<compile_context>
chip_gen: v7x
topology: tpu7x:2x2x1
jax: 0.10.0
libtpu: 0.0.40
codegen_flags: <defaults>
</compile_context>

<pallas_src>
import numpy as np
import jax
import jax.numpy as jnp
from jax.experimental import pallas as pl
from jax.experimental.pallas import tpu as pltpu


def _gelu_tanh(h):
    # tanh-approximate GELU: 0.5*h*(1 + tanh(sqrt(2/pi)*(h + 0.044715*h^3)))
    c = 0.7978845608028654
    return 0.5 * h * (1.0 + jnp.tanh(c * (h + 0.044715 * h * h * h)))


def _mlp_kernel(x_ref, w1_ref, b1_ref, w2_ref, b2_ref, o_ref):
    # x_ref: (TM, C_in); w1_ref: (C_in, H); b1_ref: (1, H)
    # w2_ref: (H, C_out); b2_ref: (1, C_out); o_ref: (TM, C_out)
    x = x_ref[...].astype(w1_ref.dtype)        # no-op cast when dtypes match
    h = jnp.dot(x, w1_ref[...], preferred_element_type=jnp.float32)
    h = h + b1_ref[...]                        # bias add in f32
    h = _gelu_tanh(h)                          # GELU in f32 (tanh on EUP)
    y = jnp.dot(h.astype(w2_ref.dtype), w2_ref[...],
                preferred_element_type=jnp.float32)
    y = y + b2_ref[...]
    o_ref[...] = y.astype(o_ref.dtype)


def mlp_forward(x, w1, b1, w2, b2, *, block_m=512, compute_dtype=jnp.float32):
    """Fused Mlp forward.  x: (..., C_in) -> (..., C_out)."""
    orig_lead = x.shape[:-1]
    c_in = x.shape[-1]
    hidden = w1.shape[1]
    c_out = w2.shape[1]
    assert w1.shape == (c_in, hidden)
    assert w2.shape == (hidden, c_out)

    # Cast weights for the MXU once in the wrapper (bf16 on v6e/v7x if wanted);
    # biases stay f32 (added after the f32 accumulate).
    w1c = w1.astype(compute_dtype)
    w2c = w2.astype(compute_dtype)
    b1c = b1.astype(jnp.float32).reshape(1, hidden)
    b2c = b2.astype(jnp.float32).reshape(1, c_out)

    xm = x.reshape(-1, c_in)
    m = xm.shape[0]

    # Pick the M block: start large, shrink so the grid has >=2 steps when the
    # problem allows (keeps both v7x TensorCores busy), never below 128 rows.
    bm = max(128, min(block_m, pl.cdiv(m, 128) * 128))
    while bm > 128 and pl.cdiv(m, bm) < 2:
        bm //= 2
    m_pad = pl.cdiv(m, bm) * bm
    if m_pad != m:
        xm = jnp.pad(xm, ((0, m_pad - m), (0, 0)))
    grid = (m_pad // bm,)

    itemsize = jnp.dtype(x.dtype).itemsize
    w_itemsize = jnp.dtype(compute_dtype).itemsize
    est_bytes = (
        (c_in * hidden + hidden * c_out) * w_itemsize        # resident weights
        + (hidden + c_out) * 4                               # biases
        + 2 * bm * (c_in + c_out) * itemsize                 # double-buffered tiles
        + bm * hidden * 4                                    # hidden activation
    )
    vmem_limit = int(min(32 * 2**20, max(8 * 2**20, 4 * est_bytes)))

    cost = pl.CostEstimate(
        flops=2 * m_pad * c_in * hidden + 2 * m_pad * hidden * c_out,
        transcendentals=m_pad * hidden,
        bytes_accessed=(m_pad * (c_in + c_out) * itemsize
                        + (c_in * hidden + hidden * c_out) * w_itemsize
                        + (hidden + c_out) * 4),
    )

    out = pl.pallas_call(
        _mlp_kernel,
        out_shape=jax.ShapeDtypeStruct((m_pad, c_out), x.dtype),
        grid=grid,
        in_specs=[
            pl.BlockSpec((bm, c_in), lambda i: (i, 0)),
            pl.BlockSpec((c_in, hidden), lambda i: (0, 0)),
            pl.BlockSpec((1, hidden), lambda i: (0, 0)),
            pl.BlockSpec((hidden, c_out), lambda i: (0, 0)),
            pl.BlockSpec((1, c_out), lambda i: (0, 0)),
        ],
        out_specs=pl.BlockSpec((bm, c_out), lambda i: (i, 0)),
        compiler_params=pltpu.CompilerParams(
            dimension_semantics=("parallel",),
            vmem_limit_bytes=vmem_limit,
        ),
        cost_estimate=cost,
    )(xm, w1c, b1c, w2c, b2c)

    out = out[:m]
    return out.reshape(*orig_lead, c_out)


def reference_mlp(x, w1, b1, w2, b2):
    """Pure-JAX reference of the PyTorch forward (dropout p=0, tanh-GELU)."""
    h = x @ w1 + b1.reshape(-1)
    h = _gelu_tanh(h)
    return h @ w2 + b2.reshape(-1)


if __name__ == "__main__":
    # Small config consistent with the module: token stream (b, n, c) with
    # in_features=128, hidden_features=256 (mlp_ratio=2), out_features=128.
    B, N = 2, 512
    in_features = 128
    hidden_features = 256
    out_features = in_features

    key = jax.random.PRNGKey(0)
    k_x, k_w1, k_b1, k_w2, k_b2 = jax.random.split(key, 5)

    x = jax.random.normal(k_x, (B, N, in_features), dtype=jnp.float32)
    # Weights stored transposed (in, out) so y = x @ W + b matches nn.Linear.
    w1 = 0.1 * jax.random.normal(k_w1, (in_features, hidden_features), jnp.float32)
    b1 = 0.1 * jax.random.normal(k_b1, (1, hidden_features), jnp.float32)
    w2 = 0.1 * jax.random.normal(k_w2, (hidden_features, out_features), jnp.float32)
    b2 = 0.1 * jax.random.normal(k_b2, (1, out_features), jnp.float32)

    ref = reference_mlp(x, w1, b1, w2, b2)

    # f32 compute path (tight tolerance).
    out = mlp_forward(x, w1, b1, w2, b2, compute_dtype=jnp.float32)
    out = jax.block_until_ready(out)
    np.testing.assert_allclose(np.asarray(out), np.asarray(ref),
                               rtol=1e-4, atol=1e-4)

    # bf16 MXU path (v6e/v7x perf option) — looser tolerance vs f32 reference.
    out_bf16 = mlp_forward(x, w1, b1, w2, b2, compute_dtype=jnp.bfloat16)
    out_bf16 = jax.block_until_ready(out_bf16)
    np.testing.assert_allclose(np.asarray(out_bf16), np.asarray(ref),
                               rtol=5e-2, atol=5e-2)

    print("KERNEL_OK")
</pallas_src>

<mosaic_0001>
module attributes {stable_mosaic.version = 11 : i64} {
  func.func @_mlp_kernel(%arg0: i32, %arg1: memref<512x128xf32, #tpu.memory_space<vmem>>, %arg2: memref<128x256xf32, #tpu.memory_space<vmem>>, %arg3: memref<1x256xf32, #tpu.memory_space<vmem>>, %arg4: memref<256x128xf32, #tpu.memory_space<vmem>>, %arg5: memref<1x128xf32, #tpu.memory_space<vmem>>, %arg6: memref<512x128xf32, #tpu.memory_space<vmem>>) attributes {dimension_semantics = [#tpu.dimension_semantics<parallel>], iteration_bounds = array<i64: 2>, scalar_prefetch = 0 : i64, scratch_operands = 0 : i64, tpu.core_type = #tpu.core_type<tc>, window_params = [{transform_indices = @transform_0, window_bounds = array<i64: 512, 128>}, {pipeline_mode = #tpu.pipeline_mode<synchronous>, transform_indices = @transform_1, window_bounds = array<i64: 128, 256>}, {pipeline_mode = #tpu.pipeline_mode<synchronous>, transform_indices = @transform_2, window_bounds = array<i64: 1, 256>}, {pipeline_mode = #tpu.pipeline_mode<synchronous>, transform_indices = @transform_3, window_bounds = array<i64: 256, 128>}, {pipeline_mode = #tpu.pipeline_mode<synchronous>, transform_indices = @transform_4, window_bounds = array<i64: 1, 128>}, {transform_indices = @transform_5, window_bounds = array<i64: 512, 128>}]} {
    %c0 = arith.constant 0 : index
    %c0_0 = arith.constant 0 : index
    %0 = vector.load %arg1[%c0, %c0_0] : memref<512x128xf32, #tpu.memory_space<vmem>>, vector<512x128xf32>
    %c0_1 = arith.constant 0 : index
    %c0_2 = arith.constant 0 : index
    %1 = vector.load %arg2[%c0_1, %c0_2] : memref<128x256xf32, #tpu.memory_space<vmem>>, vector<128x256xf32>
    %cst = arith.constant dense<0.000000e+00> : vector<512x256xf32>
    %2 = tpu.matmul %0, %1, %cst {dimension_numbers = #tpu.dot_dimension_numbers<[1], [0], [0], [1], [0, 0, 1, 1], [], []>} : vector<512x128xf32>, vector<128x256xf32>, vector<512x256xf32> -> vector<512x256xf32>
    %c0_3 = arith.constant 0 : index
    %c0_4 = arith.constant 0 : index
    %3 = vector.load %arg3[%c0_3, %c0_4] : memref<1x256xf32, #tpu.memory_space<vmem>>, vector<1x256xf32>
    %4 = vector.broadcast %3 : vector<1x256xf32> to vector<512x256xf32>
    %5 = arith.addf %2, %4 : vector<512x256xf32>
    %cst_5 = arith.constant 5.000000e-01 : f32
    %6 = vector.broadcast %cst_5 : f32 to vector<512x256xf32>
    %7 = arith.mulf %6, %5 : vector<512x256xf32>
    %cst_6 = arith.constant 4.471500e-02 : f32
    %8 = vector.broadcast %cst_6 : f32 to vector<512x256xf32>
    %9 = arith.mulf %8, %5 : vector<512x256xf32>
    %10 = arith.mulf %9, %5 : vector<512x256xf32>
    %11 = arith.mulf %10, %5 : vector<512x256xf32>
    %12 = arith.addf %5, %11 : vector<512x256xf32>
    %cst_7 = arith.constant 0.797884583 : f32
    %13 = vector.broadcast %cst_7 : f32 to vector<512x256xf32>
    %14 = arith.mulf %13, %12 : vector<512x256xf32>
    %15 = math.tanh %14 : vector<512x256xf32>
    %cst_8 = arith.constant 1.000000e+00 : f32
    %16 = vector.broadcast %cst_8 : f32 to vector<512x256xf32>
    %17 = arith.addf %16, %15 : vector<512x256xf32>
    %18 = arith.mulf %7, %17 : vector<512x256xf32>
    %c0_9 = arith.constant 0 : index
    %c0_10 = arith.constant 0 : index
    %19 = vector.load %arg4[%c0_9, %c0_10] : memref<256x128xf32, #tpu.memory_space<vmem>>, vector<256x128xf32>
    %cst_11 = arith.constant dense<0.000000e+00> : vector<512x128xf32>
    %20 = tpu.matmul %18, %19, %cst_11 {dimension_numbers = #tpu.dot_dimension_numbers<[1], [0], [0], [1], [0, 0, 1, 1], [], []>} : vector<512x256xf32>, vector<256x128xf32>, vector<512x128xf32> -> vector<512x128xf32>
    %c0_12 = arith.constant 0 : index
    %c0_13 = arith.constant 0 : index
    %21 = vector.load %arg5[%c0_12, %c0_13] : memref<1x128xf32, #tpu.memory_space<vmem>>, vector<1x128xf32>
    %22 = vector.broadcast %21 : vector<1x128xf32> to vector<512x128xf32>
    %23 = arith.addf %20, %22 : vector<512x128xf32>
    %c0_14 = arith.constant 0 : index
    %c0_15 = arith.constant 0 : index
    %24 = vector.load %arg6[%c0_14, %c0_15] : memref<512x128xf32, #tpu.memory_space<vmem>>, vector<512x128xf32>
    tpu.vector_store %arg6[%c0_14, %c0_15], %23 {strides = array<i32>} : memref<512x128xf32, #tpu.memory_space<vmem>>, vector<512x128xf32>,
    return
  }
  func.func @transform_0(%arg0: i32) -> (i32, i32) {
    %c0_i32 = arith.constant 0 : i32
    %c0_i32_0 = arith.constant 0 : i32
    return %arg0, %c0_i32 : i32, i32
  }
  func.func @transform_1(%arg0: i32) -> (i32, i32) {
    %c0_i32 = arith.constant 0 : i32
    %c0_i32_0 = arith.constant 0 : i32
    %c0_i32_1 = arith.constant 0 : i32
    return %c0_i32, %c0_i32_0 : i32, i32
  }
  func.func @transform_2(%arg0: i32) -> (i32, i32) {
    %c0_i32 = arith.constant 0 : i32
    %c0_i32_0 = arith.constant 0 : i32
    %c0_i32_1 = arith.constant 0 : i32
    return %c0_i32, %c0_i32_0 : i32, i32
  }
  func.func @transform_3(%arg0: i32) -> (i32, i32) {
    %c0_i32 = arith.constant 0 : i32
    %c0_i32_0 = arith.constant 0 : i32
    %c0_i32_1 = arith.constant 0 : i32
    return %c0_i32, %c0_i32_0 : i32, i32
  }
  func.func @transform_4(%arg0: i32) -> (i32, i32) {
    %c0_i32 = arith.constant 0 : i32
    %c0_i32_0 = arith.constant 0 : i32
    %c0_i32_1 = arith.constant 0 : i32
    return %c0_i32, %c0_i32_0 : i32, i32
  }
  func.func @transform_5(%arg0: i32) -> (i32, i32) {
    %c0_i32 = arith.constant 0 : i32
    %c0_i32_0 = arith.constant 0 : i32
    return %arg0, %c0_i32 : i32, i32
  }
}

</mosaic_0001>

<bundles_post_ra>
// kernel: tpu_custom_call.1
= control target key start
LH: loop header
LB: loop body
LE: loop exit
PB: predicated region body
PF: predicated region fallthrough
CT: control target
= control target key end

     0   :  { %10 = vsyncpa [#allocation3], 0  ;;  %s5509_s0 = inlined_call_operand.hbm [shape: f32[1024,128], index: 0, kind: input, shape index: {}]   ;;  %s5510_s1 = inlined_call_operand.hbm [shape: f32[128,256], index: 1, kind: input, shape index: {}]   ;;  %s5511_s2 = inlined_call_operand.vmem [shape: f32[1,256], index: 2, kind: input, shape index: {}]   ;;  %s5512_s3 = inlined_call_operand.hbm [shape: f32[256,128], index: 3, kind: input, shape index: {}]   ;;  %s5513_s4 = inlined_call_operand.vmem [shape: f32[1,128], index: 4, kind: input, shape index: {}]   ;;  %s5514_s5 = inlined_call_operand.hbm [shape: f32[1024,128], index: 5, kind: output, shape index: {}]  }
   0x1   :  { %12 = vsyncpa [#allocation3 + $0x1], 0 }
   0x2   :  { %13 = vsyncpa [#allocation6], 0 }
   0x3   :  { %14 = vsyncpa [#allocation4], 0 }
   0x4   :  { %16 = vsyncpa [#allocation4 + $0x1], 0  ;;  %s3241_s18 = smov 0   ;;  %s3243_s19 = smov 0  }
   0x5   :  { %s3245_s20 = smov 0   ;;  %s3247_s21 = smov 0  }
   0x6 LB: > { %s3262_s22 = sadd.s32 4294967295, %s3197_s21   ;;  %s2577_s23 = sadd.s32 4294967294, %s3197_s21   ;;  %s3197_s21 = sphi %s3247_s21, %s5548_s21   ;;  %s3193_s20 = sphi %s3245_s20, %s5547_s20   ;;  %s3189_s19 = sphi %s3243_s19, %s5546_s19   ;;  %s3185_s18 = sphi %s3241_s18, %s5545_s18  }
   0x7   : > { %p42_p0 = scmp.ne.s32.totalorder %s3189_s19, %s3185_s18  ;;  %p5515_p1 = scmp.eq.s32.totalorder %s3262_s22, 0 }
   0x8   : > { %p156_p3 = scmp.eq.s32.totalorder %s2577_s23, 1  ;;  %p2578_p5 = scmp.ge.s32.totalorder %s3197_s21, 1 }
   0x9   : > { %p3271_p4 = por %p5515_p1, %p42_p0  ;;  %p163_p7 = scmp.lt.s32.totalorder %s3197_s21, 3 }
   0xa   : > { %p3276_p6 = por %p156_p3, %p42_p0  ;;  %s3199_s27 = smov [#allocation5]  }
   0xb   : > { %s5518_s24 = scalar_select %p3271_p4, 1, 0 }
   0xc   : > { %s5519_s25 = scalar_select %p3276_p6, 1, 0 }
   0xd   : > { %p3281_p8 = pnand %p2578_p5, %p163_p7  ;;  %s175_s28 = sshll.u32 %s3199_s27, 4  ;;  %s3285_s28 = int_to_ptr.vmem [resolvable:$true] %s175_s28 }
   0xe   : > { %s3200_s30 = smov [#allocation7]   ;;  %s3041_s9 = scalar_lea.hbm %s5510_s1, 4096 }
   0xf   : > { %p2722_p9 = pneg %p3281_p8  ;;  %s191_s6 = sshll.u32 %s3200_s30, 4  ;;  %s3296_s6 = int_to_ptr.vmem [resolvable:$true] %s191_s6 }
  0x10   : > { %p3042_p12 = scmp.ne.s32.totalorder %s5510_s1, %s3041_s9  ;;  %p3048_p5 = scmp.lt.u32.totalorder %s3041_s9, %s5510_s1 }
  0x11   : > { %p3292_p11 = pnand %p2722_p9, %p5515_p1 }
  0x13   : > { %p3043_p13 = pneg %p3292_p11 }
  0x15   : > { %p3044_p0 = pnand %p3043_p13, %p3042_p12 }
  0x17   : > { %p3045_p3 = pneg %p3044_p0 }
  0x19   : > { %p3050_p7 = pnand %p3048_p5, %p3045_p3 }
  0x1b   : > { %3053 = shalt.err (!%p3050_p7)
}
  0x1c   : > { %s3054_s14 = scalar_lea.vmem %s3285_s28, 4096  ;;  %p3062_p2 = scmp.lt.s32.totalorder %s3285_s28, %s3285_s28 }
  0x1d   : > { %p3055_p9 = scmp.ne.s32.totalorder %s3285_s28, %s3054_s14  ;;  %p3063_p12 = scmp.lt.s32.totalorder %s3054_s14, %s3054_s14 }
  0x1f   : > { %p3057_p10 = pnand %p3055_p9, %p3043_p13  ;;  %p3064_p0 = por %p3063_p12, %p3062_p2 }
  0x21   : > { %p3058_p1 = pneg %p3057_p10 }
  0x23   : > { %p3065_p6 = pnand %p3064_p0, %p3058_p1 }
  0x25   : > { %3068 = shalt.err (!%p3065_p6)
}
  0x26   : > { %s3201_s15 = smov 256   ;;  %s3202_s16 = smov 16  }
  0x27   : > { %2725 = dma.hbm_to_vmem [thread:$0]  (!%p3292_p11), %s5510_s1, 4096, %s3285_s28, [#allocation6], %s3201_s15, %s3201_s15, %s3202_s16  }
  0x28   : > { %s3069_s7 = scalar_lea.hbm %s5512_s3, 4096 }
  0x29   : > { %p3070_p2 = scmp.ne.s32.totalorder %s5512_s3, %s3069_s7  ;;  %p3076_p10 = scmp.lt.u32.totalorder %s3069_s7, %s5512_s3 }
  0x2b   : > { %p3072_p1 = pnand %p3070_p2, %p3043_p13 }
  0x2d   : > { %p3073_p6 = pneg %p3072_p1 }
  0x2f   : > { %p3078_p3 = pnand %p3076_p10, %p3073_p6 }
  0x31   : > { %3081 = shalt.err (!%p3078_p3)
}
  0x32   : > { %s3082_s28 = scalar_lea.vmem %s3296_s6, 4096  ;;  %p3090_p12 = scmp.lt.s32.totalorder %s3296_s6, %s3296_s6 }
  0x33   : > { %p3083_p5 = scmp.ne.s32.totalorder %s3296_s6, %s3082_s28  ;;  %p3091_p0 = scmp.lt.s32.totalorder %s3082_s28, %s3082_s28 }
  0x35   : > { %p3085_p7 = pnand %p3083_p5, %p3043_p13  ;;  %p3092_p2 = por %p3091_p0, %p3090_p12 }
  0x37   : > { %p3086_p9 = pneg %p3085_p7 }
  0x39   : > { %p3093_p1 = pnand %p3092_p2, %p3086_p9 }
  0x3b   : > { %3096 = shalt.err (!%p3093_p1)
}
  0x3c   : > { %s3203_s12 = smov 128   ;;  %s3204_s13 = smov 8  }
  0x3d   : > { %2728 = dma.hbm_to_vmem [thread:$0]  (!%p3292_p11), %s5512_s3, 4096, %s3296_s6, [#allocation6], %s3203_s12, %s3203_s12, %s3204_s13  }
  0x3e   : > { %s3354_s16 = sadd.s32 1, %s3197_s21   ;;  %s29_s23 = sadd.s32 1, %s3193_s20 }
  0x3f   : > { %s26_s17 = ssub.s32 %s3197_s21, %s3354_s16  ;;  %p36_p6 = scmp.ne.s32.totalorder %s3193_s20, %s3189_s19 }
  0x40   : > { %p27_p13 = scmp.eq.s32.totalorder %s26_s17, 0  ;;  %p37_p10 = scmp.eq.s32.totalorder %s3197_s21, 0 }
  0x41   : > { %p5522_p5 = scmp.eq.s32.totalorder %s3262_s22, 1  ;;  %p2739_p9 = scmp.lt.s32.totalorder %s3197_s21, 2 }
  0x42   : > { %s3363_s27 = scalar_select %p27_p13, %s3193_s20, %s29_s23  }
  0x43   : > { %p38_p3 = por %p37_p10, %p36_p6  ;;  %p3367_p7 = por %p5522_p5, %p36_p6 }
  0x44   : > { %s208_s30 = sand.u32 1, %s3193_s20   ;;  %s2596_s6 = sshll.u32 %s3197_s21, 13 }
  0x45   : > { %s5523_s29 = scalar_select %p3367_p7, 1, 0 }
  0x46   : > { %s2582_s7 = sshll.u32 %s208_s30, 9  ;;  %s3377_s10 = scalar_lea.hbm %s5509_s0, %s2596_s6 }
  0x47   : > { %s212_s11 = scalar_lea.vmem [#allocation2], %s2582_s7  ;;  %p3381_p11 = pnand %p2739_p9, %p38_p3 }
  0x48   : > { %s219_s28 = sshll.u32 %s212_s11, 4  ;;  %s3385_s15 = scalar_lea.sflag [#allocation3], %s208_s30  ;;  %s3379_s28 = int_to_ptr.vmem [resolvable:$true] %s219_s28 }
  0x49   : > { %s3097_s17 = scalar_lea.hbm %s3377_s10, 8192  ;;  %p3099_p0 = pneg %p3381_p11 }
  0x4a   : > { %p3098_p12 = scmp.ne.s32.totalorder %s3377_s10, %s3097_s17  ;;  %s3102_s6 = scalar_lea.hbm %s5509_s0, 16384 }
  0x4b   : > { %p3103_p13 = scmp.lt.u32.totalorder %s3377_s10, %s5509_s0  ;;  %p3104_p6 = scmp.lt.u32.totalorder %s3102_s6, %s3097_s17 }
  0x4c   : > { %p3100_p2 = pnand %p3099_p0, %p3098_p12  ;;  %p3106_p3 = scmp.lt.u32.totalorder %s3097_s17, %s3377_s10 }
  0x4d   : > { %p3105_p10 = por %p3104_p6, %p3103_p13 }
  0x4e   : > { %p3101_p1 = pneg %p3100_p2 }
  0x4f   : > { %p3107_p5 = por %p3106_p3, %p3105_p10 }
  0x51   : > { %p3108_p9 = pnand %p3107_p5, %p3101_p1 }
  0x53   : > { %3111 = shalt.err (!%p3108_p9)
}
  0x54   : > { %s3112_s30 = scalar_lea.vmem %s3379_s28, 8192  ;;  %s3205_s11 = smov [#allocation2]  }
  0x55   : > { %p3113_p12 = scmp.ne.s32.totalorder %s3379_s28, %s3112_s30  ;;  %s3117_s23 = sshll.u32 %s3205_s11, 4  ;;  %s3118_s23 = int_to_ptr.vmem [resolvable:$false] %s3117_s23 }
  0x56   : > { %s3119_s7 = scalar_lea.vmem %s3118_s23, 16384  ;;  %p3120_p4 = scmp.lt.s32.totalorder %s3379_s28, %s3118_s23 }
  0x57   : > { %p3115_p2 = pnand %p3113_p12, %p3099_p0  ;;  %p3121_p13 = scmp.lt.s32.totalorder %s3119_s7, %s3112_s30 }
  0x59   : > { %p3116_p7 = pneg %p3115_p2  ;;  %p3122_p6 = por %p3121_p13, %p3120_p4 }
  0x5b   : > { %p3123_p10 = pnand %p3122_p6, %p3116_p7 }
  0x5d   : > { %3126 = shalt.err (!%p3123_p10)
}
  0x5e   : > { %2732 = dma.hbm_to_vmem [thread:$0]  (!%p3381_p11), %s3377_s10, 8192, %s3379_s28, %s3385_s15, %s3203_s12, %s3203_s12, %s3204_s13  }
  0x5f   : > { %231 = sbr.rel (%p3281_p8) target bundleno = 926 (0x39e), region = 40 }
  0x66   : > { %s3419_s17 = sand.u32 1, %s3189_s19   ;;  %p5525_p4 = scmp.ne.s32.totalorder %s5518_s24, 0 }
  0x67   : > { %s2586_s6 = sshll.u32 %s3419_s17, 9  ;;  %s234_s8 = scalar_lea.sflag [#allocation3], %s3419_s17 }
  0x68   : > { %s3425_s14 = scalar_lea.vmem [#allocation2], %s2586_s6 }
  0x69   : > { %3172 = dma.done.wait (%p5525_p4), %s234_s8, 8192  }
  0x6a   : > { %3174 = vsyncadd (%p5525_p4), %s234_s8, 4294959104  ;;  %p5526_p7 = scmp.eq.s32.totalorder %s3262_s22, 0 }
  0x6c   : > { %3176 = dma.done.wait (%p5526_p7), [#allocation6], 8192   ;;  %p5527_p8 = pmov %p5526_p7 }
  0x6d   : > { %v3206_v0 = vmov 0.0   ;;  %v339_v1 = vld [vmem:[#allocation5 + $0x8] sm:$0xff]  ;;  %v341_v2 = vld [vmem:[#allocation5 + $0x18] sm:$0xff]  ;;  %v338_v3 = vld [vmem:[#allocation5] sm:$0xff]  ;;  %s5235_s10 = scalar_lea.vmem [#allocation8], %s2586_s6  ;;  %s2597_s28 = sshll.u32 %s3262_s22, 13 }
  0x6e   : > { %3178 = vsyncadd (%p5527_p8), [#allocation6], 4294959104  ;;  %446 = vmatprep.mubr.f32.mxu0 %v3206_v0  ;;  %v2598_v4 = vpack.c.bf16 %v341_v2, %v339_v1  ;;  %v340_v5 = vld [vmem:[#allocation5 + $0x10] sm:$0xff]  ;;  %v343_v6 = vld [vmem:[#allocation5 + $0x28] sm:$0xff]  ;;  %s2485_s15 = sshll.u32 %s5235_s10, 4  ;;  %s5461_s11 = scalar_lea.hbm %s5514_s5, %s2597_s28  ;;  %s5463_s15 = int_to_ptr.vmem [resolvable:$true] %s2485_s15 }
  0x6f   : > { %v345_v7 = vld [vmem:[#allocation5 + $0x38] sm:$0xff]  ;;  %v2600_v8 = vpack.c.bf16 %v340_v5, %v338_v3  ;;  %v342_v10 = vld [vmem:[#allocation5 + $0x20] sm:$0xff]  ;;  %v344_v11 = vld [vmem:[#allocation5 + $0x30] sm:$0xff]  ;;  %s2472_s23 = scalar_lea.sflag [#allocation4], %s3419_s17  ;;  %s3127_s7 = scalar_lea.vmem %s5463_s15, 8192 }
  0x70   : > { %v2602_v9 = vpack.c.bf16 %v345_v7, %v343_v6  ;;  %v347_v12 = vld [vmem:[#allocation5 + $0x48] sm:$0xff]  ;;  %2599 = vmatprep.subr.bf16.mxu0 %v2598_v4  ;;  %v349_v13 = vld [vmem:[#allocation5 + $0x58] sm:$0xff]  ;;  %v2604_v14 = vpack.c.bf16 %v344_v11, %v342_v10  ;;  %v346_v16 = vld [vmem:[#allocation5 + $0x40] sm:$0xff]  ;;  %v3207_v6 = vmov 0.0|0.0   ;;  %p3128_p11 = scmp.ne.s32.totalorder %s5463_s15, %s3127_s7  ;;  %p5542_p0 = scmp.ne.s32.totalorder %s5523_s29, 0 }
  0x71   : > { %2601 = vmatpush1.bf16.msra.mxu0 %v2600_v8  ;;  %v2606_v15 = vpack.c.bf16 %v349_v13, %v347_v12  ;;  %v348_v17 = vld [vmem:[#allocation5 + $0x50] sm:$0xff]  ;;  %v351_v18 = vld [vmem:[#allocation5 + $0x68] sm:$0xff]  ;;  %v353_v19 = vld [vmem:[#allocation5 + $0x78] sm:$0xff]  ;;  %2678 = vmatprep.subr.bf16.mxu1 %v3207_v6  ;;  %s3208_s22 = smov [#allocation8]  }
  0x72   : > { %2603 = vmatprep.subr.bf16.mxu0 %v2602_v9  ;;  %v2608_v20 = vpack.c.bf16 %v348_v17, %v346_v16  ;;  %v2610_v21 = vpack.c.bf16 %v353_v19, %v351_v18  ;;  %v350_v22 = vld [vmem:[#allocation5 + $0x60] sm:$0xff]  ;;  %v352_v23 = vld [vmem:[#allocation5 + $0x70] sm:$0xff]  ;;  %v355_v24 = vld [vmem:[#allocation5 + $0x88] sm:$0xff]  ;;  %p3129_p1 = pnand %p3128_p11, %p5542_p0  ;;  %s3131_s6 = sshll.u32 %s3208_s22, 4  ;;  %s3132_s6 = int_to_ptr.vmem [resolvable:$false] %s3131_s6 }
  0x73   : > { %v357_v25 = vld [vmem:[#allocation5 + $0x98] sm:$0xff]  ;;  %v2612_v26 = vpack.c.bf16 %v352_v23, %v350_v22  ;;  %v354_v28 = vld [vmem:[#allocation5 + $0x80] sm:$0xff]  ;;  %v356_v29 = vld [vmem:[#allocation5 + $0x90] sm:$0xff]  ;;  %s3133_s8 = scalar_lea.vmem %s3132_s6, 16384  ;;  %p3134_p5 = scmp.lt.s32.totalorder %s5463_s15, %s3132_s6 }
  0x74   : > { %v2614_v27 = vpack.c.bf16 %v357_v25, %v355_v24  ;;  %v359_v30 = vld [vmem:[#allocation5 + $0xa8] sm:$0xff]  ;;  %v361_v31 = vld [vmem:[#allocation5 + $0xb8] sm:$0xff]  ;;  %v2616_v32 = vpack.c.bf16 %v356_v29, %v354_v28  ;;  %v358_v34 = vld [vmem:[#allocation5 + $0xa0] sm:$0xff]  ;;  %p3130_p3 = pneg %p3129_p1  ;;  %p3135_p9 = scmp.lt.s32.totalorder %s3133_s8, %s3127_s7 }
  0x75   : > { %2605 = vmatpush1.bf16.msra.mxu0 %v2604_v14  ;;  %v2618_v33 = vpack.c.bf16 %v361_v31, %v359_v30  ;;  %v360_v35 = vld [vmem:[#allocation5 + $0xb0] sm:$0xff]  ;;  %v363_v36 = vld [vmem:[#allocation5 + $0xc8] sm:$0xff]  ;;  %v365_v37 = vld [vmem:[#allocation5 + $0xd8] sm:$0xff] }
  0x76   : > { %2607 = vmatprep.subr.bf16.mxu0 %v2606_v15  ;;  %v2620_v38 = vpack.c.bf16 %v360_v35, %v358_v34  ;;  %v2622_v39 = vpack.c.bf16 %v365_v37, %v363_v36  ;;  %v362_v40 = vld [vmem:[#allocation5 + $0xc0] sm:$0xff]  ;;  %v364_v41 = vld [vmem:[#allocation5 + $0xd0] sm:$0xff]  ;;  %v367_v42 = vld [vmem:[#allocation5 + $0xe8] sm:$0xff]  ;;  %p3136_p12 = por %p3135_p9, %p3134_p5 }
  0x77   : > { %v369_v43 = vld [vmem:[#allocation5 + $0xf8] sm:$0xff]  ;;  %v2624_v44 = vpack.c.bf16 %v364_v41, %v362_v40  ;;  %v366_v46 = vld [vmem:[#allocation5 + $0xe0] sm:$0xff]  ;;  %v368_v47 = vld [vmem:[#allocation5 + $0xf0] sm:$0xff] }
  0x78   : > { %v2626_v45 = vpack.c.bf16 %v369_v43, %v367_v42  ;;  %v2628_v48 = vpack.c.bf16 %v368_v47, %v366_v46  ;;  %v274_v49 = vld [vmem:[%s3425_s14] sm:$0xff]  ;;  %v275_v50 = vld [vmem:[%s3425_s14 + $0x8] sm:$0xff]  ;;  %v276_v51 = vld [vmem:[%s3425_s14 + $0x10] sm:$0xff]  ;;  %p3137_p2 = pnand %p3136_p12, %p3130_p3 }
  0x79   : > { %2609 = vmatpush1.bf16.msra.mxu0 %v2608_v20  ;;  %v277_v52 = vld [vmem:[%s3425_s14 + $0x18] sm:$0xff]  ;;  %v278_v53 = vld [vmem:[%s3425_s14 + $0x20] sm:$0xff]  ;;  %v279_v54 = vld [vmem:[%s3425_s14 + $0x28] sm:$0xff] }
  0x7a   : > { %2611 = vmatprep.subr.bf16.mxu0 %v2610_v21  ;;  %v280_v55 = vld [vmem:[%s3425_s14 + $0x30] sm:$0xff]  ;;  %v281_v56 = vld [vmem:[%s3425_s14 + $0x38] sm:$0xff]  ;;  %v282_v57 = vld [vmem:[%s3425_s14 + $0x40] sm:$0xff] }
  0x7b   : > { %v283_v58 = vld [vmem:[%s3425_s14 + $0x48] sm:$0xff]  ;;  %v284_v59 = vld [vmem:[%s3425_s14 + $0x50] sm:$0xff]  ;;  %v285_v60 = vld [vmem:[%s3425_s14 + $0x58] sm:$0xff] }
  0x7c   : > { %v286_v61 = vld [vmem:[%s3425_s14 + $0x60] sm:$0xff]  ;;  %v287_v62 = vld [vmem:[%s3425_s14 + $0x68] sm:$0xff]  ;;  %v288_v63 = vld [vmem:[%s3425_s14 + $0x70] sm:$0xff] }
  0x7d   : > { %2613 = vmatpush1.bf16.msra.mxu0 %v2612_v26  ;;  %v289_v1 = vld [vmem:[%s3425_s14 + $0x78] sm:$0xff]  ;;  %v290_v2 = vld [vmem:[%s3425_s14 + $0x80] sm:$0xff]  ;;  %v1984_v4 = vld [vmem:[#allocation7 + $0x8] sm:$0xff] }
  0x7e   : > { %2615 = vmatprep.subr.bf16.mxu0 %v2614_v27  ;;  %v1983_v3 = vld [vmem:[#allocation7] sm:$0xff]  ;;  %v291_v7 = vld [vmem:[%s3425_s14 + $0x88] sm:$0xff]  ;;  %v1985_v8 = vld [vmem:[#allocation7 + $0x10] sm:$0xff] }
  0x7f   : > { %v2631_v5 = vpack.c.bf16 %v1984_v4, %v1983_v3  ;;  %v1986_v9 = vld [vmem:[#allocation7 + $0x18] sm:$0xff]  ;;  %v292_v11 = vld [vmem:[%s3425_s14 + $0x90] sm:$0xff]  ;;  %v1987_v12 = vld [vmem:[#allocation7 + $0x20] sm:$0xff] }
  0x80   : > { %v2634_v10 = vpack.c.bf16 %v1986_v9, %v1985_v8  ;;  %v1988_v13 = vld [vmem:[#allocation7 + $0x28] sm:$0xff]  ;;  %v293_v15 = vld [vmem:[%s3425_s14 + $0x98] sm:$0xff]  ;;  %v1989_v16 = vld [vmem:[#allocation7 + $0x30] sm:$0xff] }
  0x81   : > { %2617 = vmatpush1.bf16.msra.mxu0 %v2616_v32  ;;  %2694 = vmatpush1.bf16.msra.mxu1 %v2631_v5  ;;  %v2637_v14 = vpack.c.bf16 %v1988_v13, %v1987_v12  ;;  %v1990_v17 = vld [vmem:[#allocation7 + $0x38] sm:$0xff]  ;;  %v294_v19 = vld [vmem:[%s3425_s14 + $0xa0] sm:$0xff]  ;;  %v1992_v21 = vld [vmem:[#allocation7 + $0x48] sm:$0xff] }
  0x82   : > { %2619 = vmatprep.subr.bf16.mxu0 %v2618_v33  ;;  %2679 = vmatprep.subr.bf16.mxu1 %v3207_v6  ;;  %v2640_v18 = vpack.c.bf16 %v1990_v17, %v1989_v16  ;;  %v1991_v20 = vld [vmem:[#allocation7 + $0x40] sm:$0xff]  ;;  %v295_v23 = vld [vmem:[%s3425_s14 + $0xa8] sm:$0xff]  ;;  %v1993_v24 = vld [vmem:[#allocation7 + $0x50] sm:$0xff] }
  0x83   : > { %v2643_v22 = vpack.c.bf16 %v1992_v21, %v1991_v20  ;;  %v1994_v25 = vld [vmem:[#allocation7 + $0x58] sm:$0xff]  ;;  %v296_v27 = vld [vmem:[%s3425_s14 + $0xb0] sm:$0xff]  ;;  %v1995_v28 = vld [vmem:[#allocation7 + $0x60] sm:$0xff] }
  0x84   : > { %v2646_v26 = vpack.c.bf16 %v1994_v25, %v1993_v24  ;;  %v1996_v29 = vld [vmem:[#allocation7 + $0x68] sm:$0xff]  ;;  %v297_v31 = vld [vmem:[%s3425_s14 + $0xb8] sm:$0xff]  ;;  %v1997_v32 = vld [vmem:[#allocation7 + $0x70] sm:$0xff] }
  0x85   : > { %2621 = vmatpush1.bf16.msra.mxu0 %v2620_v38  ;;  %2695 = vmatpush1.bf16.msra.mxu1 %v2634_v10  ;;  %v2649_v30 = vpack.c.bf16 %v1996_v29, %v1995_v28  ;;  %v1998_v33 = vld [vmem:[#allocation7 + $0x78] sm:$0xff]  ;;  %v298_v35 = vld [vmem:[%s3425_s14 + $0xc0] sm:$0xff]  ;;  %v2000_v37 = vld [vmem:[#allocation7 + $0x88] sm:$0xff] }
  0x86   : > { %2623 = vmatprep.subr.bf16.mxu0 %v2622_v39  ;;  %2680 = vmatprep.subr.bf16.mxu1 %v3207_v6  ;;  %v2652_v34 = vpack.c.bf16 %v1998_v33, %v1997_v32  ;;  %v1999_v36 = vld [vmem:[#allocation7 + $0x80] sm:$0xff]  ;;  %v299_v39 = vld [vmem:[%s3425_s14 + $0xc8] sm:$0xff]  ;;  %v2001_v40 = vld [vmem:[#allocation7 + $0x90] sm:$0xff] }
  0x87   : > { %v2655_v38 = vpack.c.bf16 %v2000_v37, %v1999_v36  ;;  %v2002_v41 = vld [vmem:[#allocation7 + $0x98] sm:$0xff]  ;;  %v300_v43 = vld [vmem:[%s3425_s14 + $0xd0] sm:$0xff]  ;;  %v306_v4 = vld [vmem:[%s3425_s14 + $0x100] sm:$0xff] }
  0x88   : > { %v2658_v42 = vpack.c.bf16 %v2002_v41, %v2001_v40  ;;  %v301_v47 = vld [vmem:[%s3425_s14 + $0xd8] sm:$0xff]  ;;  %v310_v8 = vld [vmem:[%s3425_s14 + $0x120] sm:$0xff]  ;;  %v311_v9 = vld [vmem:[%s3425_s14 + $0x128] sm:$0xff] }
  0x89   : > { %2625 = vmatpush1.bf16.msra.mxu0 %v2624_v44  ;;  %2696 = vmatpush1.bf16.msra.mxu1 %v2637_v14  ;;  %v2003_v44 = vld [vmem:[#allocation7 + $0xa0] sm:$0xff]  ;;  %v315_v13 = vld [vmem:[%s3425_s14 + $0x148] sm:$0xff]  ;;  %v325_v25 = vld [vmem:[%s3425_s14 + $0x198] sm:$0xff] }
  0x8a   : > { %2627 = vmatprep.subr.bf16.mxu0 %v2626_v45  ;;  %2681 = vmatprep.subr.bf16.mxu1 %v3207_v6  ;;  %v2004_v45 = vld [vmem:[#allocation7 + $0xa8] sm:$0xff]  ;;  %v314_v12 = vld [vmem:[%s3425_s14 + $0x140] sm:$0xff]  ;;  %v328_v37 = vld [vmem:[%s3425_s14 + $0x1b0] sm:$0xff] }
  0x8b   : > { %v2661_v46 = vpack.c.bf16 %v2004_v45, %v2003_v44  ;;  %v318_v16 = vld [vmem:[%s3425_s14 + $0x160] sm:$0xff]  ;;  %v319_v17 = vld [vmem:[%s3425_s14 + $0x168] sm:$0xff] }
  0x8c   : > { %v322_v20 = vld [vmem:[%s3425_s14 + $0x180] sm:$0xff]  ;;  %v323_v21 = vld [vmem:[%s3425_s14 + $0x188] sm:$0xff] }
  0x8d   : > { %2629 = vmatpush1.bf16.msra.mxu0 %v2628_v48  ;;  %2697 = vmatpush1.bf16.msra.mxu1 %v2640_v18  ;;  %v2005_v48 = vld [vmem:[#allocation7 + $0xb0] sm:$0xff]  ;;  %v370_v28 = vld [vmem:[%s5511_s2] sm:$0x3]  ;;  %v327_v32 = vld [vmem:[%s3425_s14 + $0x1a8] sm:$0xff] }
  0x8e   : > { %2630 = vmatprep.subr.bf16.mxu0 %v3207_v6  ;;  %2682 = vmatprep.subr.bf16.mxu1 %v3207_v6 }
  0x90   : > { %447 = vmatmul.mubr.f32.vlgmr.msra.gmra.mrb[0].mxu0 %v274_v49  ;;  %v2006_v49 = vld [vmem:[#allocation7 + $0xb8] sm:$0xff] }
  0x91   : > { %452 = vmatprep.mubr.f32.mxu0 %v3206_v0  ;;  %2632 = vmatpush1.bf16.msra.mxu0 %v2631_v5  ;;  %v307_v5 = vld [vmem:[%s3425_s14 + $0x108] sm:$0xff] }
  0x92   : > { %2633 = vmatprep.subr.bf16.mxu0 %v3207_v6  ;;  %2698 = vmatpush1.bf16.msra.mxu1 %v2643_v22 }
  0x93   : > { %2683 = vmatprep.subr.bf16.mxu1 %v3207_v6 }
  0x94   : > { %453 = vmatmul.mubr.f32.gmra.mrb[2].mxu0 %v275_v50  ;;  %v2664_v50 = vpack.c.bf16 %v2006_v49, %v2005_v48 }
  0x95   : > { %458 = vmatprep.mubr.f32.mxu0 %v3206_v0  ;;  %2635 = vmatpush1.bf16.msra.mxu0 %v2634_v10  ;;  %v312_v10 = vld [vmem:[%s3425_s14 + $0x130] sm:$0xff] }
  0x96   : > { %2636 = vmatprep.subr.bf16.mxu0 %v3207_v6  ;;  %2699 = vmatpush1.bf16.msra.mxu1 %v2646_v26 }
  0x97   : > { %2684 = vmatprep.subr.bf16.mxu1 %v3207_v6 }
  0x98   : > { %459 = vmatmul.mubr.f32.gmra.mrb[4].mxu0 %v276_v51  ;;  %v302_v51 = vld [vmem:[%s3425_s14 + $0xe0] sm:$0xff] }
  0x99   : > { %464 = vmatprep.mubr.f32.mxu0 %v3206_v0  ;;  %2638 = vmatpush1.bf16.msra.mxu0 %v2637_v14  ;;  %v316_v14 = vld [vmem:[%s3425_s14 + $0x150] sm:$0xff] }
  0x9a   : > { %2639 = vmatprep.subr.bf16.mxu0 %v3207_v6  ;;  %2700 = vmatpush1.bf16.msra.mxu1 %v2649_v30 }
  0x9b   : > { %2685 = vmatprep.subr.bf16.mxu1 %v3207_v6 }
  0x9c   : > { %465 = vmatmul.mubr.f32.gmra.mrb[6].mxu0 %v277_v52  ;;  %v2007_v52 = vld [vmem:[#allocation7 + $0xc0] sm:$0xff] }
  0x9d   : > { %470 = vmatprep.mubr.f32.mxu0 %v3206_v0  ;;  %2641 = vmatpush1.bf16.msra.mxu0 %v2640_v18  ;;  %v320_v18 = vld [vmem:[%s3425_s14 + $0x170] sm:$0xff] }
  0x9e   : > { %2642 = vmatprep.subr.bf16.mxu0 %v3207_v6  ;;  %2701 = vmatpush1.bf16.msra.mxu1 %v2652_v34 }
  0x9f   : > { %2686 = vmatprep.subr.bf16.mxu1 %v3207_v6 }
  0xa0   : > { %471 = vmatmul.mubr.f32.gmra.mrb[8].mxu0 %v278_v53  ;;  %v2008_v53 = vld [vmem:[#allocation7 + $0xc8] sm:$0xff] }
  0xa1   : > { %476 = vmatprep.mubr.f32.mxu0 %v3206_v0  ;;  %2644 = vmatpush1.bf16.msra.mxu0 %v2643_v22  ;;  %v372_v22 = vlaneseq }
  0xa2   : > { %2645 = vmatprep.subr.bf16.mxu0 %v3207_v6  ;;  %2702 = vmatpush1.bf16.msra.mxu1 %v2655_v38 }
  0xa3   : > { %2687 = vmatprep.subr.bf16.mxu1 %v3207_v6  ;;  %v373_v24 = vshrl.u32 %v372_v22, 7 }
  0xa4   : > { %477 = vmatmul.mubr.f32.gmra.mrb[10].mxu0 %v279_v54  ;;  %v2667_v54 = vpack.c.bf16 %v2008_v53, %v2007_v52 }
  0xa5   : > { %482 = vmatprep.mubr.f32.mxu0 %v3206_v0  ;;  %2647 = vmatpush1.bf16.msra.mxu0 %v2646_v26  ;;  %v374_v26 = vsub.s32 0, %v373_v24  ;;  %v378_v29 = vsub.s32 1, %v373_v24  ;;  %v332_v24 = vld [vmem:[%s3425_s14 + $0x1d0] sm:$0xff] }
  0xa6   : > { %2648 = vmatprep.subr.bf16.mxu0 %v3207_v6  ;;  %2703 = vmatpush1.bf16.msra.mxu1 %v2658_v42 }
  0xa7   : > { %2688 = vmatprep.subr.bf16.mxu1 %v3207_v6 }
  0xa8   : > { %483 = vmatmul.mubr.f32.gmra.mrb[12].mxu0 %v280_v55  ;;  %v303_v55 = vld [vmem:[%s3425_s14 + $0xe8] sm:$0xff] }
  0xa9   : > { %488 = vmatprep.mubr.f32.mxu0 %v3206_v0  ;;  %2650 = vmatpush1.bf16.msra.mxu0 %v2649_v30  ;;  %v3576_v30 = vrot.slane %v370_v28, %v374_v26 }
  0xaa   : > { %2651 = vmatprep.subr.bf16.mxu0 %v3207_v6  ;;  %2704 = vmatpush1.bf16.msra.mxu1 %v2661_v46 }
  0xab   : > { %2689 = vmatprep.subr.bf16.mxu1 %v3207_v6 }
  0xac   : > { %489 = vmatmul.mubr.f32.gmra.mrb[14].mxu0 %v281_v56  ;;  %v2009_v56 = vld [vmem:[#allocation7 + $0xd0] sm:$0xff] }
  0xad   : > { %494 = vmatprep.mubr.f32.mxu0 %v3206_v0  ;;  %2653 = vmatpush1.bf16.msra.mxu0 %v2652_v34 }
  0xae   : > { %2654 = vmatprep.subr.bf16.mxu0 %v3207_v6  ;;  %2705 = vmatpush1.bf16.msra.mxu1 %v2664_v50 }
  0xaf   : > { %2690 = vmatprep.subr.bf16.mxu1 %v3207_v6 }
  0xb0   : > { %495 = vmatmul.mubr.f32.gmra.mrb[16].mxu0 %v282_v57  ;;  %v2010_v57 = vld [vmem:[#allocation7 + $0xd8] sm:$0xff] }
  0xb1   : > { %500 = vmatprep.mubr.f32.mxu0 %v3206_v0  ;;  %2656 = vmatpush1.bf16.msra.mxu0 %v2655_v38 }
  0xb2   : > { %2657 = vmatprep.subr.bf16.mxu0 %v3207_v6  ;;  %2706 = vmatpush1.bf16.msra.mxu1 %v2667_v54 }
  0xb3   : > { %2691 = vmatprep.subr.bf16.mxu1 %v3207_v6 }
  0xb4   : > { %501 = vmatmul.mubr.f32.gmra.mrb[18].mxu0 %v283_v58  ;;  %v2670_v58 = vpack.c.bf16 %v2010_v57, %v2009_v56 }
  0xb5   : > { %506 = vmatprep.mubr.f32.mxu0 %v3206_v0  ;;  %2659 = vmatpush1.bf16.msra.mxu0 %v2658_v42 }
  0xb6   : > { %2660 = vmatprep.subr.bf16.mxu0 %v3207_v6  ;;  %2707 = vmatpush1.bf16.msra.mxu1 %v2670_v58 }
  0xb7   : > { %2692 = vmatprep.subr.bf16.mxu1 %v3207_v6 }
  0xb8   : > { %507 = vmatmul.mubr.f32.gmra.mrb[20].mxu0 %v284_v59  ;;  %v304_v59 = vld [vmem:[%s3425_s14 + $0xf0] sm:$0xff] }
  0xb9   : > { %512 = vmatprep.mubr.f32.mxu0 %v3206_v0  ;;  %2662 = vmatpush1.bf16.msra.mxu0 %v2661_v46  ;;  %v329_v46 = vld [vmem:[%s3425_s14 + $0x1b8] sm:$0xff] }
  0xba   : > { %2663 = vmatprep.subr.bf16.mxu0 %v3207_v6 }
  0xbc   : > { %513 = vmatmul.mubr.f32.gmra.mrb[22].mxu0 %v285_v60  ;;  %v2011_v60 = vld [vmem:[#allocation7 + $0xe0] sm:$0xff] }
  0xbd   : > { %518 = vmatprep.mubr.f32.mxu0 %v3206_v0  ;;  %2665 = vmatpush1.bf16.msra.mxu0 %v2664_v50 }
  0xbe   : > { %2666 = vmatprep.subr.bf16.mxu0 %v3207_v6 }
  0xc0   : > { %519 = vmatmul.mubr.f32.gmra.mrb[24].mxu0 %v286_v61  ;;  %v2012_v61 = vld [vmem:[#allocation7 + $0xe8] sm:$0xff] }
  0xc1   : > { %524 = vmatprep.mubr.f32.mxu0 %v3206_v0  ;;  %2668 = vmatpush1.bf16.msra.mxu0 %v2667_v54 }
  0xc2   : > { %2669 = vmatprep.subr.bf16.mxu0 %v3207_v6 }
  0xc4   : > { %525 = vmatmul.mubr.f32.gmra.mrb[26].mxu0 %v287_v62  ;;  %v2673_v62 = vpack.c.bf16 %v2012_v61, %v2011_v60 }
  0xc5   : > { %530 = vmatprep.mubr.f32.mxu0 %v3206_v0  ;;  %2671 = vmatpush1.bf16.msra.mxu0 %v2670_v58  ;;  %v330_v58 = vld [vmem:[%s3425_s14 + $0x1c0] sm:$0xff] }
  0xc6   : > { %2672 = vmatprep.subr.bf16.mxu0 %v3207_v6  ;;  %2708 = vmatpush1.bf16.msra.mxu1 %v2673_v62 }
  0xc7   : > { %2693 = vmatprep.subr.bf16.mxu1 %v3207_v6 }
  0xc8   : > { %531 = vmatmul.mubr.f32.gmra.mrb[28].mxu0 %v288_v63  ;;  %v305_v63 = vld [vmem:[%s3425_s14 + $0xf8] sm:$0xff] }
  0xc9   : > { %536 = vmatprep.mubr.f32.mxu0 %v3206_v0  ;;  %2674 = vmatpush1.bf16.msra.mxu0 %v2673_v62 }
  0xca   : > { %2675 = vmatprep.subr.bf16.mxu0 %v3207_v6  ;;  %v309_v6 = vld [vmem:[%s3425_s14 + $0x118] sm:$0xff] }
  0xcc   : > { %537 = vmatmul.mubr.f32.gmra.mrb[30].mxu0 %v289_v1  ;;  %v2013_v1 = vld [vmem:[#allocation7 + $0xf0] sm:$0xff] }
  0xcd   : > { %542 = vmatprep.mubr.f32.mxu0 %v3206_v0 }
  0xd0   : > { %543 = vmatmul.mubr.f32.gmra.mrb[32].mxu0 %v290_v2  ;;  %v2014_v2 = vld [vmem:[#allocation7 + $0xf8] sm:$0xff] }
  0xd1   : > { %548 = vmatprep.mubr.f32.mxu0 %v3206_v0  ;;  %v2676_v3 = vpack.c.bf16 %v2014_v2, %v2013_v1 }
  0xd3   : > { %2677 = vmatpush1.bf16.msra.mxu0 %v2676_v3  ;;  %2709 = vmatpush1.bf16.msra.mxu1 %v2676_v3 }
  0xd4   : > { %549 = vmatmul.mubr.f32.gmra.mrb[34].mxu0 %v291_v7  ;;  %v308_v7 = vld [vmem:[%s3425_s14 + $0x110] sm:$0xff] }
  0xd5   : > { %554 = vmatprep.mubr.f32.mxu0 %v3206_v0 }
  0xd8   : > { %555 = vmatmul.mubr.f32.gmra.mrb[36].mxu0 %v292_v11  ;;  %v313_v11 = vld [vmem:[%s3425_s14 + $0x138] sm:$0xff] }
  0xd9   : > { %560 = vmatprep.mubr.f32.mxu0 %v3206_v0 }
  0xdc   : > { %561 = vmatmul.mubr.f32.gmra.mrb[38].mxu0 %v293_v15  ;;  %v317_v15 = vld [vmem:[%s3425_s14 + $0x158] sm:$0xff] }
  0xdd   : > { %566 = vmatprep.mubr.f32.mxu0 %v3206_v0 }
  0xe0   : > { %567 = vmatmul.mubr.f32.gmra.mrb[40].mxu0 %v294_v19  ;;  %v321_v19 = vld [vmem:[%s3425_s14 + $0x178] sm:$0xff] }
  0xe1   : > { %572 = vmatprep.mubr.f32.mxu0 %v3206_v0 }
  0xe4   : > { %573 = vmatmul.mubr.f32.gmra.mrb[42].mxu0 %v295_v23  ;;  %v324_v23 = vld [vmem:[%s3425_s14 + $0x190] sm:$0xff] }
  0xe5   : > { %578 = vmatprep.mubr.f32.mxu0 %v3206_v0 }
  0xe8   : > { %579 = vmatmul.mubr.f32.gmra.mrb[44].mxu0 %v296_v27  ;;  %v326_v27 = vld [vmem:[%s3425_s14 + $0x1a0] sm:$0xff] }
  0xe9   : > { %584 = vmatprep.mubr.f32.mxu0 %v3206_v0 }
  0xec   : > { %585 = vmatmul.mubr.f32.gmra.mrb[46].mxu0 %v297_v31  ;;  %v3579_v31 = vrot.slane %v370_v28, %v378_v29 }
  0xed   : > { %590 = vmatprep.mubr.f32.mxu0 %v3206_v0 }
  0xf0   : > { %591 = vmatmul.mubr.f32.gmra.mrb[48].mxu0 %v298_v35 }
  0xf1   : > { %596 = vmatprep.mubr.f32.mxu0 %v3206_v0 }
  0xf4   : > { %597 = vmatmul.mubr.f32.gmra.mrb[50].mxu0 %v299_v39 }
  0xf5   : > { %602 = vmatprep.mubr.f32.mxu0 %v3206_v0 }
  0xf8   : > { %603 = vmatmul.mubr.f32.gmra.mrb[52].mxu0 %v300_v43 }
  0xf9   : > { %608 = vmatprep.mubr.f32.mxu0 %v3206_v0 }
  0xfc   : > { %609 = vmatmul.mubr.f32.gmra.mrb[54].mxu0 %v301_v47 }
  0xfd   : > { %614 = vmatprep.mubr.f32.mxu0 %v3206_v0 }
 0x100   : > { %615 = vmatmul.mubr.f32.gmra.mrb[56].mxu0 %v302_v51 }
 0x101   : > { %620 = vmatprep.mubr.f32.mxu0 %v3206_v0 }
 0x104   : > { %621 = vmatmul.mubr.f32.gmra.mrb[58].mxu0 %v303_v55 }
 0x105   : > { %626 = vmatprep.mubr.f32.mxu0 %v3206_v0 }
 0x108   : > { %627 = vmatmul.mubr.f32.gmra.mrb[60].mxu0 %v304_v59 }
 0x109   : > { %632 = vmatprep.mubr.f32.mxu0 %v3206_v0 }
 0x10c   : > { %633 = vmatmul.mubr.f32.gmra.mrb[62].mxu0 %v305_v63 }
 0x10d   : > { %638 = vmatprep.mubr.f32.mxu0 %v3206_v0 }
 0x110   : > { %639 = vmatmul.mubr.f32.gmra.mrb[64].mxu0 %v306_v4 }
 0x111   : > { %644 = vmatprep.mubr.f32.mxu0 %v3206_v0 }
 0x114   : > { %645 = vmatmul.mubr.f32.gmra.mrb[66].mxu0 %v307_v5 }
 0x115   : > { %650 = vmatprep.mubr.f32.mxu0 %v3206_v0 }
 0x118   : > { %651 = vmatmul.mubr.f32.gmra.mrb[68].mxu0 %v308_v7 }
 0x119   : > { %656 = vmatprep.mubr.f32.mxu0 %v3206_v0 }
 0x11c   : > { %657 = vmatmul.mubr.f32.gmra.mrb[70].mxu0 %v309_v6 }
 0x11d   : > { %662 = vmatprep.mubr.f32.mxu0 %v3206_v0 }
 0x120   : > { %663 = vmatmul.mubr.f32.gmra.mrb[72].mxu0 %v310_v8 }
 0x121   : > { %668 = vmatprep.mubr.f32.mxu0 %v3206_v0 }
 0x124   : > { %669 = vmatmul.mubr.f32.gmra.mrb[74].mxu0 %v311_v9 }
 0x125   : > { %674 = vmatprep.mubr.f32.mxu0 %v3206_v0 }
 0x128   : > { %675 = vmatmul.mubr.f32.gmra.mrb[76].mxu0 %v312_v10  ;;  %v331_v10 = vld [vmem:[%s3425_s14 + $0x1c8] sm:$0xff] }
 0x129   : > { %680 = vmatprep.mubr.f32.mxu0 %v3206_v0 }
 0x12c   : > { %681 = vmatmul.mubr.f32.gmra.mrb[78].mxu0 %v313_v11 }
 0x12d   : > { %686 = vmatprep.mubr.f32.mxu0 %v3206_v0 }
 0x130   : > { %687 = vmatmul.mubr.f32.gmra.mrb[80].mxu0 %v314_v12 }
 0x131   : > { %692 = vmatprep.mubr.f32.mxu0 %v3206_v0 }
 0x134   : > { %693 = vmatmul.mubr.f32.gmra.mrb[82].mxu0 %v315_v13 }
 0x135   : > { %698 = vmatprep.mubr.f32.mxu0 %v3206_v0 }
 0x138   : > { %699 = vmatmul.mubr.f32.gmra.mrb[84].mxu0 %v316_v14 }
 0x139   : > { %704 = vmatprep.mubr.f32.mxu0 %v3206_v0 }
 0x13c   : > { %705 = vmatmul.mubr.f32.gmra.mrb[86].mxu0 %v317_v15 }
 0x13d   : > { %710 = vmatprep.mubr.f32.mxu0 %v3206_v0 }
 0x140   : > { %711 = vmatmul.mubr.f32.gmra.mrb[88].mxu0 %v318_v16 }
 0x141   : > { %716 = vmatprep.mubr.f32.mxu0 %v3206_v0 }
 0x144   : > { %717 = vmatmul.mubr.f32.gmra.mrb[90].mxu0 %v319_v17 }
 0x145   : > { %722 = vmatprep.mubr.f32.mxu0 %v3206_v0 }
 0x148   : > { %723 = vmatmul.mubr.f32.gmra.mrb[92].mxu0 %v320_v18 }
 0x149   : > { %728 = vmatprep.mubr.f32.mxu0 %v3206_v0 }
 0x14c   : > { %729 = vmatmul.mubr.f32.gmra.mrb[94].mxu0 %v321_v19 }
 0x14d   : > { %734 = vmatprep.mubr.f32.mxu0 %v3206_v0 }
 0x150   : > { %735 = vmatmul.mubr.f32.gmra.mrb[96].mxu0 %v322_v20 }
 0x151   : > { %740 = vmatprep.mubr.f32.mxu0 %v3206_v0 }
 0x154   : > { %741 = vmatmul.mubr.f32.gmra.mrb[98].mxu0 %v323_v21 }
 0x155   : > { %746 = vmatprep.mubr.f32.mxu0 %v3206_v0 }
 0x158   : > { %747 = vmatmul.mubr.f32.gmra.mrb[100].mxu0 %v324_v23 }
 0x159   : > { %752 = vmatprep.mubr.f32.mxu0 %v3206_v0 }
 0x15c   : > { %753 = vmatmul.mubr.f32.gmra.mrb[102].mxu0 %v325_v25 }
 0x15d   : > { %758 = vmatprep.mubr.f32.mxu0 %v3206_v0 }
 0x160   : > { %759 = vmatmul.mubr.f32.gmra.mrb[104].mxu0 %v326_v27 }
 0x161   : > { %764 = vmatprep.mubr.f32.mxu0 %v3206_v0 }
 0x163   : > { %v448_v33 = vpop.f32.mrb[0].mxu0 }
 0x164   : > { %v449_v34 = vadd.f32 %v448_v33, %v3576_v30  ;;  %v450_v35 = vpop.f32.mrb[1].mxu0  ;;  %765 = vmatmul.mubr.f32.gmra.mrb[106].mxu0 %v327_v32 }
 0x165   : > { %v451_v36 = vadd.f32 %v450_v35, %v3579_v31  ;;  %770 = vmatprep.mubr.f32.mxu0 %v3206_v0 }
 0x166   : > { %v959_v38 = vmul.f32 0.044715, %v449_v34  ;;  %v3604_v19 = vmul.f32 0.5, %v449_v34 }
 0x167   : > { %v960_v39 = vmul.f32 0.044715, %v451_v36  ;;  %v454_v40 = vpop.f32.mrb[2].mxu0  ;;  %v3610_v25 = vmul.f32 0.5, %v451_v36 }
 0x168   : > { %v1087_v41 = vmul.f32 %v959_v38, %v449_v34  ;;  %v455_v42 = vadd.f32 %v454_v40, %v3576_v30  ;;  %v456_v43 = vpop.f32.mrb[3].mxu0  ;;  %771 = vmatmul.mubr.f32.gmra.mrb[108].mxu0 %v328_v37 }
 0x169   : > { %v1088_v44 = vmul.f32 %v960_v39, %v451_v36  ;;  %v457_v45 = vadd.f32 %v456_v43, %v3579_v31  ;;  %776 = vmatprep.mubr.f32.mxu0 %v3206_v0  ;;  %v333_v43 = vld [vmem:[%s3425_s14 + $0x1d8] sm:$0xff] }
 0x16a   : > { %v1215_v47 = vmul.f32 %v1087_v41, %v449_v34  ;;  %v961_v48 = vmul.f32 0.044715, %v455_v42  ;;  %v3614_v27 = vmul.f32 0.5, %v455_v42 }
 0x16b   : > { %v962_v49 = vmul.f32 0.044715, %v457_v45  ;;  %v460_v50 = vpop.f32.mrb[4].mxu0  ;;  %v1216_v51 = vmul.f32 %v1088_v44, %v451_v36  ;;  %v3612_v26 = vmul.f32 0.5, %v457_v45 }
 0x16c   : > { %v1343_v52 = vadd.f32 %v1215_v47, %v449_v34  ;;  %v1089_v53 = vmul.f32 %v961_v48, %v455_v42  ;;  %v461_v54 = vadd.f32 %v460_v50, %v3576_v30  ;;  %v462_v55 = vpop.f32.mrb[5].mxu0  ;;  %777 = vmatmul.mubr.f32.gmra.mrb[110].mxu0 %v329_v46 }
 0x16d   : > { %v1090_v56 = vmul.f32 %v962_v49, %v457_v45  ;;  %v463_v57 = vadd.f32 %v462_v55, %v3579_v31  ;;  %782 = vmatprep.mubr.f32.mxu0 %v3206_v0  ;;  %v1344_v59 = vadd.f32 %v1216_v51, %v451_v36 }
 0x16e   : > { %v963_v60 = vmul.f32 0.044715, %v461_v54  ;;  %v1217_v61 = vmul.f32 %v1089_v53, %v455_v42  ;;  %v1471_v62 = vmul.f32 0.7978846, %v1343_v52  ;;  %v3621_v41 = vmul.f32 0.5, %v461_v54 }
 0x16f   : > { %v964_v63 = vmul.f32 0.044715, %v463_v57  ;;  %v466_v1 = vpop.f32.mrb[6].mxu0  ;;  %v1218_v2 = vmul.f32 %v1090_v56, %v457_v45  ;;  %v1472_v7 = vmul.f32 0.7978846, %v1344_v59  ;;  %v3619_v40 = vmul.f32 0.5, %v463_v57 }
 0x170   : > { %v1091_v3 = vmul.f32 %v963_v60, %v461_v54  ;;  %v3595_v4 = vadd.f32 %v466_v1, %v3576_v30  ;;  %v468_v5 = vpop.f32.mrb[7].mxu0  ;;  %783 = vmatmul.mubr.f32.gmra.mrb[112].mxu0 %v330_v58  ;;  %v1345_v6 = vadd.f32 %v1217_v61, %v455_v42  ;;  %2785 = vtanh.f32 %v1471_v62 }
 0x171   : > { %v1092_v8 = vmul.f32 %v964_v63, %v463_v57  ;;  %v3598_v9 = vadd.f32 %v468_v5, %v3579_v31  ;;  %788 = vmatprep.mubr.f32.mxu0 %v3206_v0  ;;  %v1346_v11 = vadd.f32 %v1218_v2, %v457_v45  ;;  %2787 = vtanh.f32 %v1472_v7  ;;  %v334_v63 = vld [vmem:[%s3425_s14 + $0x1e0] sm:$0xff] }
 0x172   : > { %v965_v12 = vmul.f32 0.044715, %v3595_v4  ;;  %v1473_v13 = vmul.f32 0.7978846, %v1345_v6  ;;  %v1219_v14 = vmul.f32 %v1091_v3, %v461_v54  ;;  %v3630_v46 = vmul.f32 0.5, %v3595_v4 }
 0x173   : > { %v966_v15 = vmul.f32 0.044715, %v3598_v9  ;;  %v472_v16 = vpop.f32.mrb[8].mxu0  ;;  %v1474_v17 = vmul.f32 0.7978846, %v1346_v11  ;;  %v1220_v18 = vmul.f32 %v1092_v8, %v463_v57  ;;  %v3627_v45 = vmul.f32 0.5, %v3598_v9 }
 0x174   : > { %v473_v20 = vadd.f32 %v472_v16, %v3576_v30  ;;  %v474_v21 = vpop.f32.mrb[9].mxu0  ;;  %789 = vmatmul.mubr.f32.gmra.mrb[114].mxu0 %v331_v10  ;;  %v1347_v22 = vadd.f32 %v1219_v14, %v461_v54  ;;  %v1093_v28 = vmul.f32 %v965_v12, %v3595_v4  ;;  %2789 = vtanh.f32 %v1473_v13 }
 0x175   : > { %v475_v23 = vadd.f32 %v474_v21, %v3579_v31  ;;  %794 = vmatprep.mubr.f32.mxu0 %v3206_v0  ;;  %v1348_v32 = vadd.f32 %v1220_v18, %v463_v57  ;;  %v1094_v33 = vmul.f32 %v966_v15, %v3598_v9  ;;  %2791 = vtanh.f32 %v1474_v17 }
 0x176   : > { %v967_v29 = vmul.f32 0.044715, %v473_v20  ;;  %v1475_v37 = vmul.f32 0.7978846, %v1347_v22  ;;  %v1221_v50 = vmul.f32 %v1093_v28, %v3595_v4  ;;  %v3637_v58 = vmul.f32 0.5, %v473_v20  ;;  %v335_v22 = vld [vmem:[%s3425_s14 + $0x1e8] sm:$0xff] }
 0x177   : > { %v478_v34 = vpop.f32.mrb[10].mxu0  ;;  %v968_v35 = vmul.f32 0.044715, %v475_v23  ;;  %v1476_v49 = vmul.f32 0.7978846, %v1348_v32  ;;  %v1222_v54 = vmul.f32 %v1094_v33, %v3598_v9  ;;  %v3644_v1 = vmul.f32 0.5, %v475_v23 }
 0x178   : > { %v1095_v38 = vmul.f32 %v967_v29, %v473_v20  ;;  %v479_v36 = vadd.f32 %v478_v34, %v3576_v30  ;;  %v480_v39 = vpop.f32.mrb[11].mxu0  ;;  %795 = vmatmul.mubr.f32.gmra.mrb[116].mxu0 %v332_v24  ;;  %2793 = vtanh.f32 %v1475_v37  ;;  %v1349_v6 = vadd.f32 %v1221_v50, %v3595_v4 }
 0x179   : > { %v481_v42 = vadd.f32 %v480_v39, %v3579_v31  ;;  %800 = vmatprep.mubr.f32.mxu0 %v3206_v0  ;;  %v1096_v44 = vmul.f32 %v968_v35, %v475_v23  ;;  %2795 = vtanh.f32 %v1476_v49  ;;  %v1350_v13 = vadd.f32 %v1222_v54, %v3598_v9 }
 0x17a   : > { %v969_v47 = vmul.f32 0.044715, %v479_v36  ;;  %v1223_v48 = vmul.f32 %v1095_v38, %v473_v20  ;;  %v2786_v60 = vpop.eup %2785  ;;  %v3650_v18 = vmul.f32 0.5, %v479_v36  ;;  %v1477_v29 = vmul.f32 0.7978846, %v1349_v6 }
 0x17b   : > { %v970_v51 = vmul.f32 0.044715, %v481_v42  ;;  %v484_v52 = vpop.f32.mrb[12].mxu0  ;;  %v1224_v53 = vmul.f32 %v1096_v44, %v475_v23  ;;  %v2788_v3 = vpop.eup %2787  ;;  %v1727_v17 = vadd.f32 1.0, %v2786_v60  ;;  %v3662_v35 = vmul.f32 0.5, %v481_v42 }
 0x17c   : > { %v1097_v55 = vmul.f32 %v969_v47, %v479_v36  ;;  %v3635_v56 = vadd.f32 %v484_v52, %v3576_v30  ;;  %v486_v57 = vpop.f32.mrb[13].mxu0  ;;  %801 = vmatmul.mubr.f32.gmra.mrb[118].mxu0 %v333_v43  ;;  %v1351_v59 = vadd.f32 %v1223_v48, %v473_v20 }
 0x17d   : > { %v1098_v61 = vmul.f32 %v970_v51, %v481_v42  ;;  %v3640_v62 = vadd.f32 %v486_v57, %v3579_v31  ;;  %806 = vmatprep.mubr.f32.mxu0 %v3206_v0  ;;  %v1352_v2 = vadd.f32 %v1224_v53, %v475_v23  ;;  %v1728_v23 = vadd.f32 1.0, %v2788_v3 }
 0x17e   : > { %v1479_v5 = vmul.f32 0.7978846, %v1351_v59  ;;  %v1225_v7 = vmul.f32 %v1097_v55, %v479_v36  ;;  %v2790_v14 = vpop.eup %2789  ;;  %v971_v15 = vmul.f32 0.044715, %v3635_v56  ;;  %v3667_v43 = vmul.f32 %v1727_v17, %v3604_v19 }
 0x17f   : > { %v972_v8 = vmul.f32 0.044715, %v3640_v62  ;;  %v490_v10 = vpop.f32.mrb[14].mxu0  ;;  %v1480_v11 = vmul.f32 0.7978846, %v1352_v2  ;;  %v1226_v12 = vmul.f32 %v1098_v61, %v481_v42  ;;  %v2792_v20 = vpop.eup %2791  ;;  %v1729_v34 = vadd.f32 1.0, %v2790_v14 }
 0x180   : > { %v492_v16 = vpop.f32.mrb[15].mxu0  ;;  %807 = vmatmul.mubr.f32.gmra.mrb[120].mxu0 %v334_v63  ;;  %2797 = vtanh.f32 %v1479_v5  ;;  %v3659_v9 = vadd.f32 %v490_v10, %v3576_v30  ;;  %v1353_v28 = vadd.f32 %v1225_v7, %v479_v36  ;;  %v1099_v38 = vmul.f32 %v971_v15, %v3635_v56 }
 0x181   : > { %v1100_v4 = vmul.f32 %v972_v8, %v3640_v62  ;;  %v3654_v21 = vadd.f32 %v492_v16, %v3579_v31  ;;  %812 = vmatprep.mubr.f32.mxu0 %v3206_v0  ;;  %2799 = vtanh.f32 %v1480_v11  ;;  %v1354_v24 = vadd.f32 %v1226_v12, %v481_v42  ;;  %v336_v42 = vld [vmem:[%s3425_s14 + $0x1f0] sm:$0xff] }
 0x182   : > { %v1730_v44 = vadd.f32 1.0, %v2792_v20  ;;  %v2794_v36 = vpop.eup %2793  ;;  %v1856_v50 = vmul.f32 %v1728_v23, %v3610_v25  ;;  %v1481_v51 = vmul.f32 0.7978846, %v1353_v28  ;;  %v973_v52 = vmul.f32 0.044715, %v3659_v9 }
 0x183   : > { %v974_v32 = vmul.f32 0.044715, %v3654_v21  ;;  %v496_v33 = vpop.f32.mrb[16].mxu0  ;;  %v1228_v37 = vmul.f32 %v1100_v4, %v3640_v62  ;;  %v1482_v47 = vmul.f32 0.7978846, %v1354_v24  ;;  %v3683_v57 = vmul.f32 %v1729_v34, %v3614_v27  ;;  %v2796_v60 = vpop.eup %2795  ;;  %v337_v27 = vld [vmem:[%s3425_s14 + $0x1f8] sm:$0xff] }
 0x184   : > { %v498_v39 = vpop.f32.mrb[17].mxu0  ;;  %813 = vmatmul.mubr.f32.gmra.mrb[122].mxu0 %v335_v22  ;;  %v3670_v48 = vadd.f32 %v496_v33, %v3576_v30  ;;  %v1478_v59 = vmul.f32 0.7978846, %v1350_v13  ;;  %v1858_v25 = vmul.f32 %v1730_v44, %v3612_v26  ;;  %v1731_v63 = vadd.f32 1.0, %v2794_v36 }
 0x185   : > { %v3673_v49 = vadd.f32 %v498_v39, %v3579_v31  ;;  %818 = vmatprep.mubr.f32.mxu0 %v3206_v0  ;;  %v1102_v19 = vmul.f32 %v974_v32, %v3654_v21  ;;  %2801 = vtanh.f32 %v1482_v47  ;;  %v1356_v53 = vadd.f32 %v1228_v37, %v3640_v62 }
 0x186   : > { %2803 = vtanh.f32 %v1481_v51  ;;  %v1227_v3 = vmul.f32 %v1099_v38, %v3635_v56  ;;  %v975_v5 = vmul.f32 0.044715, %v3670_v48  ;;  %v3694_v6 = vmul.f32 0.5, %v3640_v62 }
 0x187   : > { %v976_v54 = vmul.f32 0.044715, %v3673_v49  ;;  %v502_v55 = vpop.f32.mrb[18].mxu0  ;;  %v1484_v2 = vmul.f32 0.7978846, %v1356_v53  ;;  %2805 = vtanh.f32 %v1478_v59  ;;  %v1101_v10 = vmul.f32 %v973_v52, %v3659_v9 }
 0x188   : > { %v504_v61 = vpop.f32.mrb[19].mxu0  ;;  %819 = vmatmul.mubr.f32.gmra.mrb[124].mxu0 %v336_v42  ;;  %v3689_v7 = vadd.f32 %v502_v55, %v3576_v30  ;;  %v1355_v26 = vadd.f32 %v1227_v3, %v3635_v56  ;;  %v1230_v11 = vmul.f32 %v1102_v19, %v3654_v21  ;;  %v1732_v17 = vadd.f32 1.0, %v2796_v60 }
 0x189   : > { %824 = vmatprep.mubr.f32.mxu0 %v3206_v0  ;;  %2807 = vtanh.f32 %v1484_v2  ;;  %v1104_v13 = vmul.f32 %v976_v54, %v3673_v49  ;;  %v3701_v14 = vadd.f32 %v504_v61, %v3579_v31  ;;  %v3704_v20 = vmul.f32 %v1731_v63, %v3621_v41 }
 0x18a   : > { %v2798_v8 = vpop.eup %2797  ;;  %2809 = vtanh.f32 %v1477_v29  ;;  %v1483_v4 = vmul.f32 0.7978846, %v1355_v26  ;;  %v1103_v22 = vmul.f32 %v975_v5, %v3670_v48  ;;  %v977_v23 = vmul.f32 0.044715, %v3689_v7 }
 0x18b   : > { %v2800_v12 = vpop.eup %2799  ;;  %v508_v0 = vpop.f32.mrb[20].mxu0  ;;  %v1735_v15 = vadd.f32 1.0, %v2798_v8  ;;  %v1358_v28 = vadd.f32 %v1230_v11, %v3654_v21  ;;  %v1229_v41 = vmul.f32 %v1101_v10, %v3659_v9  ;;  %v978_v33 = vmul.f32 0.044715, %v3701_v14 }
 0x18c   : > { %v510_v62 = vpop.f32.mrb[21].mxu0  ;;  %825 = vmatmul.mubr.f32.gmra.mrb[126].mxu0 %v337_v27  ;;  %v1736_v16 = vadd.f32 1.0, %v2800_v12  ;;  %v3709_v24 = vadd.f32 %v508_v0, %v3576_v30  ;;  %2811 = vtanh.f32 %v1483_v4  ;;  %v1232_v39 = vmul.f32 %v1104_v13, %v3673_v49 }
 0x18d   : > { %2086 = vmatprep.mubr.f32.mxu0 %v1856_v50  ;;  %v3713_v29 = vadd.f32 %v510_v62, %v3579_v31  ;;  %v1863_v37 = vmul.f32 %v1735_v15, %v3637_v58  ;;  %v1486_v38 = vmul.f32 0.7978846, %v1358_v28  ;;  %v1860_v36 = vmul.f32 %v1732_v17, %v3619_v40 }
 0x18e   : > { %v1864_v32 = vmul.f32 %v1736_v16, %v3644_v1  ;;  %v843_v1 = vmul.f32 0.5, %v3635_v56  ;;  %v3724_v42 = vmul.f32 0.5, %v3654_v21  ;;  %v1357_v50 = vadd.f32 %v1229_v41, %v3659_v9 }
 0x18f   : > { %v514_v34 = vpop.f32.mrb[22].mxu0  ;;  %v2802_v44 = vpop.eup %2801  ;;  %v979_v58 = vmul.f32 0.044715, %v3709_v24  ;;  %2813 = vtanh.f32 %v1486_v38  ;;  %v3729_v19 = vmul.f32 0.5, %v3659_v9  ;;  %v1360_v56 = vadd.f32 %v1232_v39, %v3673_v49 }
 0x190   : > { %v516_v47 = vpop.f32.mrb[23].mxu0  ;;  %2087 = vmatmul.mubr.f32.vlgmr.msra.gmra.mrb[128].mxu0 %v3667_v43  ;;  %2106 = vmatprep.mubr.f32.mxu1 %v1864_v32  ;;  %v2804_v51 = vpop.eup %2803  ;;  %v1738_v52 = vadd.f32 1.0, %v2802_v44  ;;  %v980_v43 = vmul.f32 0.044715, %v3713_v29  ;;  %v1485_v53 = vmul.f32 0.7978846, %v1357_v50  ;;  %v1105_v54 = vmul.f32 %v977_v23, %v3689_v7 }
 0x191   : > { %2091 = vmatprep.mubr.f32.mxu0 %v1858_v25  ;;  %2107 = vmatmul.mubr.f32.vlgmr.msra.gmra.mrb[0].mxu1 %v1863_v37  ;;  %v1737_v40 = vadd.f32 1.0, %v2804_v51  ;;  %v2806_v21 = vpop.eup %2805  ;;  %v1106_v55 = vmul.f32 %v978_v33, %v3701_v14  ;;  %v1231_v61 = vmul.f32 %v1103_v22, %v3670_v48  ;;  %v3738_v9 = vadd.f32 %v514_v34, %v3576_v30 }
 0x192   : > { %v1866_v60 = vmul.f32 %v1738_v52, %v3662_v35  ;;  %v3741_v63 = vadd.f32 %v516_v47, %v3579_v31  ;;  %v1734_v5 = vadd.f32 1.0, %v2806_v21  ;;  %2815 = vtanh.f32 %v1485_v53 }
 0x193   : > { %v520_v59 = vpop.f32.mrb[24].mxu0  ;;  %v2808_v25 = vpop.eup %2807  ;;  %v1865_v3 = vmul.f32 %v1737_v40, %v3650_v18  ;;  %v3749_v10 = vmul.f32 0.5, %v3673_v49  ;;  %v1107_v26 = vmul.f32 %v979_v58, %v3709_v24  ;;  %v1108_v11 = vmul.f32 %v980_v43, %v3713_v29 }
 0x194   : > { %v522_v2 = vpop.f32.mrb[25].mxu0  ;;  %2092 = vmatmul.mubr.f32.gmra.mrb[130].mxu0 %v3683_v57  ;;  %v2810_v27 = vpop.eup %2809  ;;  %v3746_v8 = vadd.f32 %v520_v59, %v3576_v30  ;;  %2111 = vmatprep.mubr.f32.mxu1 %v1866_v60  ;;  %v1740_v35 = vadd.f32 1.0, %v2808_v25  ;;  %v1488_v12 = vmul.f32 0.7978846, %v1360_v56  ;;  %v1862_v0 = vmul.f32 %v1734_v5, %v3627_v45 }
 0x195   : > { %2096 = vmatprep.mubr.f32.mxu0 %v1860_v36  ;;  %2112 = vmatmul.mubr.f32.gmra.mrb[2].mxu1 %v1865_v3  ;;  %v1733_v57 = vadd.f32 1.0, %v2810_v27  ;;  %v1359_v15 = vadd.f32 %v1231_v61, %v3670_v48  ;;  %v1234_v62 = vmul.f32 %v1106_v55, %v3701_v14  ;;  %v981_v49 = vmul.f32 0.044715, %v3738_v9 }
 0x196   : > { %v1868_v13 = vmul.f32 %v1740_v35, %v3694_v6  ;;  %v2812_v16 = vpop.eup %2811  ;;  %v982_v17 = vmul.f32 0.044715, %v3741_v63  ;;  %v3760_v4 = vadd.f32 %v522_v2, %v3579_v31  ;;  %2817 = vtanh.f32 %v1488_v12 }
 0x197   : > { %v526_v18 = vpop.f32.mrb[26].mxu0  ;;  %v983_v6 = vmul.f32 0.044715, %v3746_v8  ;;  %v1739_v23 = vadd.f32 1.0, %v2812_v16  ;;  %v1487_v28 = vmul.f32 0.7978846, %v1359_v15  ;;  %v1861_v41 = vmul.f32 %v1733_v57, %v3630_v46 }
 0x198   : > { %v528_v22 = vpop.f32.mrb[27].mxu0  ;;  %2097 = vmatmul.mubr.f32.gmra.mrb[132].mxu0 %v3704_v20  ;;  %v3765_v45 = vadd.f32 %v526_v18, %v3576_v30  ;;  %2116 = vmatprep.mubr.f32.mxu1 %v1868_v13  ;;  %v1362_v33 = vadd.f32 %v1234_v62, %v3701_v14  ;;  %v1233_v34 = vmul.f32 %v1105_v54, %v3689_v7  ;;  %v3774_v39 = vmul.f32 0.5, %v3670_v48 }
 0x199   : > { %2101 = vmatprep.mubr.f32.mxu0 %v1862_v0  ;;  %v3768_v32 = vadd.f32 %v528_v22, %v3579_v31  ;;  %v2814_v20 = vpop.eup %2813  ;;  %v1867_v37 = vmul.f32 %v1739_v23, %v843_v1  ;;  %2819 = vtanh.f32 %v1487_v28  ;;  %v3777_v44 = vmul.f32 0.5, %v3701_v14 }
 0x19a   : > { %v1109_v47 = vmul.f32 %v981_v49, %v3738_v9  ;;  %v984_v36 = vmul.f32 0.044715, %v3760_v4  ;;  %v1742_v46 = vadd.f32 1.0, %v2814_v20  ;;  %v1490_v51 = vmul.f32 0.7978846, %v1362_v33 }
 0x19b   : > { %v532_v38 = vpop.f32.mrb[28].mxu0  ;;  %v1110_v58 = vmul.f32 %v982_v17, %v3741_v63  ;;  %v985_v1 = vmul.f32 0.044715, %v3765_v45  ;;  %2117 = vmatmul.mubr.f32.gmra.mrb[4].mxu1 %v1867_v37  ;;  %v1361_v48 = vadd.f32 %v1233_v34, %v3689_v7  ;;  %v1236_v52 = vmul.f32 %v1108_v11, %v3713_v29 }
 0x19c   : > { %v534_v50 = vpop.f32.mrb[29].mxu0  ;;  %2102 = vmatmul.mubr.f32.gmra.mrb[134].mxu0 %v1861_v41  ;;  %v3786_v14 = vmul.f32 %v983_v6, %v3746_v8  ;;  %v986_v43 = vmul.f32 0.044715, %v3768_v32  ;;  %v1870_v40 = vmul.f32 %v1742_v46, %v3724_v42  ;;  %2821 = vtanh.f32 %v1490_v51  ;;  %v2816_v53 = vpop.eup %2815 }
 0x19d   : > { %v3791_v56 = vadd.f32 %v532_v38, %v3576_v30  ;;  %v1489_v54 = vmul.f32 0.7978846, %v1361_v48  ;;  %v1364_v55 = vadd.f32 %v1236_v52, %v3713_v29  ;;  %v1235_v59 = vmul.f32 %v1107_v26, %v3709_v24 }
 0x19e   : > { %v1112_v60 = vmul.f32 %v984_v36, %v3760_v4  ;;  %2121 = vmatprep.mubr.f32.mxu1 %v1870_v40  ;;  %v1741_v61 = vadd.f32 1.0, %v2816_v53  ;;  %v3797_v2 = vmul.f32 0.5, %v3689_v7  ;;  %v3800_v42 = vmul.f32 0.5, %v3713_v29 }
 0x19f   : > { %v538_v21 = vpop.f32.mrb[30].mxu0  ;;  %v3803_v3 = vmul.f32 %v985_v1, %v3765_v45  ;;  %v3806_v5 = vadd.f32 %v534_v50, %v3579_v31  ;;  %2823 = vtanh.f32 %v1489_v54  ;;  %v1492_v27 = vmul.f32 0.7978846, %v1364_v55 }
 0x1a0   : > { %v540_v25 = vpop.f32.mrb[31].mxu0  ;;  %v2818_v35 = vpop.eup %2817  ;;  %v1114_v26 = vmul.f32 %v986_v43, %v3768_v32  ;;  %v1869_v11 = vmul.f32 %v1741_v61, %v3729_v19  ;;  %v1363_v57 = vadd.f32 %v1235_v59, %v3709_v24  ;;  %v1238_v7 = vmul.f32 %v1110_v58, %v3741_v63 }
 0x1a1   : > { %v987_v29 = vmul.f32 0.044715, %v3791_v56  ;;  %v3814_v12 = vadd.f32 %v538_v21, %v3576_v30  ;;  %v1744_v18 = vadd.f32 1.0, %v2818_v35  ;;  %2825 = vtanh.f32 %v1492_v27 }
 0x1a2   : > { %2122 = vmatmul.mubr.f32.gmra.mrb[6].mxu1 %v1869_v11  ;;  %v3817_v0 = vadd.f32 %v540_v25, %v3579_v31  ;;  %v3820_v62 = vmul.f32 0.5, %v3709_v24  ;;  %v1491_v19 = vmul.f32 0.7978846, %v1363_v57  ;;  %v1366_v16 = vadd.f32 %v1238_v7, %v3741_v63 }
 0x1a3   : > { %v544_v13 = vpop.f32.mrb[32].mxu0  ;;  %v2820_v49 = vpop.eup %2819  ;;  %v988_v17 = vmul.f32 0.044715, %v3806_v5  ;;  %v1872_v22 = vmul.f32 %v1744_v18, %v3749_v10  ;;  %v1237_v23 = vmul.f32 %v1109_v47, %v3738_v9  ;;  %v3833_v33 = vmul.f32 %v987_v29, %v3791_v56 }
 0x1a4   : > { %v546_v15 = vpop.f32.mrb[33].mxu0  ;;  %v3826_v6 = vadd.f32 %v544_v13, %v3576_v30  ;;  %v1743_v28 = vadd.f32 1.0, %v2820_v49  ;;  %2827 = vtanh.f32 %v1491_v19  ;;  %v1494_v24 = vmul.f32 0.7978846, %v1366_v16 }
 0x1a5   : > { %v3830_v41 = vadd.f32 %v546_v15, %v3579_v31  ;;  %v989_v34 = vmul.f32 0.044715, %v3814_v12  ;;  %2126 = vmatprep.mubr.f32.mxu1 %v1872_v22  ;;  %v1365_v10 = vadd.f32 %v1237_v23, %v3738_v9  ;;  %v1240_v37 = vmul.f32 %v1112_v60, %v3760_v4 }
 0x1a6   : > { %v2822_v38 = vpop.eup %2821  ;;  %v990_v47 = vmul.f32 0.044715, %v3817_v0  ;;  %v1871_v36 = vmul.f32 %v1743_v28, %v3774_v39  ;;  %v3841_v46 = vmul.f32 0.5, %v3741_v63  ;;  %2829 = vtanh.f32 %v1494_v24 }
 0x1a7   : > { %v550_v20 = vpop.f32.mrb[34].mxu0  ;;  %v1116_v51 = vmul.f32 %v988_v17, %v3806_v5  ;;  %v991_v58 = vmul.f32 0.044715, %v3826_v6  ;;  %v1746_v1 = vadd.f32 1.0, %v2822_v38  ;;  %v1493_v48 = vmul.f32 0.7978846, %v1365_v10 }
 0x1a8   : > { %v552_v50 = vpop.f32.mrb[35].mxu0  ;;  %2127 = vmatmul.mubr.f32.gmra.mrb[8].mxu1 %v1871_v36  ;;  %v992_v52 = vmul.f32 0.044715, %v3830_v41  ;;  %v3847_v43 = vmul.f32 0.5, %v3738_v9  ;;  %v1368_v40 = vadd.f32 %v1240_v37, %v3760_v4  ;;  %v1239_v39 = vmul.f32 %v3786_v14, %v3746_v8 }
 0x1a9   : > { %v2824_v63 = vpop.eup %2823  ;;  %v3853_v53 = vmul.f32 %v989_v34, %v3814_v12  ;;  %v1874_v21 = vmul.f32 %v1746_v1, %v3777_v44  ;;  %v3857_v54 = vadd.f32 %v550_v20, %v3576_v30  ;;  %2831 = vtanh.f32 %v1493_v48 }
 0x1aa   : > { %v3860_v59 = vmul.f32 %v990_v47, %v3817_v0  ;;  %v1745_v9 = vadd.f32 1.0, %v2824_v63  ;;  %v3863_v61 = vmul.f32 0.5, %v3760_v4  ;;  %v1496_v14 = vmul.f32 0.7978846, %v1368_v40 }
 0x1ab   : > { %v556_v55 = vpop.f32.mrb[36].mxu0  ;;  %v2826_v25 = vpop.eup %2825  ;;  %v3866_v27 = vmul.f32 %v991_v58, %v3826_v6  ;;  %2131 = vmatprep.mubr.f32.mxu1 %v1874_v21  ;;  %v3869_v44 = vadd.f32 %v552_v50, %v3579_v31  ;;  %v1367_v35 = vadd.f32 %v1239_v39, %v3746_v8  ;;  %v1242_v11 = vmul.f32 %v1114_v26, %v3768_v32 }
 0x1ac   : > { %v558_v60 = vpop.f32.mrb[37].mxu0  ;;  %v3874_v57 = vmul.f32 %v992_v52, %v3830_v41  ;;  %v1873_v7 = vmul.f32 %v1745_v9, %v3797_v2  ;;  %v1748_v4 = vadd.f32 1.0, %v2826_v25  ;;  %2833 = vtanh.f32 %v1496_v14 }
 0x1ad   : > { %v993_v29 = vmul.f32 0.044715, %v3857_v54  ;;  %v3879_v18 = vadd.f32 %v556_v55, %v3576_v30  ;;  %v1495_v15 = vmul.f32 0.7978846, %v1367_v35  ;;  %v1370_v19 = vadd.f32 %v1242_v11, %v3768_v32 }
 0x1ae   : > { %v2828_v16 = vpop.eup %2827  ;;  %2132 = vmatmul.mubr.f32.gmra.mrb[10].mxu1 %v1873_v7  ;;  %v1876_v26 = vmul.f32 %v1748_v4, %v3800_v42  ;;  %v3884_v49 = vadd.f32 %v558_v60, %v3579_v31  ;;  %v3887_v2 = vmul.f32 0.5, %v3746_v8  ;;  %v1241_v22 = vmul.f32 %v3803_v3, %v3765_v45 }
 0x1af   : > { %v562_v13 = vpop.f32.mrb[38].mxu0  ;;  %v994_v23 = vmul.f32 0.044715, %v3869_v44  ;;  %v1747_v28 = vadd.f32 1.0, %v2828_v16  ;;  %2835 = vtanh.f32 %v1495_v15  ;;  %v3899_v20 = vmul.f32 0.5, %v3768_v32 }
 0x1b0   : > { %v564_v17 = vpop.f32.mrb[39].mxu0  ;;  %v3893_v24 = vadd.f32 %v562_v13, %v3576_v30  ;;  %v2830_v34 = vpop.eup %2829  ;;  %2136 = vmatprep.mubr.f32.mxu1 %v1876_v26  ;;  %v1498_v8 = vmul.f32 0.7978846, %v1370_v19  ;;  %v1369_v10 = vadd.f32 %v1241_v22, %v3765_v45  ;;  %v995_v37 = vmul.f32 0.044715, %v3879_v18 }
 0x1b1   : > { %v3896_v42 = vadd.f32 %v564_v17, %v3579_v31  ;;  %v1875_v3 = vmul.f32 %v1747_v28, %v3820_v62  ;;  %v1750_v38 = vadd.f32 1.0, %v2830_v34  ;;  %v1244_v36 = vmul.f32 %v1116_v51, %v3806_v5 }
 0x1b2   : > { %v3906_v50 = vmul.f32 %v993_v29, %v3857_v54  ;;  %v996_v58 = vmul.f32 0.044715, %v3884_v49  ;;  %2837 = vtanh.f32 %v1498_v8  ;;  %v1497_v32 = vmul.f32 0.7978846, %v1369_v10 }
 0x1b3   : > { %v568_v47 = vpop.f32.mrb[40].mxu0  ;;  %v2832_v48 = vpop.eup %2831  ;;  %v3910_v52 = vmul.f32 %v994_v23, %v3869_v44  ;;  %2137 = vmatmul.mubr.f32.gmra.mrb[12].mxu1 %v1875_v3  ;;  %v1878_v62 = vmul.f32 %v1750_v38, %v3841_v46  ;;  %v997_v40 = vmul.f32 0.044715, %v3893_v24  ;;  %v1372_v39 = vadd.f32 %v1244_v36, %v3806_v5 }
 0x1b4   : > { %v570_v1 = vpop.f32.mrb[41].mxu0  ;;  %v1749_v51 = vadd.f32 1.0, %v2832_v48  ;;  %v998_v63 = vmul.f32 0.044715, %v3896_v42  ;;  %v3917_v21 = vadd.f32 %v568_v47, %v3576_v30  ;;  %2839 = vtanh.f32 %v1497_v32 }
 0x1b5   : > { %2141 = vmatprep.mubr.f32.mxu1 %v1878_v62  ;;  %v3920_v55 = vadd.f32 %v570_v1, %v3579_v31  ;;  %v857_v9 = vmul.f32 0.5, %v3765_v45  ;;  %v1500_v14 = vmul.f32 0.7978846, %v1372_v39  ;;  %v1243_v46 = vmul.f32 %v3833_v33, %v3791_v56 }
 0x1b6   : > { %v2834_v25 = vpop.eup %2833  ;;  %v3926_v35 = vmul.f32 %v995_v37, %v3879_v18  ;;  %v3929_v11 = vmul.f32 %v996_v58, %v3884_v49  ;;  %v1877_v7 = vmul.f32 %v1749_v51, %v3847_v43  ;;  %v1246_v29 = vmul.f32 %v3860_v59, %v3817_v0 }
 0x1b7   : > { %v574_v60 = vpop.f32.mrb[42].mxu0  ;;  %v3935_v45 = vmul.f32 %v997_v40, %v3893_v24  ;;  %v1752_v13 = vadd.f32 1.0, %v2834_v25  ;;  %v3938_v15 = vmul.f32 0.5, %v3806_v5  ;;  %2841 = vtanh.f32 %v1500_v14 }
 0x1b8   : > { %v576_v4 = vpop.f32.mrb[43].mxu0  ;;  %2142 = vmatmul.mubr.f32.gmra.mrb[14].mxu1 %v1877_v7  ;;  %v3941_v33 = vmul.f32 %v998_v63, %v3896_v42  ;;  %v999_v19 = vmul.f32 0.044715, %v3917_v21  ;;  %v1371_v43 = vadd.f32 %v1243_v46, %v3791_v56  ;;  %v1374_v16 = vadd.f32 %v1246_v29, %v3817_v0 }
 0x1b9   : > { %v2836_v26 = vpop.eup %2835  ;;  %v1880_v59 = vmul.f32 %v1752_v13, %v3863_v61  ;;  %v1000_v17 = vmul.f32 0.044715, %v3920_v55  ;;  %v3949_v22 = vmul.f32 0.5, %v3791_v56  ;;  %v1245_v23 = vmul.f32 %v3853_v53, %v3814_v12 }
 0x1ba   : > { %v1751_v28 = vadd.f32 1.0, %v2836_v26  ;;  %v3954_v34 = vadd.f32 %v574_v60, %v3576_v30  ;;  %v3957_v8 = vadd.f32 %v576_v4, %v3579_v31  ;;  %v1499_v10 = vmul.f32 0.7978846, %v1371_v43 }
 0x1bb   : > { %v580_v5 = vpop.f32.mrb[44].mxu0  ;;  %2146 = vmatprep.mubr.f32.mxu1 %v1880_v59  ;;  %v3963_v56 = vmul.f32 0.5, %v3817_v0  ;;  %v1502_v37 = vmul.f32 0.7978846, %v1374_v16  ;;  %v1373_v38 = vadd.f32 %v1245_v23, %v3814_v12  ;;  %v1248_v58 = vmul.f32 %v3874_v57, %v3830_v41 }
 0x1bc   : > { %v582_v3 = vpop.f32.mrb[45].mxu0  ;;  %v3960_v61 = vadd.f32 %v580_v5, %v3576_v30  ;;  %v2838_v53 = vpop.eup %2837  ;;  %v1879_v47 = vmul.f32 %v1751_v28, %v3887_v2  ;;  %2843 = vtanh.f32 %v1499_v10  ;;  %v3973_v1 = vmul.f32 %v999_v19, %v3917_v21 }
 0x1bd   : > { %v3968_v36 = vadd.f32 %v582_v3, %v3579_v31  ;;  %v1754_v32 = vadd.f32 1.0, %v2838_v53  ;;  %2845 = vtanh.f32 %v1502_v37  ;;  %v1501_v0 = vmul.f32 0.7978846, %v1373_v38 }
 0x1be   : > { %v2840_v62 = vpop.eup %2839  ;;  %2147 = vmatmul.mubr.f32.gmra.mrb[16].mxu1 %v1879_v47  ;;  %v3976_v40 = vmul.f32 %v1000_v17, %v3920_v55  ;;  %v1001_v2 = vmul.f32 0.044715, %v3954_v34  ;;  %v1002_v39 = vmul.f32 0.044715, %v3957_v8  ;;  %v1376_v63 = vadd.f32 %v1248_v58, %v3830_v41 }
 0x1bf   : > { %v586_v48 = vpop.f32.mrb[46].mxu0  ;;  %v1882_v57 = vmul.f32 %v1754_v32, %v3899_v20  ;;  %v1753_v60 = vadd.f32 1.0, %v2840_v62  ;;  %v1003_v14 = vmul.f32 0.044715, %v3960_v61  ;;  %2847 = vtanh.f32 %v1501_v0 }
 0x1c0   : > { %v588_v51 = vpop.f32.mrb[47].mxu0  ;;  %v1004_v46 = vmul.f32 0.044715, %v3968_v36  ;;  %v3985_v25 = vmul.f32 0.5, %v3814_v12  ;;  %v1504_v7 = vmul.f32 0.7978846, %v1376_v63  ;;  %v1247_v4 = vmul.f32 %v3866_v27, %v3826_v6 }
 0x1c1   : > { %v2842_v29 = vpop.eup %2841  ;;  %2151 = vmatprep.mubr.f32.mxu1 %v1882_v57  ;;  %v1881_v13 = vmul.f32 %v1753_v60, %v857_v9  ;;  %v3990_v19 = vadd.f32 %v586_v48, %v3576_v30  ;;  %v3993_v20 = vmul.f32 0.5, %v3830_v41  ;;  %v1250_v16 = vmul.f32 %v3910_v52, %v3869_v44 }
 0x1c2   : > { %v3998_v12 = vmul.f32 %v1001_v2, %v3954_v34  ;;  %v1756_v26 = vadd.f32 1.0, %v2842_v29  ;;  %v4001_v59 = vadd.f32 %v588_v51, %v3579_v31  ;;  %2849 = vtanh.f32 %v1504_v7 }
 0x1c3   : > { %v592_v43 = vpop.f32.mrb[48].mxu0  ;;  %2152 = vmatmul.mubr.f32.gmra.mrb[18].mxu1 %v1881_v13  ;;  %v4004_v9 = vmul.f32 %v1002_v39, %v3957_v8  ;;  %v4007_v41 = vmul.f32 %v1003_v14, %v3960_v61  ;;  %v1375_v17 = vadd.f32 %v1247_v4, %v3826_v6  ;;  %v1378_v52 = vadd.f32 %v1250_v16, %v3869_v44 }
 0x1c4   : > { %v594_v27 = vpop.f32.mrb[49].mxu0  ;;  %v1884_v5 = vmul.f32 %v1756_v26, %v3938_v15  ;;  %v4013_v23 = vmul.f32 %v1004_v46, %v3968_v36  ;;  %v4016_v28 = vmul.f32 0.5, %v3826_v6  ;;  %v1249_v10 = vmul.f32 %v3906_v50, %v3857_v54 }
 0x1c5   : > { %v1005_v3 = vmul.f32 0.044715, %v3990_v19  ;;  %v1503_v37 = vmul.f32 0.7978846, %v1375_v17  ;;  %v4022_v38 = vmul.f32 0.5, %v3869_v44  ;;  %v1252_v53 = vmul.f32 %v3929_v11, %v3884_v49 }
 0x1c6   : > { %v2844_v47 = vpop.eup %2843  ;;  %2156 = vmatprep.mubr.f32.mxu1 %v1884_v5  ;;  %v1006_v15 = vmul.f32 0.044715, %v4001_v59  ;;  %v1506_v58 = vmul.f32 0.7978846, %v1378_v52  ;;  %v1377_v6 = vadd.f32 %v1249_v10, %v3857_v54  ;;  %v1251_v50 = vmul.f32 %v3926_v35, %v3879_v18 }
 0x1c7   : > { %v598_v32 = vpop.f32.mrb[50].mxu0  ;;  %v2846_v0 = vpop.eup %2845  ;;  %v1755_v48 = vadd.f32 1.0, %v2844_v47  ;;  %2851 = vtanh.f32 %v1503_v37  ;;  %v4031_v44 = vadd.f32 %v592_v43, %v3576_v30  ;;  %v4034_v62 = vadd.f32 %v594_v27, %v3579_v31 }
 0x1c8   : > { %v600_v11 = vpop.f32.mrb[51].mxu0  ;;  %v1758_v2 = vadd.f32 1.0, %v2846_v0  ;;  %2853 = vtanh.f32 %v1506_v58  ;;  %v1505_v39 = vmul.f32 0.7978846, %v1377_v6  ;;  %v4037_v51 = vadd.f32 %v598_v32, %v3576_v30 }
 0x1c9   : > { %v2848_v63 = vpop.eup %2847  ;;  %v1883_v57 = vmul.f32 %v1755_v48, %v3949_v22  ;;  %v4041_v35 = vadd.f32 %v600_v11, %v3579_v31  ;;  %v1380_v60 = vadd.f32 %v1252_v53, %v3884_v49  ;;  %v1379_v14 = vadd.f32 %v1251_v50, %v3879_v18 }
 0x1ca   : > { %v1886_v7 = vmul.f32 %v1758_v2, %v3963_v56  ;;  %v1757_v4 = vadd.f32 1.0, %v2848_v63  ;;  %v4047_v29 = vmul.f32 0.5, %v3857_v54  ;;  %2855 = vtanh.f32 %v1505_v39 }
 0x1cb   : > { %v604_v46 = vpop.f32.mrb[52].mxu0  ;;  %2157 = vmatmul.mubr.f32.gmra.mrb[20].mxu1 %v1883_v57  ;;  %v4050_v43 = vmul.f32 %v1005_v3, %v3990_v19  ;;  %v1007_v22 = vmul.f32 0.044715, %v4031_v44  ;;  %v1508_v16 = vmul.f32 0.7978846, %v1380_v60  ;;  %v4054_v17 = vmul.f32 %v1006_v15, %v4001_v59 }
 0x1cc   : > { %v606_v13 = vpop.f32.mrb[53].mxu0  ;;  %v1507_v26 = vmul.f32 0.7978846, %v1379_v14  ;;  %v2850_v27 = vpop.eup %2849  ;;  %2161 = vmatprep.mubr.f32.mxu1 %v1886_v7  ;;  %v1008_v56 = vmul.f32 0.044715, %v4034_v62  ;;  %v1885_v5 = vmul.f32 %v1757_v4, %v3985_v25  ;;  %v4061_v3 = vadd.f32 %v604_v46, %v3576_v30 }
 0x1cd   : > { %v1009_v54 = vmul.f32 0.044715, %v4037_v51  ;;  %v1010_v52 = vmul.f32 0.044715, %v4041_v35  ;;  %v1760_v10 = vadd.f32 1.0, %v2850_v27  ;;  %2857 = vtanh.f32 %v1508_v16 }
 0x1ce   : > { %v4064_v53 = vmul.f32 0.5, %v3884_v49  ;;  %2859 = vtanh.f32 %v1507_v26  ;;  %v4067_v47 = vadd.f32 %v606_v13, %v3579_v31  ;;  %v1254_v15 = vmul.f32 %v3941_v33, %v3896_v42 }
 0x1cf   : > { %v610_v37 = vpop.f32.mrb[54].mxu0  ;;  %2162 = vmatmul.mubr.f32.gmra.mrb[22].mxu1 %v1885_v5  ;;  %v1888_v25 = vmul.f32 %v1760_v10, %v3993_v20  ;;  %v4073_v6 = vmul.f32 %v1007_v22, %v4031_v44  ;;  %v4076_v32 = vmul.f32 0.5, %v3879_v18  ;;  %v1253_v49 = vmul.f32 %v3935_v45, %v3893_v24 }
 0x1d0   : > { %v612_v58 = vpop.f32.mrb[55].mxu0  ;;  %v4081_v50 = vmul.f32 %v1008_v56, %v4034_v62  ;;  %v4084_v0 = vmul.f32 %v1009_v54, %v4037_v51  ;;  %v4087_v33 = vmul.f32 0.5, %v3896_v42  ;;  %v1382_v20 = vadd.f32 %v1254_v15, %v3896_v42 }
 0x1d1   : > { %v2852_v48 = vpop.eup %2851  ;;  %2166 = vmatprep.mubr.f32.mxu1 %v1888_v25  ;;  %v4091_v11 = vmul.f32 %v1010_v52, %v4041_v35  ;;  %v1011_v18 = vmul.f32 0.044715, %v4061_v3  ;;  %v1381_v45 = vadd.f32 %v1253_v49, %v3893_v24  ;;  %v1256_v2 = vmul.f32 %v3976_v40, %v3920_v55 }
 0x1d2   : > { %v2854_v63 = vpop.eup %2853  ;;  %v1759_v57 = vadd.f32 1.0, %v2852_v48  ;;  %v1012_v60 = vmul.f32 0.044715, %v4067_v47  ;;  %v1510_v14 = vmul.f32 0.7978846, %v1382_v20  ;;  %v1255_v42 = vmul.f32 %v3973_v1, %v3917_v21 }
 0x1d3   : > { %v616_v39 = vpop.f32.mrb[56].mxu0  ;;  %v1762_v7 = vadd.f32 1.0, %v2854_v63  ;;  %v1509_v4 = vmul.f32 0.7978846, %v1381_v45  ;;  %v4101_v13 = vadd.f32 %v610_v37, %v3576_v30  ;;  %v1384_v22 = vadd.f32 %v1256_v2, %v3920_v55 }
 0x1d4   : > { %v618_v46 = vpop.f32.mrb[57].mxu0  ;;  %v2856_v16 = vpop.eup %2855  ;;  %v1887_v40 = vmul.f32 %v1759_v57, %v4016_v28  ;;  %2861 = vtanh.f32 %v1510_v14  ;;  %v4106_v26 = vadd.f32 %v612_v58, %v3579_v31  ;;  %v1383_v27 = vadd.f32 %v1255_v42, %v3917_v21 }
 0x1d5   : > { %v1890_v56 = vmul.f32 %v1762_v7, %v4022_v38  ;;  %v1761_v1 = vadd.f32 1.0, %v2856_v16  ;;  %2863 = vtanh.f32 %v1509_v4  ;;  %v1512_v54 = vmul.f32 0.7978846, %v1384_v22 }
 0x1d6   : > { %2167 = vmatmul.mubr.f32.gmra.mrb[24].mxu1 %v1887_v40  ;;  %v4111_v5 = vmul.f32 %v1011_v18, %v4061_v3  ;;  %v4114_v10 = vmul.f32 0.5, %v3893_v24  ;;  %v1511_v28 = vmul.f32 0.7978846, %v1383_v27  ;;  %v4117_v37 = vadd.f32 %v616_v39, %v3576_v30 }
 0x1d7   : > { %v622_v52 = vpop.f32.mrb[58].mxu0  ;;  %v2858_v58 = vpop.eup %2857  ;;  %2171 = vmatprep.mubr.f32.mxu1 %v1890_v56  ;;  %v1013_v38 = vmul.f32 0.044715, %v4101_v13  ;;  %2865 = vtanh.f32 %v1512_v54  ;;  %v4121_v25 = vadd.f32 %v618_v46, %v3579_v31  ;;  %v1258_v49 = vmul.f32 %v4004_v9, %v3957_v8 }
 0x1d8   : > { %v624_v15 = vpop.f32.mrb[59].mxu0  ;;  %v2860_v20 = vpop.eup %2859  ;;  %v1889_v24 = vmul.f32 %v1761_v1, %v4047_v29  ;;  %v1764_v48 = vadd.f32 1.0, %v2858_v58  ;;  %v1014_v18 = vmul.f32 0.044715, %v4106_v26  ;;  %2867 = vtanh.f32 %v1511_v28 }
 0x1d9   : > { %v1763_v45 = vadd.f32 1.0, %v2860_v20  ;;  %v4128_v2 = vmul.f32 %v1012_v60, %v4067_v47  ;;  %v1386_v39 = vadd.f32 %v1258_v49, %v3957_v8  ;;  %v1257_v63 = vmul.f32 %v3998_v12, %v3954_v34 }
 0x1da   : > { %2172 = vmatmul.mubr.f32.gmra.mrb[26].mxu1 %v1889_v24  ;;  %v1892_v9 = vmul.f32 %v1764_v48, %v4064_v53  ;;  %v872_v14 = vmul.f32 0.5, %v3920_v55  ;;  %v871_v29 = vmul.f32 0.5, %v3917_v21  ;;  %v1015_v42 = vmul.f32 0.044715, %v4117_v37 }
 0x1db   : > { %v628_v57 = vpop.f32.mrb[60].mxu0  ;;  %v4138_v7 = vmul.f32 %v1013_v38, %v4101_v13  ;;  %v1016_v60 = vmul.f32 0.044715, %v4121_v25  ;;  %v1514_v4 = vmul.f32 0.7978846, %v1386_v39  ;;  %v1385_v22 = vadd.f32 %v1257_v63, %v3954_v34 }
 0x1dc   : > { %v630_v46 = vpop.f32.mrb[61].mxu0  ;;  %2176 = vmatprep.mubr.f32.mxu1 %v1892_v9  ;;  %v1891_v12 = vmul.f32 %v1763_v45, %v4076_v32  ;;  %v4144_v53 = vmul.f32 %v1014_v18, %v4106_v26  ;;  %v4147_v55 = vmul.f32 0.5, %v3957_v8  ;;  %v1260_v21 = vmul.f32 %v4013_v23, %v3968_v36 }
 0x1dd   : > { %2869 = vtanh.f32 %v1514_v4  ;;  %v1513_v16 = vmul.f32 0.7978846, %v1385_v22  ;;  %v4152_v40 = vadd.f32 %v622_v52, %v3576_v30  ;;  %v1259_v27 = vmul.f32 %v4007_v41, %v3960_v61 }
 0x1de   : > { %v2862_v1 = vpop.eup %2861  ;;  %2177 = vmatmul.mubr.f32.gmra.mrb[28].mxu1 %v1891_v12  ;;  %v4157_v32 = vmul.f32 %v1015_v42, %v4117_v37  ;;  %v4160_v8 = vmul.f32 0.5, %v3954_v34  ;;  %v4163_v54 = vadd.f32 %v624_v15, %v3579_v31  ;;  %v1388_v23 = vadd.f32 %v1260_v21, %v3968_v36 }
 0x1df   : > { %v634_v56 = vpop.f32.mrb[62].mxu0  ;;  %v2864_v52 = vpop.eup %2863  ;;  %v1766_v58 = vadd.f32 1.0, %v2862_v1  ;;  %v4167_v38 = vmul.f32 %v1016_v60, %v4121_v25  ;;  %2871 = vtanh.f32 %v1513_v16  ;;  %v1387_v41 = vadd.f32 %v1259_v27, %v3960_v61 }
 0x1e0   : > { %v636_v28 = vpop.f32.mrb[63].mxu0  ;;  %v1765_v49 = vadd.f32 1.0, %v2864_v52  ;;  %v1516_v20 = vmul.f32 0.7978846, %v1388_v23  ;;  %v4171_v24 = vadd.f32 %v628_v57, %v3576_v30  ;;  %v1262_v34 = vmul.f32 %v4054_v17, %v4001_v59 }
 0x1e1   : > { %v2866_v15 = vpop.eup %2865  ;;  %v1894_v48 = vmul.f32 %v1766_v58, %v4087_v33  ;;  %v1017_v18 = vmul.f32 0.044715, %v4152_v40  ;;  %v1515_v45 = vmul.f32 0.7978846, %v1387_v41  ;;  %v4178_v39 = vadd.f32 %v630_v46, %v3579_v31 }
 0x1e2   : > { %v2868_v9 = vpop.eup %2867  ;;  %v1893_v42 = vmul.f32 %v1765_v49, %v4114_v10  ;;  %v1768_v60 = vadd.f32 1.0, %v2866_v15  ;;  %v1018_v57 = vmul.f32 0.044715, %v4163_v54  ;;  %2873 = vtanh.f32 %v1516_v20 }
 0x1e3   : > { %v640_v63 = vpop.f32.mrb[64].mxu0  ;;  %2181 = vmatprep.mubr.f32.mxu1 %v1894_v48  ;;  %v1767_v17 = vadd.f32 1.0, %v2868_v9  ;;  %v876_v22 = vmul.f32 0.5, %v3968_v36  ;;  %2875 = vtanh.f32 %v1515_v45  ;;  %v1390_v33 = vadd.f32 %v1262_v34, %v4001_v59 }
 0x1e4   : > { %v642_v4 = vpop.f32.mrb[65].mxu0  ;;  %2182 = vmatmul.mubr.f32.gmra.mrb[30].mxu1 %v1893_v42  ;;  %v1896_v12 = vmul.f32 %v1768_v60, %v872_v14  ;;  %v875_v46 = vmul.f32 0.5, %v3960_v61  ;;  %v1019_v21 = vmul.f32 0.044715, %v4171_v24  ;;  %v1261_v10 = vmul.f32 %v4050_v43, %v3990_v19 }
 0x1e5   : > { %v4189_v16 = vmul.f32 %v1017_v18, %v4152_v40  ;;  %v1020_v27 = vmul.f32 0.044715, %v4178_v39  ;;  %v1518_v1 = vmul.f32 0.7978846, %v1390_v33  ;;  %v1264_v36 = vmul.f32 %v4081_v50, %v4034_v62 }
 0x1e6   : > { %2186 = vmatprep.mubr.f32.mxu1 %v1896_v12  ;;  %v1895_v52 = vmul.f32 %v1767_v17, %v871_v29  ;;  %v4195_v14 = vmul.f32 %v1018_v57, %v4163_v54  ;;  %v1389_v61 = vadd.f32 %v1261_v10, %v3990_v19  ;;  %v4199_v58 = vadd.f32 %v634_v56, %v3576_v30 }
 0x1e7   : > { %v646_v23 = vpop.f32.mrb[66].mxu0  ;;  %v2870_v41 = vpop.eup %2869  ;;  %2877 = vtanh.f32 %v1518_v1  ;;  %v4204_v49 = vadd.f32 %v636_v28, %v3579_v31  ;;  %v1392_v50 = vadd.f32 %v1264_v36, %v4034_v62  ;;  %v1263_v29 = vmul.f32 %v4073_v6, %v4031_v44 }
 0x1e8   : > { %v4201_v43 = vpop.f32.mrb[67].mxu0  ;;  %2187 = vmatmul.mubr.f32.gmra.mrb[32].mxu1 %v1895_v52  ;;  %v1770_v20 = vadd.f32 1.0, %v2870_v41  ;;  %v878_v34 = vmul.f32 0.5, %v4001_v59  ;;  %v4211_v15 = vmul.f32 0.5, %v3990_v19  ;;  %v1517_v56 = vmul.f32 0.7978846, %v1389_v61 }
 0x1e9   : > { %v2872_v48 = vpop.eup %2871  ;;  %v4214_v18 = vmul.f32 %v1019_v21, %v4171_v24  ;;  %v4217_v28 = vmul.f32 %v1020_v27, %v4178_v39  ;;  %v1520_v45 = vmul.f32 0.7978846, %v1392_v50  ;;  %v1391_v9 = vadd.f32 %v1263_v29, %v4031_v44 }
 0x1ea   : > { %v1898_v6 = vmul.f32 %v1770_v20, %v4147_v55  ;;  %v1769_v60 = vadd.f32 1.0, %v2872_v48  ;;  %2879 = vtanh.f32 %v1517_v56  ;;  %v4222_v59 = vadd.f32 %v640_v63, %v3576_v30 }
 0x1eb   : > { %v652_v42 = vpop.f32.mrb[68].mxu0  ;;  %v1021_v57 = vmul.f32 0.044715, %v4199_v58  ;;  %v1022_v17 = vmul.f32 0.044715, %v4204_v49  ;;  %2881 = vtanh.f32 %v1520_v45  ;;  %v4228_v10 = vadd.f32 %v642_v4, %v3579_v31 }
 0x1ec   : > { %v654_v19 = vpop.f32.mrb[69].mxu0  ;;  %v1519_v33 = vmul.f32 0.7978846, %v1391_v9  ;;  %v2874_v12 = vpop.eup %2873  ;;  %2191 = vmatprep.mubr.f32.mxu1 %v1898_v6  ;;  %v1897_v21 = vmul.f32 %v1769_v60, %v4160_v8  ;;  %v1266_v55 = vmul.f32 %v4091_v11, %v4041_v35  ;;  %v1265_v63 = vmul.f32 %v4084_v0, %v4037_v51 }
 0x1ed   : > { %v2876_v27 = vpop.eup %2875  ;;  %v1772_v1 = vadd.f32 1.0, %v2874_v12  ;;  %v880_v36 = vmul.f32 0.5, %v4034_v62  ;;  %v4236_v52 = vmul.f32 0.5, %v4031_v44  ;;  %v1023_v4 = vmul.f32 0.044715, %v4222_v59 }
 0x1ee   : > { %2883 = vtanh.f32 %v1519_v33  ;;  %2192 = vmatmul.mubr.f32.gmra.mrb[34].mxu1 %v1897_v21  ;;  %v1771_v8 = vadd.f32 1.0, %v2876_v27  ;;  %v1394_v41 = vadd.f32 %v1266_v55, %v4041_v35  ;;  %v1393_v11 = vadd.f32 %v1265_v63, %v4037_v51 }
 0x1ef   : > { %v658_v61 = vpop.f32.mrb[70].mxu0  ;;  %v1900_v0 = vmul.f32 %v1772_v1, %v876_v22  ;;  %v4244_v29 = vmul.f32 %v1021_v57, %v4199_v58  ;;  %v4247_v62 = vmul.f32 %v1022_v17, %v4204_v49  ;;  %v1268_v44 = vmul.f32 %v4128_v2, %v4067_v47 }
 0x1f0   : > { %v4241_v50 = vpop.f32.mrb[71].mxu0  ;;  %v1899_v20 = vmul.f32 %v1771_v8, %v875_v46  ;;  %v1024_v56 = vmul.f32 0.044715, %v4228_v10  ;;  %v1522_v48 = vmul.f32 0.7978846, %v1394_v41  ;;  %v4253_v6 = vmul.f32 0.5, %v4041_v35 }
 0x1f1   : > { %v1521_v45 = vmul.f32 0.7978846, %v1393_v11  ;;  %v2878_v9 = vpop.eup %2877  ;;  %2196 = vmatprep.mubr.f32.mxu1 %v1900_v0  ;;  %v4256_v22 = vadd.f32 %v646_v23, %v3576_v30  ;;  %v1396_v60 = vadd.f32 %v1268_v44, %v4067_v47  ;;  %v1267_v57 = vmul.f32 %v4111_v5, %v4061_v3 }
 0x1f2   : > { %2197 = vmatmul.mubr.f32.gmra.mrb[36].mxu1 %v1899_v20  ;;  %v1774_v2 = vadd.f32 1.0, %v2878_v9  ;;  %v4264_v46 = vmul.f32 %v1023_v4, %v4222_v59  ;;  %2885 = vtanh.f32 %v1522_v48  ;;  %v4268_v35 = vadd.f32 %v4201_v43, %v3579_v31 }
 0x1f3   : > { %v4261_v17 = vpop.f32.mrb[72].mxu0  ;;  %v4273_v23 = vmul.f32 0.5, %v4037_v51  ;;  %2887 = vtanh.f32 %v1521_v45  ;;  %v1524_v12 = vmul.f32 0.7978846, %v1396_v60  ;;  %v1395_v5 = vadd.f32 %v1267_v57, %v4061_v3 }
 0x1f4   : > { %v4270_v33 = vpop.f32.mrb[73].mxu0  ;;  %v2880_v21 = vpop.eup %2879  ;;  %v1902_v55 = vmul.f32 %v1774_v2, %v878_v34  ;;  %v4277_v63 = vmul.f32 %v1024_v56, %v4228_v10  ;;  %v4280_v27 = vadd.f32 %v652_v42, %v3576_v30  ;;  %v1270_v43 = vmul.f32 %v4144_v53, %v4106_v26 }
 0x1f5   : > { %v2882_v1 = vpop.eup %2881  ;;  %v1773_v8 = vadd.f32 1.0, %v2880_v21  ;;  %v1025_v51 = vmul.f32 0.044715, %v4256_v22  ;;  %2889 = vtanh.f32 %v1524_v12  ;;  %v1523_v4 = vmul.f32 0.7978846, %v1395_v5 }
 0x1f6   : > { %2201 = vmatprep.mubr.f32.mxu1 %v1902_v55  ;;  %v1776_v11 = vadd.f32 1.0, %v2882_v1  ;;  %v1026_v34 = vmul.f32 0.044715, %v4268_v35  ;;  %v4289_v0 = vadd.f32 %v654_v19, %v3579_v31  ;;  %v1398_v42 = vadd.f32 %v1270_v43, %v4106_v26 }
 0x1f7   : > { %v4285_v41 = vpop.f32.mrb[74].mxu0  ;;  %v1901_v20 = vmul.f32 %v1773_v8, %v4211_v15  ;;  %v884_v56 = vmul.f32 0.5, %v4067_v47  ;;  %2891 = vtanh.f32 %v1523_v4  ;;  %v1269_v48 = vmul.f32 %v4138_v7, %v4101_v13 }
 0x1f8   : > { %v4292_v44 = vpop.f32.mrb[75].mxu0  ;;  %v2884_v53 = vpop.eup %2883  ;;  %v1904_v45 = vmul.f32 %v1776_v11, %v880_v36  ;;  %v1027_v60 = vmul.f32 0.044715, %v4280_v27  ;;  %v1526_v57 = vmul.f32 0.7978846, %v1398_v42  ;;  %v4300_v19 = vmul.f32 %v1025_v51, %v4256_v22 }
 0x1f9   : > { %v1775_v9 = vadd.f32 1.0, %v2884_v53  ;;  %2202 = vmatmul.mubr.f32.gmra.mrb[38].mxu1 %v1901_v20  ;;  %v1397_v2 = vadd.f32 %v1269_v48, %v4101_v13  ;;  %v4304_v12 = vadd.f32 %v658_v61, %v3576_v30  ;;  %v1272_v47 = vmul.f32 %v4167_v38, %v4121_v25 }
 0x1fa   : > { %2206 = vmatprep.mubr.f32.mxu1 %v1904_v45  ;;  %v4311_v7 = vmul.f32 %v1026_v34, %v4268_v35  ;;  %v883_v36 = vmul.f32 0.5, %v4061_v3  ;;  %v1028_v5 = vmul.f32 0.044715, %v4289_v0  ;;  %2893 = vtanh.f32 %v1526_v57 }
 0x1fb   : > { %v4308_v15 = vpop.f32.mrb[76].mxu0  ;;  %v1903_v55 = vmul.f32 %v1775_v9, %v4236_v52  ;;  %v1525_v61 = vmul.f32 0.7978846, %v1397_v2  ;;  %v1400_v43 = vadd.f32 %v1272_v47, %v4121_v25  ;;  %v1271_v38 = vmul.f32 %v4157_v32, %v4117_v37 }
 0x1fc   : > { %v4315_v21 = vpop.f32.mrb[77].mxu0  ;;  %v2886_v1 = vpop.eup %2885  ;;  %v4322_v8 = vmul.f32 %v1027_v60, %v4280_v27  ;;  %v886_v51 = vmul.f32 0.5, %v4106_v26  ;;  %v4326_v3 = vmul.f32 0.5, %v4101_v13  ;;  %v4330_v4 = vadd.f32 %v4241_v50, %v3579_v31 }
 0x1fd   : > { %v2888_v52 = vpop.eup %2887  ;;  %2207 = vmatmul.mubr.f32.gmra.mrb[40].mxu1 %v1903_v55  ;;  %v1778_v11 = vadd.f32 1.0, %v2886_v1  ;;  %2895 = vtanh.f32 %v1525_v61  ;;  %v1029_v34 = vmul.f32 0.044715, %v4304_v12  ;;  %v1528_v32 = vmul.f32 0.7978846, %v1400_v43 }
 0x1fe   : > { %v1777_v53 = vadd.f32 1.0, %v2888_v52  ;;  %v4336_v20 = vmul.f32 %v1028_v5, %v4289_v0  ;;  %v4339_v13 = vmul.f32 0.5, %v4121_v25  ;;  %v1399_v26 = vadd.f32 %v1271_v38, %v4117_v37 }
 0x1ff   : > { %v4333_v42 = vpop.f32.mrb[78].mxu0  ;;  %v2890_v48 = vpop.eup %2889  ;;  %v1906_v45 = vmul.f32 %v1778_v11, %v4253_v6  ;;  %2897 = vtanh.f32 %v1528_v32  ;;  %v4347_v9 = vadd.f32 %v4261_v17, %v3576_v30  ;;  %v1274_v60 = vmul.f32 %v4195_v14, %v4163_v54 }
 0x200   : > { %v4342_v50 = vpop.f32.mrb[79].mxu0  ;;  %v1905_v57 = vmul.f32 %v1777_v53, %v4273_v23  ;;  %v1780_v2 = vadd.f32 1.0, %v2890_v48  ;;  %v1030_v25 = vmul.f32 0.044715, %v4330_v4  ;;  %v1527_v47 = vmul.f32 0.7978846, %v1399_v26 }
 0x201   : > { %v2892_v5 = vpop.eup %2891  ;;  %2211 = vmatprep.mubr.f32.mxu1 %v1906_v45  ;;  %v4354_v55 = vmul.f32 %v1029_v34, %v4304_v12  ;;  %v4357_v6 = vmul.f32 0.5, %v4117_v37  ;;  %v1402_v17 = vadd.f32 %v1274_v60, %v4163_v54  ;;  %v1273_v61 = vmul.f32 %v4189_v16, %v4152_v40 }
 0x202   : > { %2212 = vmatmul.mubr.f32.gmra.mrb[42].mxu1 %v1905_v57  ;;  %v1908_v23 = vmul.f32 %v1780_v2, %v884_v56  ;;  %v1779_v43 = vadd.f32 1.0, %v2892_v5  ;;  %2899 = vtanh.f32 %v1527_v47  ;;  %v4366_v38 = vadd.f32 %v4270_v33, %v3579_v31 }
 0x203   : > { %v4362_v14 = vpop.f32.mrb[80].mxu0  ;;  %v1031_v37 = vmul.f32 0.044715, %v4347_v9  ;;  %v4372_v52 = vmul.f32 0.5, %v4163_v54  ;;  %v1530_v11 = vmul.f32 0.7978846, %v1402_v17  ;;  %v1401_v16 = vadd.f32 %v1273_v61, %v4152_v40 }
 0x204   : > { %v4368_v1 = vpop.f32.mrb[81].mxu0  ;;  %v2894_v34 = vpop.eup %2893  ;;  %2216 = vmatprep.mubr.f32.mxu1 %v1908_v23  ;;  %v1907_v32 = vmul.f32 %v1779_v43, %v883_v36  ;;  %v4376_v56 = vmul.f32 %v1030_v25, %v4330_v4  ;;  %v4380_v33 = vadd.f32 %v4285_v41, %v3576_v30  ;;  %v1276_v53 = vmul.f32 %v4217_v28, %v4178_v39 }
 0x205   : > { %v1782_v26 = vadd.f32 1.0, %v2894_v34  ;;  %2901 = vtanh.f32 %v1530_v11  ;;  %v1529_v54 = vmul.f32 0.7978846, %v1401_v16  ;;  %v4386_v48 = vadd.f32 %v4292_v44, %v3579_v31 }
 0x206   : > { %2217 = vmatmul.mubr.f32.gmra.mrb[44].mxu1 %v1907_v32  ;;  %v1032_v36 = vmul.f32 0.044715, %v4366_v38  ;;  %v4392_v60 = vmul.f32 0.5, %v4152_v40  ;;  %v1404_v41 = vadd.f32 %v1276_v53, %v4178_v39  ;;  %v1275_v28 = vmul.f32 %v4214_v18, %v4171_v24 }
 0x207   : > { %v4388_v45 = vpop.f32.mrb[82].mxu0  ;;  %v2896_v2 = vpop.eup %2895  ;;  %v1910_v25 = vmul.f32 %v1782_v26, %v886_v51  ;;  %v4400_v44 = vmul.f32 %v1031_v37, %v4347_v9  ;;  %2903 = vtanh.f32 %v1529_v54  ;;  %v4404_v47 = vadd.f32 %v4308_v15, %v3576_v30 }
 0x208   : > { %v4397_v57 = vpop.f32.mrb[83].mxu0  ;;  %v1781_v5 = vadd.f32 1.0, %v2896_v2  ;;  %v1532_v40 = vmul.f32 0.7978846, %v1404_v41  ;;  %v1403_v17 = vadd.f32 %v1275_v28, %v4171_v24  ;;  %v4409_v61 = vadd.f32 %v4315_v21, %v3579_v31 }
 0x209   : > { %v2898_v18 = vpop.eup %2897  ;;  %2221 = vmatprep.mubr.f32.mxu1 %v1910_v25  ;;  %v1033_v51 = vmul.f32 0.044715, %v4380_v33  ;;  %v1034_v23 = vmul.f32 0.044715, %v4386_v48  ;;  %v1278_v43 = vmul.f32 %v4247_v62, %v4204_v49  ;;  %v1277_v15 = vmul.f32 %v4244_v29, %v4199_v58 }
 0x20a   : > { %v1909_v11 = vmul.f32 %v1781_v5, %v4326_v3  ;;  %v1784_v16 = vadd.f32 1.0, %v2898_v18  ;;  %2905 = vtanh.f32 %v1532_v40  ;;  %v1531_v21 = vmul.f32 0.7978846, %v1403_v17 }
 0x20b   : > { %v4417_v37 = vpop.f32.mrb[84].mxu0  ;;  %v4423_v32 = vmul.f32 %v1032_v36, %v4366_v38  ;;  %v4426_v53 = vmul.f32 0.5, %v4178_v39  ;;  %v1406_v62 = vadd.f32 %v1278_v43, %v4204_v49  ;;  %v1405_v26 = vadd.f32 %v1277_v15, %v4199_v58 }
 0x20c   : > { %v4420_v34 = vpop.f32.mrb[85].mxu0  ;;  %v2900_v29 = vpop.eup %2899  ;;  %2222 = vmatmul.mubr.f32.gmra.mrb[46].mxu1 %v1909_v11  ;;  %v1912_v54 = vmul.f32 %v1784_v16, %v4339_v13  ;;  %2907 = vtanh.f32 %v1531_v21  ;;  %v1035_v3 = vmul.f32 0.044715, %v4404_v47  ;;  %v1036_v41 = vmul.f32 0.044715, %v4409_v61 }
 0x20d   : > { %v1783_v28 = vadd.f32 1.0, %v2900_v29  ;;  %v4434_v36 = vmul.f32 0.5, %v4171_v24  ;;  %v1534_v2 = vmul.f32 0.7978846, %v1406_v62  ;;  %v1533_v39 = vmul.f32 0.7978846, %v1405_v26 }
 0x20e   : > { %2226 = vmatprep.mubr.f32.mxu1 %v1912_v54  ;;  %v4437_v25 = vmul.f32 %v1033_v51, %v4380_v33  ;;  %v4440_v5 = vmul.f32 %v1034_v23, %v4386_v48  ;;  %v4444_v13 = vadd.f32 %v4333_v42, %v3576_v30  ;;  %v1280_v40 = vmul.f32 %v4277_v63, %v4228_v10 }
 0x20f   : > { %v4448_v17 = vpop.f32.mrb[86].mxu0  ;;  %v2902_v24 = vpop.eup %2901  ;;  %v1911_v18 = vmul.f32 %v1783_v28, %v4357_v6  ;;  %v4452_v43 = vmul.f32 0.5, %v4204_v49  ;;  %2909 = vtanh.f32 %v1534_v2  ;;  %v1279_v51 = vmul.f32 %v4264_v46, %v4222_v59 }
 0x210   : > { %v4456_v23 = vpop.f32.mrb[87].mxu0  ;;  %v1786_v15 = vadd.f32 1.0, %v2902_v24  ;;  %v4459_v42 = vmul.f32 0.5, %v4199_v58  ;;  %2911 = vtanh.f32 %v1533_v39  ;;  %v4463_v63 = vadd.f32 %v4342_v50, %v3579_v31 }
 0x211   : > { %v2904_v11 = vpop.eup %2903  ;;  %2227 = vmatmul.mubr.f32.gmra.mrb[48].mxu1 %v1911_v18  ;;  %v4466_v49 = vmul.f32 %v1035_v3, %v4404_v47  ;;  %v4469_v6 = vmul.f32 %v1036_v41, %v4409_v61  ;;  %v1408_v46 = vadd.f32 %v1280_v40, %v4228_v10  ;;  %v1407_v16 = vadd.f32 %v1279_v51, %v4222_v59 }
 0x212   : > { %v1914_v58 = vmul.f32 %v1786_v15, %v4372_v52  ;;  %v1785_v62 = vadd.f32 1.0, %v2904_v11  ;;  %v1037_v50 = vmul.f32 0.044715, %v4444_v13  ;;  %v1282_v26 = vmul.f32 %v4311_v7, %v4268_v35 }
 0x213   : > { %v4473_v21 = vpop.f32.mrb[88].mxu0  ;;  %v4482_v54 = vmul.f32 0.5, %v4228_v10  ;;  %v1536_v3 = vmul.f32 0.7978846, %v1408_v46  ;;  %v1535_v41 = vmul.f32 0.7978846, %v1407_v16  ;;  %v4486_v28 = vadd.f32 %v4362_v14, %v3576_v30 }
 0x214   : > { %v4479_v29 = vpop.f32.mrb[89].mxu0  ;;  %v2906_v2 = vpop.eup %2905  ;;  %2231 = vmatprep.mubr.f32.mxu1 %v1914_v58  ;;  %v1913_v52 = vmul.f32 %v1785_v62, %v4392_v60  ;;  %v1038_v39 = vmul.f32 0.044715, %v4463_v63  ;;  %v1410_v40 = vadd.f32 %v1282_v26, %v4268_v35  ;;  %v1281_v7 = vmul.f32 %v4300_v19, %v4256_v22 }
 0x215   : > { %v1788_v24 = vadd.f32 1.0, %v2906_v2  ;;  %2913 = vtanh.f32 %v1536_v3  ;;  %v4494_v10 = vmul.f32 0.5, %v4222_v59  ;;  %v4498_v14 = vadd.f32 %v4368_v1, %v3579_v31 }
 0x216   : > { %v2908_v51 = vpop.eup %2907  ;;  %2232 = vmatmul.mubr.f32.gmra.mrb[50].mxu1 %v1913_v52  ;;  %v4503_v60 = vmul.f32 %v1037_v50, %v4444_v13  ;;  %2915 = vtanh.f32 %v1535_v41  ;;  %v1538_v15 = vmul.f32 0.7978846, %v1410_v40  ;;  %v1409_v19 = vadd.f32 %v1281_v7, %v4256_v22 }
 0x217   : > { %v4500_v18 = vpop.f32.mrb[90].mxu0  ;;  %v1916_v59 = vmul.f32 %v1788_v24, %v4426_v53  ;;  %v1787_v46 = vadd.f32 1.0, %v2908_v51  ;;  %v1039_v16 = vmul.f32 0.044715, %v4486_v28  ;;  %v4512_v1 = vadd.f32 %v4388_v45, %v3576_v30 }
 0x218   : > { %v4506_v11 = vpop.f32.mrb[91].mxu0  ;;  %v4515_v58 = vmul.f32 %v1038_v39, %v4463_v63  ;;  %2917 = vtanh.f32 %v1538_v15  ;;  %v1537_v62 = vmul.f32 0.7978846, %v1409_v19  ;;  %v1284_v50 = vmul.f32 %v4336_v20, %v4289_v0 }
 0x219   : > { %v2910_v26 = vpop.eup %2909  ;;  %2236 = vmatprep.mubr.f32.mxu1 %v1916_v59  ;;  %v1915_v3 = vmul.f32 %v1787_v46, %v4434_v36  ;;  %v1040_v53 = vmul.f32 0.044715, %v4498_v14  ;;  %v4523_v41 = vadd.f32 %v4397_v57, %v3579_v31  ;;  %v1283_v45 = vmul.f32 %v4322_v8, %v4280_v27 }
 0x21a   : > { %v2912_v52 = vpop.eup %2911  ;;  %v1790_v39 = vadd.f32 1.0, %v2910_v26  ;;  %v898_v40 = vmul.f32 0.5, %v4268_v35  ;;  %2919 = vtanh.f32 %v1537_v62  ;;  %v1412_v20 = vadd.f32 %v1284_v50, %v4289_v0 }
 0x21b   : > { %v4527_v2 = vpop.f32.mrb[92].mxu0  ;;  %2237 = vmatmul.mubr.f32.gmra.mrb[52].mxu1 %v1915_v3  ;;  %v1789_v36 = vadd.f32 1.0, %v2912_v52  ;;  %v4534_v24 = vmul.f32 %v1039_v16, %v4486_v28  ;;  %v1041_v57 = vmul.f32 0.044715, %v4512_v1  ;;  %v1411_v8 = vadd.f32 %v1283_v45, %v4280_v27 }
 0x21c   : > { %v4531_v7 = vpop.f32.mrb[93].mxu0  ;;  %v1918_v51 = vmul.f32 %v1790_v39, %v4452_v43  ;;  %v897_v15 = vmul.f32 0.5, %v4256_v22  ;;  %v1540_v19 = vmul.f32 0.7978846, %v1412_v20  ;;  %v1286_v35 = vmul.f32 %v4376_v56, %v4330_v4 }
 0x21d   : > { %v1917_v59 = vmul.f32 %v1789_v36, %v4459_v42  ;;  %v4544_v46 = vmul.f32 %v1040_v53, %v4498_v14  ;;  %v1042_v16 = vmul.f32 0.044715, %v4523_v41  ;;  %v1539_v62 = vmul.f32 0.7978846, %v1411_v8 }
 0x21e   : > { %2241 = vmatprep.mubr.f32.mxu1 %v1918_v51  ;;  %2921 = vtanh.f32 %v1540_v19  ;;  %v4549_v50 = vadd.f32 %v4417_v37, %v3576_v30  ;;  %v1414_v22 = vadd.f32 %v1286_v35, %v4330_v4  ;;  %v1285_v43 = vmul.f32 %v4354_v55, %v4304_v12 }
 0x21f   : > { %v4554_v56 = vpop.f32.mrb[94].mxu0  ;;  %v2914_v42 = vpop.eup %2913  ;;  %2242 = vmatmul.mubr.f32.gmra.mrb[54].mxu1 %v1917_v59  ;;  %v4557_v26 = vmul.f32 %v1041_v57, %v4512_v1  ;;  %v4560_v3 = vmul.f32 0.5, %v4289_v0  ;;  %2923 = vtanh.f32 %v1539_v62  ;;  %v4564_v37 = vadd.f32 %v4420_v34, %v3579_v31 }
 0x220   : > { %v4566_v53 = vpop.f32.mrb[95].mxu0  ;;  %v2916_v45 = vpop.eup %2915  ;;  %v1792_v52 = vadd.f32 1.0, %v2914_v42  ;;  %v899_v55 = vmul.f32 0.5, %v4280_v27  ;;  %v1542_v39 = vmul.f32 0.7978846, %v1414_v22  ;;  %v1413_v20 = vadd.f32 %v1285_v43, %v4304_v12 }
 0x221   : > { %v1791_v36 = vadd.f32 1.0, %v2916_v45  ;;  %v4571_v57 = vmul.f32 %v1042_v16, %v4523_v41  ;;  %v4575_v0 = vadd.f32 %v4448_v17, %v3576_v30  ;;  %v1288_v34 = vmul.f32 %v4423_v32, %v4366_v38 }
 0x222   : > { %v2918_v51 = vpop.eup %2917  ;;  %v1920_v19 = vmul.f32 %v1792_v52, %v4482_v54  ;;  %v1043_v27 = vmul.f32 0.044715, %v4549_v50  ;;  %2925 = vtanh.f32 %v1542_v39  ;;  %v1541_v35 = vmul.f32 0.7978846, %v1413_v20 }
 0x223   : > { %v4579_v8 = vpop.f32.mrb[96].mxu0  ;;  %v1919_v16 = vmul.f32 %v1791_v36, %v4494_v10  ;;  %v1794_v62 = vadd.f32 1.0, %v2918_v51  ;;  %v1044_v17 = vmul.f32 0.044715, %v4564_v37  ;;  %v1416_v22 = vadd.f32 %v1288_v34, %v4366_v38 }
 0x224   : > { %v4583_v59 = vpop.f32.mrb[97].mxu0  ;;  %v2920_v43 = vpop.eup %2919  ;;  %2246 = vmatprep.mubr.f32.mxu1 %v1920_v19  ;;  %v902_v32 = vmul.f32 0.5, %v4330_v4  ;;  %2927 = vtanh.f32 %v1541_v35  ;;  %v4591_v54 = vadd.f32 %v4456_v23, %v3579_v31  ;;  %v1287_v42 = vmul.f32 %v4400_v44, %v4347_v9 }
 0x225   : > { %2247 = vmatmul.mubr.f32.gmra.mrb[56].mxu1 %v1919_v16  ;;  %v1922_v45 = vmul.f32 %v1794_v62, %v898_v40  ;;  %v1793_v10 = vadd.f32 1.0, %v2920_v43  ;;  %v1045_v52 = vmul.f32 0.044715, %v4575_v0  ;;  %v1544_v39 = vmul.f32 0.7978846, %v1416_v22 }
 0x226   : > { %v4599_v36 = vmul.f32 %v1043_v27, %v4549_v50  ;;  %v901_v4 = vmul.f32 0.5, %v4304_v12  ;;  %v1415_v34 = vadd.f32 %v1287_v42, %v4347_v9  ;;  %v1290_v23 = vmul.f32 %v4440_v5, %v4386_v48 }
 0x227   : > { %v4596_v20 = vpop.f32.mrb[98].mxu0  ;;  %2251 = vmatprep.mubr.f32.mxu1 %v1922_v45  ;;  %v1921_v44 = vmul.f32 %v1793_v10, %v897_v15  ;;  %v4608_v40 = vmul.f32 %v1044_v17, %v4564_v37  ;;  %2929 = vtanh.f32 %v1544_v39  ;;  %v4612_v19 = vadd.f32 %v4473_v21, %v3576_v30 }
 0x228   : > { %v4605_v51 = vpop.f32.mrb[99].mxu0  ;;  %v2922_v27 = vpop.eup %2921  ;;  %v4615_v12 = vmul.f32 0.5, %v4366_v38  ;;  %v1543_v35 = vmul.f32 0.7978846, %v1415_v34  ;;  %v1418_v16 = vadd.f32 %v1290_v23, %v4386_v48  ;;  %v1289_v5 = vmul.f32 %v4437_v25, %v4380_v33 }
 0x229   : > { %v2924_v62 = vpop.eup %2923  ;;  %2252 = vmatmul.mubr.f32.gmra.mrb[58].mxu1 %v1921_v44  ;;  %v1796_v15 = vadd.f32 1.0, %v2922_v27  ;;  %v4621_v17 = vmul.f32 %v1045_v52, %v4575_v0  ;;  %v1046_v22 = vmul.f32 0.044715, %v4591_v54  ;;  %v4626_v21 = vadd.f32 %v4479_v29, %v3579_v31 }
 0x22a   : > { %v1795_v43 = vadd.f32 1.0, %v2924_v62  ;;  %v4631_v42 = vmul.f32 0.5, %v4347_v9  ;;  %2931 = vtanh.f32 %v1543_v35  ;;  %v1546_v25 = vmul.f32 0.7978846, %v1418_v16 }
 0x22b   : > { %v4628_v38 = vpop.f32.mrb[100].mxu0  ;;  %v1924_v10 = vmul.f32 %v1796_v15, %v4560_v3  ;;  %v1047_v52 = vmul.f32 0.044715, %v4612_v19  ;;  %v1417_v39 = vadd.f32 %v1289_v5, %v4380_v33  ;;  %v4640_v29 = vadd.f32 %v4500_v18, %v3576_v30 }
 0x22c   : > { %v4633_v45 = vpop.f32.mrb[101].mxu0  ;;  %v2926_v34 = vpop.eup %2925  ;;  %v1923_v23 = vmul.f32 %v1795_v43, %v899_v55  ;;  %2933 = vtanh.f32 %v1546_v25  ;;  %v4644_v9 = vadd.f32 %v4506_v11, %v3579_v31  ;;  %v1292_v44 = vmul.f32 %v4469_v6, %v4409_v61 }
 0x22d   : > { %2256 = vmatprep.mubr.f32.mxu1 %v1924_v10  ;;  %v1798_v3 = vadd.f32 1.0, %v2926_v34  ;;  %v4649_v27 = vmul.f32 %v1046_v22, %v4591_v54  ;;  %v1048_v35 = vmul.f32 0.044715, %v4626_v21  ;;  %v1545_v16 = vmul.f32 0.7978846, %v1417_v39 }
 0x22e   : > { %v2928_v5 = vpop.eup %2927  ;;  %2257 = vmatmul.mubr.f32.gmra.mrb[60].mxu1 %v1923_v23  ;;  %v906_v55 = vmul.f32 0.5, %v4386_v48  ;;  %v4656_v11 = vmul.f32 0.5, %v4380_v33  ;;  %v1420_v62 = vadd.f32 %v1292_v44, %v4409_v61  ;;  %v1291_v6 = vmul.f32 %v4466_v49, %v4404_v47 }
 0x22f   : > { %v4652_v18 = vpop.f32.mrb[102].mxu0  ;;  %v1926_v22 = vmul.f32 %v1798_v3, %v902_v32  ;;  %v1797_v43 = vadd.f32 1.0, %v2928_v5  ;;  %2935 = vtanh.f32 %v1545_v16  ;;  %v1049_v25 = vmul.f32 0.044715, %v4640_v29 }
 0x230   : > { %v4661_v15 = vpop.f32.mrb[103].mxu0  ;;  %v4665_v10 = vmul.f32 %v1047_v52, %v4612_v19  ;;  %v1050_v48 = vmul.f32 0.044715, %v4644_v9  ;;  %v1548_v39 = vmul.f32 0.7978846, %v1420_v62  ;;  %v1419_v33 = vadd.f32 %v1291_v6, %v4404_v47 }
 0x231   : > { %v2930_v34 = vpop.eup %2929  ;;  %2261 = vmatprep.mubr.f32.mxu1 %v1926_v22  ;;  %v1925_v23 = vmul.f32 %v1797_v43, %v901_v4  ;;  %v4670_v49 = vmul.f32 %v1048_v35, %v4626_v21  ;;  %v4674_v32 = vadd.f32 %v4527_v2, %v3576_v30  ;;  %v1294_v44 = vmul.f32 %v4515_v58, %v4463_v63 }
 0x232   : > { %v1800_v3 = vadd.f32 1.0, %v2930_v34  ;;  %2937 = vtanh.f32 %v1548_v39  ;;  %v1547_v16 = vmul.f32 0.7978846, %v1419_v33  ;;  %v4682_v5 = vadd.f32 %v4531_v7, %v3579_v31 }
 0x233   : > { %v4678_v52 = vpop.f32.mrb[104].mxu0  ;;  %2262 = vmatmul.mubr.f32.gmra.mrb[62].mxu1 %v1925_v23  ;;  %v4687_v35 = vmul.f32 %v1049_v25, %v4640_v29  ;;  %v908_v2 = vmul.f32 0.5, %v4409_v61  ;;  %v1422_v62 = vadd.f32 %v1294_v44, %v4463_v63  ;;  %v1293_v58 = vmul.f32 %v4503_v60, %v4444_v13 }
 0x234   : > { %v4684_v4 = vpop.f32.mrb[105].mxu0  ;;  %v2932_v6 = vpop.eup %2931  ;;  %v1928_v22 = vmul.f32 %v1800_v3, %v4615_v12  ;;  %v4695_v43 = vmul.f32 %v1050_v48, %v4644_v9  ;;  %2939 = vtanh.f32 %v1547_v16  ;;  %v4699_v7 = vadd.f32 %v4554_v56, %v3576_v30 }
 0x235   : > { %v1799_v25 = vadd.f32 1.0, %v2932_v6  ;;  %v1550_v39 = vmul.f32 0.7978846, %v1422_v62  ;;  %v1421_v61 = vadd.f32 %v1293_v58, %v4444_v13  ;;  %v4704_v33 = vadd.f32 %v4566_v53, %v3579_v31 }
 0x236   : > { %v2934_v34 = vpop.eup %2933  ;;  %2266 = vmatprep.mubr.f32.mxu1 %v1928_v22  ;;  %v1051_v12 = vmul.f32 0.044715, %v4674_v32  ;;  %v1052_v48 = vmul.f32 0.044715, %v4682_v5  ;;  %v1296_v56 = vmul.f32 %v4544_v46, %v4498_v14  ;;  %v1295_v23 = vmul.f32 %v4534_v24, %v4486_v28 }
 0x237   : > { %v4706_v60 = vpop.f32.mrb[106].mxu0  ;;  %v1927_v3 = vmul.f32 %v1799_v25, %v4631_v42  ;;  %v1802_v53 = vadd.f32 1.0, %v2934_v34  ;;  %2941 = vtanh.f32 %v1550_v39  ;;  %v1549_v16 = vmul.f32 0.7978846, %v1421_v61 }
 0x238   : > { %5528 = vst [vmem:[#allocation12_spill] sm:$0xff] %v4706_v60  ;;  %v4714_v44 = vpop.f32.mrb[107].mxu0  ;;  %v907_v62 = vmul.f32 0.5, %v4404_v47  ;;  %v4719_v58 = vmul.f32 0.5, %v4463_v63  ;;  %v1424_v6 = vadd.f32 %v1296_v56, %v4498_v14  ;;  %v1423_v22 = vadd.f32 %v1295_v23, %v4486_v28 }
 0x239   : > { %v2936_v46 = vpop.eup %2935  ;;  %2267 = vmatmul.mubr.f32.gmra.mrb[64].mxu1 %v1927_v3  ;;  %v1930_v60 = vmul.f32 %v1802_v53, %v906_v55  ;;  %2943 = vtanh.f32 %v1549_v16  ;;  %v1053_v24 = vmul.f32 0.044715, %v4699_v7  ;;  %v1054_v42 = vmul.f32 0.044715, %v4704_v33 }
 0x23a   : > { %v1801_v39 = vadd.f32 1.0, %v2936_v46  ;;  %v4728_v47 = vmul.f32 0.5, %v4444_v13  ;;  %v1552_v63 = vmul.f32 0.7978846, %v1424_v6  ;;  %v1551_v61 = vmul.f32 0.7978846, %v1423_v22 }
 0x23b   : > { %v4725_v25 = vpop.f32.mrb[108].mxu0  ;;  %2271 = vmatprep.mubr.f32.mxu1 %v1930_v60  ;;  %v4731_v34 = vmul.f32 %v1051_v12, %v4674_v32  ;;  %v4734_v56 = vmul.f32 %v1052_v48, %v4682_v5  ;;  %v4738_v55 = vadd.f32 %v4579_v8, %v3576_v30  ;;  %v1298_v23 = vmul.f32 %v4571_v57, %v4523_v41 }
 0x23c   : > { %v4742_v3 = vpop.f32.mrb[109].mxu0  ;;  %v2938_v13 = vpop.eup %2937  ;;  %v1929_v53 = vmul.f32 %v1801_v39, %v4656_v11  ;;  %v4746_v60 = vmul.f32 0.5, %v4498_v14  ;;  %2945 = vtanh.f32 %v1552_v63  ;;  %v1297_v12 = vmul.f32 %v4557_v26, %v4512_v1 }
 0x23d   : > { %v1804_v48 = vadd.f32 1.0, %v2938_v13  ;;  %v4751_v16 = vmul.f32 0.5, %v4486_v28  ;;  %2947 = vtanh.f32 %v1551_v61  ;;  %v4755_v57 = vadd.f32 %v4583_v59, %v3579_v31 }
 0x23e   : > { %v2940_v6 = vpop.eup %2939  ;;  %2272 = vmatmul.mubr.f32.gmra.mrb[66].mxu1 %v1929_v53  ;;  %v4760_v14 = vmul.f32 %v1053_v24, %v4699_v7  ;;  %v4763_v11 = vmul.f32 %v1054_v42, %v4704_v33  ;;  %v1426_v26 = vadd.f32 %v1298_v23, %v4523_v41  ;;  %v1425_v28 = vadd.f32 %v1297_v12, %v4512_v1 }
 0x23f   : > { %v4757_v8 = vpop.f32.mrb[110].mxu0  ;;  %v1932_v46 = vmul.f32 %v1804_v48, %v908_v2  ;;  %v1803_v39 = vadd.f32 1.0, %v2940_v6  ;;  %v1055_v59 = vmul.f32 0.044715, %v4738_v55  ;;  %v1300_v63 = vmul.f32 %v4608_v40, %v4564_v37 }
 0x240   : > { %v4767_v22 = vpop.f32.mrb[111].mxu0  ;;  %v4773_v61 = vmul.f32 0.5, %v4523_v41  ;;  %v1554_v24 = vmul.f32 0.7978846, %v1426_v26  ;;  %v1553_v13 = vmul.f32 0.7978846, %v1425_v28  ;;  %v4777_v42 = vadd.f32 %v4596_v20, %v3576_v30 }
 0x241   : > { %v2942_v23 = vpop.eup %2941  ;;  %2276 = vmatprep.mubr.f32.mxu1 %v1932_v46  ;;  %v1931_v53 = vmul.f32 %v1803_v39, %v907_v62  ;;  %v1056_v2 = vmul.f32 0.044715, %v4755_v57  ;;  %v1428_v12 = vadd.f32 %v1300_v63, %v4564_v37  ;;  %v1299_v48 = vmul.f32 %v4599_v36, %v4549_v50 }
 0x242   : > { %v1806_v41 = vadd.f32 1.0, %v2942_v23  ;;  %2949 = vtanh.f32 %v1554_v24  ;;  %v4786_v6 = vmul.f32 0.5, %v4512_v1  ;;  %v4790_v20 = vadd.f32 %v4605_v51, %v3579_v31 }
 0x243   : > { %v4783_v40 = vpop.f32.mrb[112].mxu0  ;;  %v2944_v62 = vpop.eup %2943  ;;  %2277 = vmatmul.mubr.f32.gmra.mrb[68].mxu1 %v1931_v53  ;;  %v4795_v28 = vmul.f32 %v1055_v59, %v4738_v55  ;;  %2951 = vtanh.f32 %v1553_v13  ;;  %v1556_v36 = vmul.f32 0.7978846, %v1428_v12  ;;  %v1427_v46 = vadd.f32 %v1299_v48, %v4549_v50 }
 0x244   : > { %v4792_v26 = vpop.f32.mrb[113].mxu0  ;;  %v1934_v39 = vmul.f32 %v1806_v41, %v4719_v58  ;;  %v1805_v63 = vadd.f32 1.0, %v2944_v62  ;;  %v1057_v1 = vmul.f32 0.044715, %v4777_v42  ;;  %v4802_v51 = vadd.f32 %v4628_v38, %v3576_v30 }
 0x245   : > { %v4805_v24 = vmul.f32 %v1056_v2, %v4755_v57  ;;  %2953 = vtanh.f32 %v1556_v36  ;;  %v1555_v23 = vmul.f32 0.7978846, %v1427_v46  ;;  %v1302_v59 = vmul.f32 %v4649_v27, %v4591_v54 }
 0x246   : > { %v2946_v53 = vpop.eup %2945  ;;  %2281 = vmatprep.mubr.f32.mxu1 %v1934_v39  ;;  %v1933_v58 = vmul.f32 %v1805_v63, %v4728_v47  ;;  %v1058_v12 = vmul.f32 0.044715, %v4790_v20  ;;  %v4815_v38 = vadd.f32 %v4633_v45, %v3579_v31  ;;  %v1301_v2 = vmul.f32 %v4621_v17, %v4575_v0 }
 0x247   : > { %v4809_v13 = vpop.f32.mrb[114].mxu0  ;;  %v2948_v41 = vpop.eup %2947  ;;  %v1808_v62 = vadd.f32 1.0, %v2946_v53  ;;  %v916_v27 = vmul.f32 0.5, %v4564_v37  ;;  %2955 = vtanh.f32 %v1555_v23  ;;  %v1430_v36 = vadd.f32 %v1302_v59, %v4591_v54 }
 0x248   : > { %v4819_v48 = vpop.f32.mrb[115].mxu0  ;;  %2282 = vmatmul.mubr.f32.gmra.mrb[70].mxu1 %v1933_v58  ;;  %v1807_v47 = vadd.f32 1.0, %v2948_v41  ;;  %v4824_v46 = vmul.f32 %v1057_v1, %v4777_v42  ;;  %v1059_v45 = vmul.f32 0.044715, %v4802_v51  ;;  %v1429_v39 = vadd.f32 %v1301_v2, %v4575_v0 }
 0x249   : > { %5529 = vst [vmem:[#allocation13_spill] sm:$0xff] %v4819_v48  ;;  %v1936_v17 = vmul.f32 %v1808_v62, %v4746_v60  ;;  %v915_v63 = vmul.f32 0.5, %v4549_v50  ;;  %v1558_v48 = vmul.f32 0.7978846, %v1430_v36  ;;  %v1304_v37 = vmul.f32 %v4670_v49, %v4626_v21 }
 0x24a   : > { %v1935_v59 = vmul.f32 %v1807_v47, %v4751_v16  ;;  %v4836_v53 = vmul.f32 %v1058_v12, %v4790_v20  ;;  %v1060_v1 = vmul.f32 0.044715, %v4815_v38  ;;  %v1557_v58 = vmul.f32 0.7978846, %v1429_v39 }
 0x24b   : > { %v4832_v23 = vpop.f32.mrb[116].mxu0  ;;  %2286 = vmatprep.mubr.f32.mxu1 %v1936_v17  ;;  %2957 = vtanh.f32 %v1558_v48  ;;  %v4841_v60 = vadd.f32 %v4652_v18, %v3576_v30  ;;  %v1432_v50 = vadd.f32 %v1304_v37, %v4626_v21  ;;  %v1303_v49 = vmul.f32 %v4665_v10, %v4612_v19 }
 0x24c   : > { %v4846_v2 = vpop.f32.mrb[117].mxu0  ;;  %v2950_v16 = vpop.eup %2949  ;;  %2287 = vmatmul.mubr.f32.gmra.mrb[72].mxu1 %v1935_v59  ;;  %v4849_v12 = vmul.f32 %v1059_v45, %v4802_v51  ;;  %v918_v41 = vmul.f32 0.5, %v4591_v54  ;;  %2959 = vtanh.f32 %v1557_v58  ;;  %v4854_v48 = vadd.f32 %v4661_v15, %v3579_v31 }
 0x24d   : > { %v2952_v18 = vpop.eup %2951  ;;  %v1810_v62 = vadd.f32 1.0, %v2950_v16  ;;  %v917_v36 = vmul.f32 0.5, %v4575_v0  ;;  %v1560_v47 = vmul.f32 0.7978846, %v1432_v50  ;;  %v1431_v10 = vadd.f32 %v1303_v49, %v4612_v19 }
 0x24e   : > { %v1809_v17 = vadd.f32 1.0, %v2952_v18  ;;  %v4861_v45 = vmul.f32 %v1060_v1, %v4815_v38  ;;  %v4865_v54 = vadd.f32 %v4678_v52, %v3576_v30  ;;  %v1306_v15 = vmul.f32 %v4695_v43, %v4644_v9 }
 0x24f   : > { %v4858_v39 = vpop.f32.mrb[118].mxu0  ;;  %v2954_v59 = vpop.eup %2953  ;;  %v1938_v0 = vmul.f32 %v1810_v62, %v4773_v61  ;;  %v1061_v58 = vmul.f32 0.044715, %v4841_v60  ;;  %2961 = vtanh.f32 %v1560_v47  ;;  %v1559_v50 = vmul.f32 0.7978846, %v1431_v10 }
 0x250   : > { %v4869_v37 = vpop.f32.mrb[119].mxu0  ;;  %v1937_v49 = vmul.f32 %v1809_v17, %v4786_v6  ;;  %v1812_v1 = vadd.f32 1.0, %v2954_v59  ;;  %v1062_v16 = vmul.f32 0.044715, %v4854_v48  ;;  %v1434_v52 = vadd.f32 %v1306_v15, %v4644_v9 }
 0x251   : > { %5530 = vst [vmem:[#allocation14_spill] sm:$0xff] %v4869_v37  ;;  %v2956_v18 = vpop.eup %2955  ;;  %2291 = vmatprep.mubr.f32.mxu1 %v1938_v0  ;;  %v920_v43 = vmul.f32 0.5, %v4626_v21  ;;  %2963 = vtanh.f32 %v1559_v50  ;;  %v4879_v37 = vadd.f32 %v4684_v4, %v3579_v31  ;;  %v1305_v61 = vmul.f32 %v4687_v35, %v4640_v29  ;;  %v5531_v50 = vld [vmem:[#allocation12_spill] sm:$0xff] }
 0x252   : > { %2292 = vmatmul.mubr.f32.gmra.mrb[74].mxu1 %v1937_v49  ;;  %v1940_v6 = vmul.f32 %v1812_v1, %v916_v27  ;;  %v1811_v47 = vadd.f32 1.0, %v2956_v18  ;;  %v1063_v10 = vmul.f32 0.044715, %v4865_v54  ;;  %v1562_v17 = vmul.f32 0.7978846, %v1434_v52 }
 0x253   : > { %v4883_v62 = vpop.f32.mrb[120].mxu0  ;;  %v4889_v21 = vmul.f32 %v1061_v58, %v4841_v60  ;;  %v919_v59 = vmul.f32 0.5, %v4612_v19  ;;  %v1433_v4 = vadd.f32 %v1305_v61, %v4640_v29  ;;  %v1308_v35 = vmul.f32 %v4734_v56, %v4682_v5 }
 0x254   : > { %v4886_v15 = vpop.f32.mrb[121].mxu0  ;;  %2296 = vmatprep.mubr.f32.mxu1 %v1940_v6  ;;  %v1939_v0 = vmul.f32 %v1811_v47, %v915_v63  ;;  %v4896_v27 = vmul.f32 %v1062_v16, %v4854_v48  ;;  %2965 = vtanh.f32 %v1562_v17  ;;  %v4900_v49 = vadd.f32 %v5531_v50, %v3576_v30 }
 0x255   : > { %v2958_v1 = vpop.eup %2957  ;;  %v4903_v58 = vmul.f32 0.5, %v4644_v9  ;;  %v1561_v19 = vmul.f32 0.7978846, %v1433_v4  ;;  %v1436_v52 = vadd.f32 %v1308_v35, %v4682_v5  ;;  %v1307_v56 = vmul.f32 %v4731_v34, %v4674_v32 }
 0x256   : > { %v2960_v63 = vpop.eup %2959  ;;  %2297 = vmatmul.mubr.f32.gmra.mrb[76].mxu1 %v1939_v0  ;;  %v1814_v16 = vadd.f32 1.0, %v2958_v1  ;;  %v4911_v61 = vmul.f32 %v1063_v10, %v4865_v54  ;;  %v1064_v6 = vmul.f32 0.044715, %v4879_v37  ;;  %v4916_v9 = vadd.f32 %v4714_v44, %v3579_v31 }
 0x257   : > { %v4908_v18 = vpop.f32.mrb[122].mxu0  ;;  %v1813_v17 = vadd.f32 1.0, %v2960_v63  ;;  %v4921_v4 = vmul.f32 0.5, %v4640_v29  ;;  %2967 = vtanh.f32 %v1561_v19  ;;  %v1564_v34 = vmul.f32 0.7978846, %v1436_v52 }
 0x258   : > { %v4918_v47 = vpop.f32.mrb[123].mxu0  ;;  %v1942_v35 = vmul.f32 %v1814_v16, %v918_v41  ;;  %v1065_v0 = vmul.f32 0.044715, %v4900_v49  ;;  %v1435_v10 = vadd.f32 %v1307_v56, %v4674_v32  ;;  %v4927_v50 = vadd.f32 %v4725_v25, %v3576_v30 }
 0x259   : > { %v2962_v1 = vpop.eup %2961  ;;  %v1941_v44 = vmul.f32 %v1813_v17, %v917_v36  ;;  %2969 = vtanh.f32 %v1564_v34  ;;  %v4931_v63 = vadd.f32 %v4742_v3, %v3579_v31  ;;  %v1310_v29 = vmul.f32 %v4763_v11, %v4704_v33 }
 0x25a   : > { %2301 = vmatprep.mubr.f32.mxu1 %v1942_v35  ;;  %v1816_v41 = vadd.f32 1.0, %v2962_v1  ;;  %v4938_v52 = vmul.f32 %v1064_v6, %v4879_v37  ;;  %v1066_v25 = vmul.f32 0.044715, %v4916_v9  ;;  %v1563_v56 = vmul.f32 0.7978846, %v1435_v10 }
 0x25b   : > { %v4935_v19 = vpop.f32.mrb[124].mxu0  ;;  %v2964_v36 = vpop.eup %2963  ;;  %2302 = vmatmul.mubr.f32.gmra.mrb[78].mxu1 %v1941_v44  ;;  %v924_v3 = vmul.f32 0.5, %v4682_v5  ;;  %v4945_v17 = vmul.f32 0.5, %v4674_v32  ;;  %v1438_v11 = vadd.f32 %v1310_v29, %v4704_v33  ;;  %v1309_v34 = vmul.f32 %v4760_v14, %v4699_v7 }
 0x25c   : > { %5532 = vst [vmem:[#allocation12_spill] sm:$0xff] %v4935_v19  ;;  %v4941_v16 = vpop.f32.mrb[125].mxu0  ;;  %v1944_v35 = vmul.f32 %v1816_v41, %v920_v43  ;;  %v1815_v6 = vadd.f32 1.0, %v2964_v36  ;;  %2971 = vtanh.f32 %v1563_v56  ;;  %v1067_v1 = vmul.f32 0.044715, %v4927_v50 }
 0x25d   : > { %5533 = vst [vmem:[#allocation15_spill] sm:$0xff] %v4941_v16  ;;  %v4952_v10 = vmul.f32 %v1065_v0, %v4900_v49  ;;  %v1068_v44 = vmul.f32 0.044715, %v4931_v63  ;;  %v1566_v16 = vmul.f32 0.7978846, %v1438_v11  ;;  %v1437_v5 = vadd.f32 %v1309_v34, %v4699_v7 }
 0x25e   : > { %v2966_v19 = vpop.eup %2965  ;;  %2306 = vmatprep.mubr.f32.mxu1 %v1944_v35  ;;  %v1943_v29 = vmul.f32 %v1815_v6, %v919_v59  ;;  %v4959_v14 = vmul.f32 %v1066_v25, %v4916_v9  ;;  %v4963_v43 = vadd.f32 %v4757_v8, %v3576_v30  ;;  %v1312_v0 = vmul.f32 %v4805_v24, %v4755_v57 }
 0x25f   : > { %v4956_v32 = vpop.f32.mrb[126].mxu0  ;;  %v1818_v56 = vadd.f32 1.0, %v2966_v19  ;;  %2973 = vtanh.f32 %v1566_v16  ;;  %v1565_v36 = vmul.f32 0.7978846, %v1437_v5  ;;  %v4971_v11 = vadd.f32 %v4767_v22, %v3579_v31 }
 0x260   : > { %5534 = vst [vmem:[#allocation16_spill] sm:$0xff] %v4956_v32  ;;  %v4967_v41 = vpop.f32.mrb[127].mxu0  ;;  %2307 = vmatmul.mubr.f32.gmra.mrb[80].mxu1 %v1943_v29  ;;  %v4974_v59 = vmul.f32 %v1067_v1, %v4927_v50  ;;  %v4977_v25 = vmul.f32 0.5, %v4704_v33  ;;  %v1440_v8 = vadd.f32 %v1312_v0, %v4755_v57  ;;  %v1311_v24 = vmul.f32 %v4795_v28, %v4738_v55 }
 0x261   : > { %5535 = vst [vmem:[#allocation17_spill] sm:$0xff] %v4967_v41  ;;  %v2968_v34 = vpop.eup %2967  ;;  %v1946_v19 = vmul.f32 %v1818_v56, %v4903_v58  ;;  %v4984_v16 = vmul.f32 %v1068_v44, %v4931_v63  ;;  %2975 = vtanh.f32 %v1565_v36  ;;  %v4988_v22 = vadd.f32 %v4783_v40, %v3576_v30 }
 0x262   : > { %v1817_v33 = vadd.f32 1.0, %v2968_v34  ;;  %v1568_v6 = vmul.f32 0.7978846, %v1440_v8  ;;  %v1439_v1 = vadd.f32 %v1311_v24, %v4738_v55  ;;  %v4995_v28 = vadd.f32 %v4792_v26, %v3579_v31 }
 0x263   : > { %v4990_v35 = vpop.f32.mrb[128].mxu0  ;;  %v2970_v58 = vpop.eup %2969  ;;  %2311 = vmatprep.mubr.f32.mxu1 %v1946_v19  ;;  %v1069_v44 = vmul.f32 0.044715, %v4963_v43  ;;  %v1070_v29 = vmul.f32 0.044715, %v4971_v11  ;;  %v1314_v40 = vmul.f32 %v4836_v53, %v4790_v20  ;;  %v1313_v0 = vmul.f32 %v4824_v46, %v4777_v42 }
 0x264   : > { %v2090_v5 = vpop.f32.mrb[129].mxu0  ;;  %v5003_v56 = vpop.f32.mrb[0].mxu1  ;;  %v1945_v36 = vmul.f32 %v1817_v33, %v4921_v4  ;;  %v1820_v8 = vadd.f32 1.0, %v2970_v58  ;;  %2977 = vtanh.f32 %v1568_v6  ;;  %v1567_v26 = vmul.f32 0.7978846, %v1439_v1 }
 0x265   : > { %v2110_v24 = vpop.f32.mrb[1].mxu1  ;;  %v925_v34 = vmul.f32 0.5, %v4699_v7  ;;  %v5008_v19 = vmul.f32 0.5, %v4755_v57  ;;  %v1442_v5 = vadd.f32 %v1314_v40, %v4790_v20  ;;  %v1441_v53 = vadd.f32 %v1313_v0, %v4777_v42 }
 0x266   : > { %v2972_v46 = vpop.eup %2971  ;;  %2312 = vmatmul.mubr.f32.gmra.mrb[82].mxu1 %v1945_v36  ;;  %v1948_v32 = vmul.f32 %v1820_v8, %v924_v3  ;;  %2979 = vtanh.f32 %v1567_v26  ;;  %v1071_v4 = vmul.f32 0.044715, %v4988_v22  ;;  %v1072_v33 = vmul.f32 0.044715, %v4995_v28 }
 0x267   : > { %v5012_v41 = vpop.f32.mrb[130].mxu0  ;;  %v1819_v1 = vadd.f32 1.0, %v2972_v46  ;;  %v5017_v7 = vmul.f32 0.5, %v4738_v55  ;;  %v1570_v57 = vmul.f32 0.7978846, %v1442_v5  ;;  %v5020_v40 = vmul.f32 %v1069_v44, %v4963_v43 }
 0x268   : > { %v2095_v6 = vpop.f32.mrb[131].mxu0  ;;  %v1569_v58 = vmul.f32 0.7978846, %v1441_v53  ;;  %2316 = vmatprep.mubr.f32.mxu1 %v1948_v32  ;;  %v5023_v0 = vmul.f32 %v1070_v29, %v4971_v11  ;;  %v5027_v3 = vadd.f32 %v4809_v13, %v3576_v30  ;;  %v1316_v36 = vmul.f32 %v4861_v45, %v4815_v38  ;;  %v5031_v8 = vpop.f32.mrb[2].mxu1  ;;  %v5536_v45 = vld [vmem:[#allocation13_spill] sm:$0xff] }
 0x269   : > { %v2974_v55 = vpop.eup %2973  ;;  %v1947_v26 = vmul.f32 %v1819_v1, %v4945_v17  ;;  %v5035_v32 = vmul.f32 0.5, %v4790_v20  ;;  %2981 = vtanh.f32 %v1570_v57  ;;  %v1315_v44 = vmul.f32 %v4849_v12, %v4802_v51  ;;  %v2115_v29 = vpop.f32.mrb[3].mxu1 }
 0x26a   : > { %v1822_v13 = vadd.f32 1.0, %v2974_v55  ;;  %v5042_v5 = vmul.f32 0.5, %v4777_v42  ;;  %2983 = vtanh.f32 %v1569_v58  ;;  %v5046_v53 = vadd.f32 %v5536_v45, %v3579_v31 }
 0x26b   : > { %v5039_v24 = vpop.f32.mrb[132].mxu0  ;;  %v2976_v46 = vpop.eup %2975  ;;  %2317 = vmatmul.mubr.f32.gmra.mrb[84].mxu1 %v1947_v26  ;;  %v5049_v20 = vmul.f32 %v1071_v4, %v4988_v22  ;;  %v5052_v12 = vmul.f32 %v1072_v33, %v4995_v28  ;;  %v1444_v6 = vadd.f32 %v1316_v36, %v4815_v38  ;;  %v1443_v1 = vadd.f32 %v1315_v44, %v4802_v51 }
 0x26c   : > { %v2100_v17 = vpop.f32.mrb[133].mxu0  ;;  %v1950_v42 = vmul.f32 %v1822_v13, %v4977_v25  ;;  %v1821_v57 = vadd.f32 1.0, %v2976_v46  ;;  %v1073_v58 = vmul.f32 0.044715, %v5027_v3  ;;  %v1318_v55 = vmul.f32 %v4896_v27, %v4854_v48 }
 0x26d   : > { %v5061_v26 = vmul.f32 0.5, %v4815_v38  ;;  %v1572_v4 = vmul.f32 0.7978846, %v1444_v6  ;;  %v1571_v29 = vmul.f32 0.7978846, %v1443_v1  ;;  %v5065_v33 = vadd.f32 %v4832_v23, %v3576_v30 }
 0x26e   : > { %v2978_v36 = vpop.eup %2977  ;;  %2321 = vmatprep.mubr.f32.mxu1 %v1950_v42  ;;  %v1949_v44 = vmul.f32 %v1821_v57, %v925_v34  ;;  %v1074_v25 = vmul.f32 0.044715, %v5046_v53  ;;  %v1446_v13 = vadd.f32 %v1318_v55, %v4854_v48  ;;  %v1317_v45 = vmul.f32 %v4889_v21, %v4841_v60  ;;  %v5071_v27 = vpop.f32.mrb[4].mxu1 }
 0x26f   : > { %v5073_v38 = vpop.f32.mrb[134].mxu0  ;;  %v1824_v17 = vadd.f32 1.0, %v2978_v36  ;;  %2985 = vtanh.f32 %v1572_v4  ;;  %v5076_v46 = vmul.f32 0.5, %v4802_v51  ;;  %v5080_v23 = vadd.f32 %v4846_v2, %v3579_v31  ;;  %v2120_v34 = vpop.f32.mrb[5].mxu1 }
 0x270   : > { %v2105_v6 = vpop.f32.mrb[135].mxu0  ;;  %v2980_v1 = vpop.eup %2979  ;;  %2322 = vmatmul.mubr.f32.gmra.mrb[86].mxu1 %v1949_v44  ;;  %v5083_v42 = vmul.f32 %v1073_v58, %v5027_v3  ;;  %2987 = vtanh.f32 %v1571_v29  ;;  %v1574_v21 = vmul.f32 0.7978846, %v1446_v13  ;;  %v1445_v57 = vadd.f32 %v1317_v45, %v4841_v60  ;;  %v5537_v45 = vld [vmem:[#allocation14_spill] sm:$0xff] }
 0x271   : > { %v1952_v55 = vmul.f32 %v1824_v17, %v5008_v19  ;;  %v1823_v4 = vadd.f32 1.0, %v2980_v1  ;;  %v1075_v51 = vmul.f32 0.044715, %v5065_v33  ;;  %v5090_v2 = vadd.f32 %v4858_v39, %v3576_v30 }
 0x272   : > { %v5093_v36 = vmul.f32 %v1074_v25, %v5046_v53  ;;  %2989 = vtanh.f32 %v1574_v21  ;;  %v1573_v44 = vmul.f32 0.7978846, %v1445_v57  ;;  %v1320_v58 = vmul.f32 %v4938_v52, %v4879_v37 }
 0x273   : > { %v2982_v29 = vpop.eup %2981  ;;  %2326 = vmatprep.mubr.f32.mxu1 %v1952_v55  ;;  %v1951_v13 = vmul.f32 %v1823_v4, %v5017_v7  ;;  %v1076_v19 = vmul.f32 0.044715, %v5080_v23  ;;  %v5101_v17 = vadd.f32 %v5537_v45, %v3579_v31  ;;  %v1319_v39 = vmul.f32 %v4911_v61, %v4865_v54 }
 0x274   : > { %v2984_v25 = vpop.eup %2983  ;;  %v1826_v34 = vadd.f32 1.0, %v2982_v29  ;;  %v934_v6 = vmul.f32 0.5, %v4854_v48  ;;  %2991 = vtanh.f32 %v1573_v44  ;;  %v1448_v52 = vadd.f32 %v1320_v58, %v4879_v37 }
 0x275   : > { %2327 = vmatmul.mubr.f32.gmra.mrb[88].mxu1 %v1951_v13  ;;  %v1825_v1 = vadd.f32 1.0, %v2984_v25  ;;  %v5108_v7 = vmul.f32 %v1075_v51, %v5065_v33  ;;  %v1077_v21 = vmul.f32 0.044715, %v5090_v2  ;;  %v1447_v57 = vadd.f32 %v1319_v39, %v4865_v54  ;;  %v5112_v55 = vpop.f32.mrb[6].mxu1 }
 0x276   : > { %v1954_v61 = vmul.f32 %v1826_v34, %v5035_v32  ;;  %v933_v4 = vmul.f32 0.5, %v4841_v60  ;;  %v1576_v29 = vmul.f32 0.7978846, %v1448_v52  ;;  %v1322_v48 = vmul.f32 %v4959_v14, %v4916_v9  ;;  %v2125_v44 = vpop.f32.mrb[7].mxu1 }
 0x277   : > { %v1953_v58 = vmul.f32 %v1825_v1, %v5042_v5  ;;  %v5120_v51 = vmul.f32 %v1076_v19, %v5080_v23  ;;  %v1078_v13 = vmul.f32 0.044715, %v5101_v17  ;;  %v1575_v45 = vmul.f32 0.7978846, %v1447_v57 }
 0x278   : > { %2331 = vmatprep.mubr.f32.mxu1 %v1954_v61  ;;  %2993 = vtanh.f32 %v1576_v29  ;;  %v5125_v32 = vadd.f32 %v4883_v62, %v3576_v30  ;;  %v1450_v60 = vadd.f32 %v1322_v48, %v4916_v9  ;;  %v1321_v14 = vmul.f32 %v4952_v10, %v4900_v49 }
 0x279   : > { %v2986_v39 = vpop.eup %2985  ;;  %2332 = vmatmul.mubr.f32.gmra.mrb[90].mxu1 %v1953_v58  ;;  %v5131_v5 = vmul.f32 %v1077_v21, %v5090_v2  ;;  %v936_v19 = vmul.f32 0.5, %v4879_v37  ;;  %2995 = vtanh.f32 %v1575_v45  ;;  %v5136_v25 = vadd.f32 %v4886_v15, %v3579_v31 }
 0x27a   : > { %v2988_v34 = vpop.eup %2987  ;;  %v1828_v62 = vadd.f32 1.0, %v2986_v39  ;;  %v935_v52 = vmul.f32 0.5, %v4865_v54  ;;  %v1578_v1 = vmul.f32 0.7978846, %v1450_v60  ;;  %v1449_v57 = vadd.f32 %v1321_v14, %v4900_v49 }
 0x27b   : > { %v1827_v10 = vadd.f32 1.0, %v2988_v34  ;;  %v5141_v61 = vmul.f32 %v1078_v13, %v5101_v17  ;;  %v5145_v21 = vadd.f32 %v4908_v18, %v3576_v30  ;;  %v1324_v37 = vmul.f32 %v4984_v16, %v4931_v63  ;;  %v5149_v15 = vpop.f32.mrb[8].mxu1 }
 0x27c   : > { %v2990_v29 = vpop.eup %2989  ;;  %v1956_v48 = vmul.f32 %v1828_v62, %v5061_v26  ;;  %v1079_v54 = vmul.f32 0.044715, %v5125_v32  ;;  %2997 = vtanh.f32 %v1578_v1  ;;  %v1577_v44 = vmul.f32 0.7978846, %v1449_v57  ;;  %v2130_v58 = vpop.f32.mrb[9].mxu1 }
 0x27d   : > { %v1955_v13 = vmul.f32 %v1827_v10, %v5076_v46  ;;  %v1830_v45 = vadd.f32 1.0, %v2990_v29  ;;  %v1080_v60 = vmul.f32 0.044715, %v5136_v25  ;;  %v1452_v18 = vadd.f32 %v1324_v37, %v4931_v63 }
 0x27e   : > { %v2992_v14 = vpop.eup %2991  ;;  %2336 = vmatprep.mubr.f32.mxu1 %v1956_v48  ;;  %v938_v16 = vmul.f32 0.5, %v4916_v9  ;;  %2999 = vtanh.f32 %v1577_v44  ;;  %v5159_v26 = vadd.f32 %v4918_v47, %v3579_v31  ;;  %v1323_v39 = vmul.f32 %v4974_v59, %v4927_v50  ;;  %v5538_v9 = vld [vmem:[#allocation12_spill] sm:$0xff] }
 0x27f   : > { %2337 = vmatmul.mubr.f32.gmra.mrb[92].mxu1 %v1955_v13  ;;  %v1958_v34 = vmul.f32 %v1830_v45, %v934_v6  ;;  %v1829_v46 = vadd.f32 1.0, %v2992_v14  ;;  %v1081_v62 = vmul.f32 0.044715, %v5145_v21  ;;  %v1580_v1 = vmul.f32 0.7978846, %v1452_v18  ;;  %v5539_v14 = vld [vmem:[#allocation15_spill] sm:$0xff] }
 0x280   : > { %v937_v57 = vmul.f32 0.5, %v4900_v49  ;;  %v1451_v10 = vadd.f32 %v1323_v39, %v4927_v50  ;;  %v5168_v37 = vadd.f32 %v5538_v9, %v3576_v30  ;;  %v1326_v47 = vmul.f32 %v5023_v0, %v4971_v11  ;;  %v5205_v9 = vld [vmem:[%s5513_s4] ss:$0 sm:$0xff] }
 0x281   : > { %2341 = vmatprep.mubr.f32.mxu1 %v1958_v34  ;;  %v1957_v29 = vmul.f32 %v1829_v46, %v933_v4  ;;  %v5173_v59 = vmul.f32 %v1079_v54, %v5125_v32  ;;  %v5176_v6 = vmul.f32 %v1080_v60, %v5136_v25  ;;  %3001 = vtanh.f32 %v1580_v1  ;;  %v5178_v48 = vpop.f32.mrb[10].mxu1 }
 0x282   : > { %v2994_v49 = vpop.eup %2993  ;;  %v5181_v44 = vmul.f32 0.5, %v4931_v63  ;;  %v1579_v58 = vmul.f32 0.7978846, %v1451_v10  ;;  %v1454_v13 = vadd.f32 %v1326_v47, %v4971_v11  ;;  %v1325_v0 = vmul.f32 %v5020_v40, %v4963_v43  ;;  %v2135_v4 = vpop.f32.mrb[11].mxu1 }
 0x283   : > { %v2996_v45 = vpop.eup %2995  ;;  %2342 = vmatmul.mubr.f32.gmra.mrb[94].mxu1 %v1957_v29  ;;  %v1832_v54 = vadd.f32 1.0, %v2994_v49  ;;  %v5187_v60 = vmul.f32 %v1081_v62, %v5145_v21  ;;  %v1082_v18 = vmul.f32 0.044715, %v5159_v26  ;;  %v5192_v39 = vadd.f32 %v5539_v14, %v3579_v31 }
 0x284   : > { %v1831_v63 = vadd.f32 1.0, %v2996_v45  ;;  %3003 = vtanh.f32 %v1579_v58  ;;  %v1083_v34 = vmul.f32 0.044715, %v5168_v37  ;;  %v1582_v46 = vmul.f32 0.7978846, %v1454_v13 }
 0x285   : > { %v1960_v1 = vmul.f32 %v1832_v54, %v936_v19  ;;  %v5196_v40 = vmul.f32 0.5, %v4927_v50  ;;  %v5199_v10 = vmul.f32 0.5, %v4971_v11  ;;  %v1453_v62 = vadd.f32 %v1325_v0, %v4963_v43 }
 0x286   : > { %v2998_v47 = vpop.eup %2997  ;;  %v1959_v29 = vmul.f32 %v1831_v63, %v935_v52  ;;  %3005 = vtanh.f32 %v1582_v46  ;;  %v5208_v49 = vmul.f32 0.5, %v4963_v43  ;;  %v1328_v50 = vmul.f32 %v5052_v12, %v4995_v28  ;;  %v5212_v19 = vpop.f32.mrb[12].mxu1  ;;  %v5540_v46 = vld [vmem:[#allocation16_spill] sm:$0xff] }
 0x287   : > { %2346 = vmatprep.mubr.f32.mxu1 %v1960_v1  ;;  %v1834_v11 = vadd.f32 1.0, %v2998_v47  ;;  %v5215_v58 = vmul.f32 %v1082_v18, %v5159_v26  ;;  %v1084_v13 = vmul.f32 0.044715, %v5192_v39  ;;  %v1581_v0 = vmul.f32 0.7978846, %v1453_v62  ;;  %v2140_v4 = vpop.f32.mrb[13].mxu1 }
 0x288   : > { %v3000_v52 = vpop.eup %2999  ;;  %2347 = vmatmul.mubr.f32.gmra.mrb[96].mxu1 %v1959_v29  ;;  %v5219_v43 = vmul.f32 %v1083_v34, %v5168_v37  ;;  %v1456_v45 = vadd.f32 %v1328_v50, %v4995_v28  ;;  %v1327_v12 = vmul.f32 %v5049_v20, %v4988_v22  ;;  %v2089_v54 = vadd.f32 %v5205_v9, %v4990_v35 }
 0x289   : > { %v1962_v18 = vmul.f32 %v1834_v11, %v938_v16  ;;  %v1833_v14 = vadd.f32 1.0, %v3000_v52  ;;  %3007 = vtanh.f32 %v1581_v0  ;;  %v2109_v63 = vadd.f32 %v5205_v9, %v5003_v56  ;;  %v5541_v16 = vld [vmem:[#allocation17_spill] sm:$0xff] }
 0x28a   : > { %v5230_v1 = vadd.f32 %v5540_v46, %v3576_v30  ;;  %v1584_v34 = vmul.f32 0.7978846, %v1456_v45  ;;  %v1455_v62 = vadd.f32 %v1327_v12, %v4988_v22  ;;  %2407 = vst [vmem:[%s5235_s10] sm:$0xff] %v2089_v54  ;;  %v1330_v35 = vmul.f32 %v5093_v36, %v5046_v53 }
 0x28b   : > { %v3002_v20 = vpop.eup %3001  ;;  %2351 = vmatprep.mubr.f32.mxu1 %v1962_v18  ;;  %v1961_v56 = vmul.f32 %v1833_v14, %v937_v57  ;;  %v5242_v30 = vadd.f32 %v5541_v16, %v3579_v31  ;;  %2411 = vst [vmem:[%s5235_s10 + $0x20] sm:$0xff] %v2109_v63  ;;  %v1329_v47 = vmul.f32 %v5083_v42, %v5027_v3  ;;  %v5249_v50 = vpop.f32.mrb[14].mxu1 }
 0x28c   : > { %v2094_v29 = vadd.f32 %v5205_v9, %v5012_v41  ;;  %v1836_v11 = vadd.f32 1.0, %v3002_v20  ;;  %3009 = vtanh.f32 %v1584_v34  ;;  %v1583_v36 = vmul.f32 0.7978846, %v1455_v62  ;;  %v2145_v57 = vpop.f32.mrb[15].mxu1 }
 0x28d   : > { %v1458_v0 = vadd.f32 %v1330_v35, %v5046_v53  ;;  %2352 = vmatmul.mubr.f32.gmra.mrb[98].mxu1 %v1961_v56  ;;  %v5253_v31 = vmul.f32 %v1084_v13, %v5192_v39  ;;  %v1457_v4 = vadd.f32 %v1329_v47, %v5027_v3  ;;  %v2114_v42 = vadd.f32 %v5205_v9, %v5031_v8 }
 0x28e   : > { %2408 = vst [vmem:[%s5235_s10 + $0x8] sm:$0xff] %v2094_v29  ;;  %v1332_v41 = vmul.f32 %v5120_v51, %v5080_v23  ;;  %v3004_v52 = vpop.eup %3003  ;;  %v1964_v45 = vmul.f32 %v1836_v11, %v5181_v44  ;;  %v1085_v12 = vmul.f32 0.044715, %v5230_v1  ;;  %3011 = vtanh.f32 %v1583_v36 }
 0x28f   : > { %v1586_v54 = vmul.f32 0.7978846, %v1458_v0  ;;  %v1835_v18 = vadd.f32 1.0, %v3004_v52  ;;  %v1585_v14 = vmul.f32 0.7978846, %v1457_v4  ;;  %2412 = vst [vmem:[%s5235_s10 + $0x28] sm:$0xff] %v2114_v42  ;;  %v1331_v8 = vmul.f32 %v5108_v7, %v5065_v33 }
 0x290   : > { %v1460_v13 = vadd.f32 %v1332_v41, %v5080_v23  ;;  %v3006_v63 = vpop.eup %3005  ;;  %2356 = vmatprep.mubr.f32.mxu1 %v1964_v45  ;;  %v1086_v51 = vmul.f32 0.044715, %v5242_v30  ;;  %v2099_v44 = vadd.f32 %v5205_v9, %v5039_v24  ;;  %v2119_v46 = vadd.f32 %v5205_v9, %v5071_v27 }
 0x291   : > { %3013 = vtanh.f32 %v1586_v54  ;;  %v1963_v34 = vmul.f32 %v1835_v18, %v5196_v40  ;;  %v1838_v62 = vadd.f32 1.0, %v3006_v63  ;;  %v5273_v20 = vpop.f32.mrb[16].mxu1  ;;  %v944_v7 = vmul.f32 0.5, %v4995_v28 }
 0x292   : > { %3015 = vtanh.f32 %v1585_v14  ;;  %v1588_v35 = vmul.f32 0.7978846, %v1460_v13  ;;  %v1459_v56 = vadd.f32 %v1331_v8, %v5065_v33  ;;  %2409 = vst [vmem:[%s5235_s10 + $0x10] sm:$0xff] %v2099_v44  ;;  %2413 = vst [vmem:[%s5235_s10 + $0x30] sm:$0xff] %v2119_v46  ;;  %v1334_v16 = vmul.f32 %v5141_v61, %v5101_v17  ;;  %v2150_v27 = vpop.f32.mrb[17].mxu1 }
 0x293   : > { %v1333_v24 = vmul.f32 %v5131_v5, %v5090_v2  ;;  %v3008_v40 = vpop.eup %3007  ;;  %2357 = vmatmul.mubr.f32.gmra.mrb[100].mxu1 %v1963_v34  ;;  %v1966_v47 = vmul.f32 %v1838_v62, %v5199_v10  ;;  %v2104_v28 = vadd.f32 %v5205_v9, %v5073_v38  ;;  %v2124_v29 = vadd.f32 %v5205_v9, %v5112_v55 }
 0x294   : > { %3017 = vtanh.f32 %v1588_v35  ;;  %v1837_v11 = vadd.f32 1.0, %v3008_v40  ;;  %v1587_v36 = vmul.f32 0.7978846, %v1459_v56  ;;  %v1462_v61 = vadd.f32 %v1334_v16, %v5101_v17 }
 0x295   : > { %v1461_v0 = vadd.f32 %v1333_v24, %v5090_v2  ;;  %2361 = vmatprep.mubr.f32.mxu1 %v1966_v47  ;;  %v5291_v5 = vmul.f32 %v1085_v12, %v5230_v1  ;;  %v5294_v57 = vmul.f32 %v1086_v51, %v5242_v30  ;;  %2410 = vst [vmem:[%s5235_s10 + $0x18] sm:$0xff] %v2104_v28  ;;  %2414 = vst [vmem:[%s5235_s10 + $0x38] sm:$0xff] %v2124_v29 }
 0x296   : > { %v1336_v38 = vmul.f32 %v5176_v6, %v5136_v25  ;;  %v1335_v55 = vmul.f32 %v5173_v59, %v5125_v32  ;;  %v3010_v10 = vpop.eup %3009  ;;  %v1965_v4 = vmul.f32 %v1837_v11, %v5208_v49  ;;  %3019 = vtanh.f32 %v1587_v36  ;;  %v5303_v52 = vpop.f32.mrb[18].mxu1 }
 0x297   : > { %v1590_v42 = vmul.f32 0.7978846, %v1462_v61  ;;  %v1589_v41 = vmul.f32 0.7978846, %v1461_v0  ;;  %v1840_v45 = vadd.f32 1.0, %v3010_v10  ;;  %v2129_v6 = vadd.f32 %v5205_v9, %v5149_v15  ;;  %v2155_v18 = vpop.f32.mrb[19].mxu1 }
 0x298   : > { %v1464_v12 = vadd.f32 %v1336_v38, %v5136_v25  ;;  %v1463_v54 = vadd.f32 %v1335_v55, %v5125_v32  ;;  %v3012_v14 = vpop.eup %3011  ;;  %2362 = vmatmul.mubr.f32.gmra.mrb[102].mxu1 %v1965_v4  ;;  %v943_v59 = vmul.f32 0.5, %v4988_v22  ;;  %v946_v49 = vmul.f32 0.5, %v5046_v53 }
 0x299   : > { %3021 = vtanh.f32 %v1590_v42  ;;  %v1338_v13 = vmul.f32 %v5215_v58, %v5159_v26  ;;  %v1968_v8 = vmul.f32 %v1840_v45, %v944_v7  ;;  %v1839_v63 = vadd.f32 1.0, %v3012_v14  ;;  %2415 = vst [vmem:[%s5235_s10 + $0x40] sm:$0xff] %v2129_v6 }
 0x29a   : > { %3023 = vtanh.f32 %v1589_v41  ;;  %v1592_v51 = vmul.f32 0.7978846, %v1464_v12  ;;  %v1591_v46 = vmul.f32 0.7978846, %v1463_v54  ;;  %v1337_v34 = vmul.f32 %v5187_v60, %v5145_v21 }
 0x29b   : > { %v3014_v44 = vpop.eup %3013  ;;  %v1466_v15 = vadd.f32 %v1338_v13, %v5159_v26  ;;  %v2134_v22 = vadd.f32 %v5205_v9, %v5178_v48  ;;  %2366 = vmatprep.mubr.f32.mxu1 %v1968_v8  ;;  %v1967_v62 = vmul.f32 %v1839_v63, %v943_v59  ;;  %v945_v35 = vmul.f32 0.5, %v5027_v3 }
 0x29c   : > { %v3016_v53 = vpop.eup %3015  ;;  %v1842_v58 = vadd.f32 1.0, %v3014_v44  ;;  %3025 = vtanh.f32 %v1592_v51  ;;  %v1465_v16 = vadd.f32 %v1337_v34, %v5145_v21  ;;  %v948_v60 = vmul.f32 0.5, %v5080_v23 }
 0x29d   : > { %v1841_v7 = vadd.f32 1.0, %v3016_v53  ;;  %3027 = vtanh.f32 %v1591_v46  ;;  %v1594_v56 = vmul.f32 0.7978846, %v1466_v15  ;;  %2416 = vst [vmem:[%s5235_s10 + $0x48] sm:$0xff] %v2134_v22  ;;  %2367 = vmatmul.mubr.f32.gmra.mrb[104].mxu1 %v1967_v62  ;;  %v1340_v48 = vmul.f32 %v5253_v31, %v5192_v39 }
 0x29e   : > { %v3018_v24 = vpop.eup %3017  ;;  %v1970_v27 = vmul.f32 %v1842_v58, %v946_v49  ;;  %v1339_v40 = vmul.f32 %v5219_v43, %v5168_v37  ;;  %v947_v3 = vmul.f32 0.5, %v5065_v33  ;;  %v1593_v28 = vmul.f32 0.7978846, %v1465_v16  ;;  %v2158_v29 = vpop.f32.mrb[20].mxu1 }
 0x29f   : > { %v1844_v47 = vadd.f32 1.0, %v3018_v24  ;;  %3029 = vtanh.f32 %v1594_v56  ;;  %v1969_v11 = vmul.f32 %v1841_v7, %v945_v35  ;;  %v1468_v36 = vadd.f32 %v1340_v48, %v5192_v39  ;;  %v2160_v31 = vpop.f32.mrb[21].mxu1 }
 0x2a0   : > { %2371 = vmatprep.mubr.f32.mxu1 %v1970_v27  ;;  %v1467_v61 = vadd.f32 %v1339_v40, %v5168_v37  ;;  %v2139_v23 = vadd.f32 %v5205_v9, %v5212_v19  ;;  %v3020_v0 = vpop.eup %3019  ;;  %v950_v43 = vmul.f32 0.5, %v5101_v17  ;;  %3031 = vtanh.f32 %v1593_v28 }
 0x2a1   : > { %v1972_v38 = vmul.f32 %v1844_v47, %v948_v60  ;;  %v1342_v33 = vmul.f32 %v5294_v57, %v5242_v30  ;;  %2372 = vmatmul.mubr.f32.gmra.mrb[106].mxu1 %v1969_v11  ;;  %v1843_v55 = vadd.f32 1.0, %v3020_v0  ;;  %v1596_v10 = vmul.f32 0.7978846, %v1468_v36 }
 0x2a2   : > { %v1595_v4 = vmul.f32 0.7978846, %v1467_v61  ;;  %2417 = vst [vmem:[%s5235_s10 + $0x50] sm:$0xff] %v2139_v23  ;;  %v1341_v42 = vmul.f32 %v5291_v5, %v5230_v1  ;;  %v2144_v17 = vadd.f32 %v5205_v9, %v5249_v50  ;;  %v2149_v57 = vadd.f32 %v5205_v9, %v5273_v20  ;;  %v2163_v12 = vpop.f32.mrb[22].mxu1 }
 0x2a3   : > { %v3022_v41 = vpop.eup %3021  ;;  %2376 = vmatprep.mubr.f32.mxu1 %v1972_v38  ;;  %v1470_v19 = vadd.f32 %v1342_v33, %v5242_v30  ;;  %v2154_v45 = vadd.f32 %v5205_v9, %v5303_v52  ;;  %v1971_v6 = vmul.f32 %v1843_v55, %v947_v3  ;;  %3033 = vtanh.f32 %v1596_v10  ;;  %v2165_v14 = vpop.f32.mrb[23].mxu1 }
 0x2a4   : > { %v3024_v54 = vpop.eup %3023  ;;  %v1846_v5 = vadd.f32 1.0, %v3022_v41  ;;  %v1469_v18 = vadd.f32 %v1341_v42, %v5230_v1  ;;  %3035 = vtanh.f32 %v1595_v4  ;;  %2418 = vst [vmem:[%s5235_s10 + $0x58] sm:$0xff] %v2144_v17  ;;  %2419 = vst [vmem:[%s5235_s10 + $0x60] sm:$0xff] %v2149_v57  ;;  %v2159_v50 = vadd.f32 %v5205_v9, %v2158_v29 }
 0x2a5   : > { %v1845_v59 = vadd.f32 1.0, %v3024_v54  ;;  %v1598_v49 = vmul.f32 0.7978846, %v1470_v19  ;;  %2420 = vst [vmem:[%s5235_s10 + $0x68] sm:$0xff] %v2154_v45  ;;  %2377 = vmatmul.mubr.f32.gmra.mrb[108].mxu1 %v1971_v6  ;;  %v949_v13 = vmul.f32 0.5, %v5090_v2  ;;  %v2164_v63 = vadd.f32 %v5205_v9, %v2163_v12 }
 0x2a6   : > { %v3026_v20 = vpop.eup %3025  ;;  %v1974_v52 = vmul.f32 %v1846_v5, %v950_v43  ;;  %v1597_v8 = vmul.f32 0.7978846, %v1469_v18  ;;  %v952_v44 = vmul.f32 0.5, %v5136_v25  ;;  %2421 = vst [vmem:[%s5235_s10 + $0x70] sm:$0xff] %v2159_v50  ;;  %v951_v2 = vmul.f32 0.5, %v5125_v32 }
 0x2a7   : > { %v3028_v51 = vpop.eup %3027  ;;  %v1848_v46 = vadd.f32 1.0, %v3026_v20  ;;  %3037 = vtanh.f32 %v1598_v49  ;;  %v1973_v15 = vmul.f32 %v1845_v59, %v949_v13  ;;  %2422 = vst [vmem:[%s5235_s10 + $0x78] sm:$0xff] %v2164_v63  ;;  %v954_v62 = vmul.f32 0.5, %v5159_v26 }
 0x2a8   : > { %2381 = vmatprep.mubr.f32.mxu1 %v1974_v52  ;;  %v1847_v34 = vadd.f32 1.0, %v3028_v51  ;;  %3039 = vtanh.f32 %v1597_v8  ;;  %v953_v48 = vmul.f32 0.5, %v5145_v21  ;;  %v956_v26 = vmul.f32 0.5, %v5192_v39 }
 0x2a9   : > { %v3030_v22 = vpop.eup %3029  ;;  %v1976_v53 = vmul.f32 %v1848_v46, %v952_v44  ;;  %2382 = vmatmul.mubr.f32.gmra.mrb[110].mxu1 %v1973_v15  ;;  %v2168_v35 = vpop.f32.mrb[24].mxu1  ;;  %v955_v31 = vmul.f32 0.5, %v5168_v37  ;;  %v958_v21 = vmul.f32 0.5, %v5242_v30  ;;  %v957_v4 = vmul.f32 0.5, %v5230_v1 }
 0x2aa   : > { %v1850_v58 = vadd.f32 1.0, %v3030_v22  ;;  %v3032_v7 = vpop.eup %3031  ;;  %v2169_v25 = vadd.f32 %v5205_v9, %v2168_v35  ;;  %v2170_v56 = vpop.f32.mrb[25].mxu1  ;;  %v1975_v16 = vmul.f32 %v1847_v34, %v951_v2 }
 0x2ab   : > { %2386 = vmatprep.mubr.f32.mxu1 %v1976_v53  ;;  %v1849_v27 = vadd.f32 1.0, %v3032_v7 }
 0x2ac   : > { %v1978_v24 = vmul.f32 %v1850_v58, %v954_v62  ;;  %2423 = vst [vmem:[%s5235_s10 + $0x80] sm:$0xff] %v2169_v25 }
 0x2ad   : > { %v3034_v60 = vpop.eup %3033  ;;  %2387 = vmatmul.mubr.f32.gmra.mrb[112].mxu1 %v1975_v16  ;;  %v2173_v40 = vpop.f32.mrb[26].mxu1  ;;  %v1977_v29 = vmul.f32 %v1849_v27, %v953_v48 }
 0x2ae   : > { %v3036_v32 = vpop.eup %3035  ;;  %2391 = vmatprep.mubr.f32.mxu1 %v1978_v24  ;;  %v1852_v47 = vadd.f32 1.0, %v3034_v60  ;;  %v2174_v3 = vadd.f32 %v5205_v9, %v2173_v40  ;;  %v2175_v28 = vpop.f32.mrb[27].mxu1 }
 0x2af   : > { %v1851_v11 = vadd.f32 1.0, %v3036_v32 }
 0x2b0   : > { %v1980_v61 = vmul.f32 %v1852_v47, %v956_v26  ;;  %2424 = vst [vmem:[%s5235_s10 + $0x88] sm:$0xff] %v2174_v3 }
 0x2b1   : > { %v3038_v36 = vpop.eup %3037  ;;  %2392 = vmatmul.mubr.f32.gmra.mrb[114].mxu1 %v1977_v29  ;;  %v2178_v38 = vpop.f32.mrb[28].mxu1  ;;  %v1979_v33 = vmul.f32 %v1851_v11, %v955_v31 }
 0x2b2   : > { %v3040_v23 = vpop.eup %3039  ;;  %v1854_v0 = vadd.f32 1.0, %v3038_v36  ;;  %2396 = vmatprep.mubr.f32.mxu1 %v1980_v61  ;;  %v2179_v39 = vadd.f32 %v5205_v9, %v2178_v38  ;;  %v2180_v43 = vpop.f32.mrb[29].mxu1 }
 0x2b3   : > { %v1853_v10 = vadd.f32 1.0, %v3040_v23 }
 0x2b4   : > { %v1982_v55 = vmul.f32 %v1854_v0, %v958_v21  ;;  %2425 = vst [vmem:[%s5235_s10 + $0x90] sm:$0xff] %v2179_v39 }
 0x2b5   : > { %2397 = vmatmul.mubr.f32.gmra.mrb[116].mxu1 %v1979_v33  ;;  %v1981_v37 = vmul.f32 %v1853_v10, %v957_v4 }
 0x2b6   : > { %2401 = vmatprep.mubr.f32.mxu1 %v1982_v55 }
 0x2b7   : > { %v2183_v42 = vpop.f32.mrb[30].mxu1 }
 0x2b8   : > { %v2184_v30 = vadd.f32 %v5205_v9, %v2183_v42  ;;  %v2185_v41 = vpop.f32.mrb[31].mxu1 }
 0x2b9   : > { %2402 = vmatmul.mubr.f32.gmra.mrb[118].mxu1 %v1981_v37 }
 0x2ba   : > { %2426 = vst [vmem:[%s5235_s10 + $0x98] sm:$0xff] %v2184_v30 }
 0x2bb   : > { %v2188_v19 = vpop.f32.mrb[32].mxu1 }
 0x2bc   : > { %v2189_v17 = vadd.f32 %v5205_v9, %v2188_v19  ;;  %v2190_v57 = vpop.f32.mrb[33].mxu1 }
 0x2be   : > { %2427 = vst [vmem:[%s5235_s10 + $0xa0] sm:$0xff] %v2189_v17 }
 0x2c1   : > { %v2193_v45 = vpop.f32.mrb[34].mxu1 }
 0x2c2   : > { %v2194_v12 = vadd.f32 %v5205_v9, %v2193_v45  ;;  %v2195_v1 = vpop.f32.mrb[35].mxu1 }
 0x2c4   : > { %2428 = vst [vmem:[%s5235_s10 + $0xa8] sm:$0xff] %v2194_v12 }
 0x2c5   : > { %v2198_v54 = vpop.f32.mrb[36].mxu1 }
 0x2c6   : > { %v2199_v6 = vadd.f32 %v5205_v9, %v2198_v54  ;;  %v2200_v5 = vpop.f32.mrb[37].mxu1 }
 0x2c8   : > { %2429 = vst [vmem:[%s5235_s10 + $0xb0] sm:$0xff] %v2199_v6 }
 0x2cc   : > { %v2203_v18 = vpop.f32.mrb[38].mxu1 }
 0x2cd   : > { %v2204_v14 = vadd.f32 %v5205_v9, %v2203_v18  ;;  %v2205_v59 = vpop.f32.mrb[39].mxu1 }
 0x2cf   : > { %2430 = vst [vmem:[%s5235_s10 + $0xb8] sm:$0xff] %v2204_v14 }
 0x2d0   : > { %v2208_v49 = vpop.f32.mrb[40].mxu1 }
 0x2d1   : > { %v2209_v50 = vadd.f32 %v5205_v9, %v2208_v49  ;;  %v2210_v20 = vpop.f32.mrb[41].mxu1 }
 0x2d3   : > { %2431 = vst [vmem:[%s5235_s10 + $0xc0] sm:$0xff] %v2209_v50 }
 0x2d5   : > { %v2213_v52 = vpop.f32.mrb[42].mxu1 }
 0x2d6   : > { %v2214_v13 = vadd.f32 %v5205_v9, %v2213_v52  ;;  %v2215_v8 = vpop.f32.mrb[43].mxu1 }
 0x2d8   : > { %2432 = vst [vmem:[%s5235_s10 + $0xc8] sm:$0xff] %v2214_v13 }
 0x2d9   : > { %v2218_v63 = vpop.f32.mrb[44].mxu1 }
 0x2da   : > { %v2219_v51 = vadd.f32 %v5205_v9, %v2218_v63  ;;  %v2220_v44 = vpop.f32.mrb[45].mxu1 }
 0x2dc   : > { %2433 = vst [vmem:[%s5235_s10 + $0xd0] sm:$0xff] %v2219_v51 }
 0x2df   : > { %v2223_v46 = vpop.f32.mrb[46].mxu1 }
 0x2e0   : > { %v2224_v15 = vadd.f32 %v5205_v9, %v2223_v46  ;;  %v2225_v34 = vpop.f32.mrb[47].mxu1 }
 0x2e2   : > { %2434 = vst [vmem:[%s5235_s10 + $0xd8] sm:$0xff] %v2224_v15 }
 0x2e4   : > { %v2228_v22 = vpop.f32.mrb[48].mxu1 }
 0x2e5   : > { %v2229_v53 = vadd.f32 %v5205_v9, %v2228_v22  ;;  %v2230_v2 = vpop.f32.mrb[49].mxu1 }
 0x2e7   : > { %2435 = vst [vmem:[%s5235_s10 + $0xe0] sm:$0xff] %v2229_v53 }
 0x2e9   : > { %v2233_v62 = vpop.f32.mrb[50].mxu1 }
 0x2ea   : > { %v2234_v58 = vadd.f32 %v5205_v9, %v2233_v62  ;;  %v2235_v35 = vpop.f32.mrb[51].mxu1 }
 0x2ec   : > { %2436 = vst [vmem:[%s5235_s10 + $0xe8] sm:$0xff] %v2234_v58 }
 0x2ee   : > { %v2238_v7 = vpop.f32.mrb[52].mxu1 }
 0x2ef   : > { %v2239_v25 = vadd.f32 %v5205_v9, %v2238_v7  ;;  %v2240_v56 = vpop.f32.mrb[53].mxu1 }
 0x2f1   : > { %2437 = vst [vmem:[%s5235_s10 + $0xf0] sm:$0xff] %v2239_v25 }
 0x2f2   : > { %v2243_v16 = vpop.f32.mrb[54].mxu1 }
 0x2f3   : > { %v2244_v24 = vadd.f32 %v5205_v9, %v2243_v16  ;;  %v2245_v27 = vpop.f32.mrb[55].mxu1 }
 0x2f5   : > { %2438 = vst [vmem:[%s5235_s10 + $0xf8] sm:$0xff] %v2244_v24 }
 0x2f8   : > { %v2248_v60 = vpop.f32.mrb[56].mxu1 }
 0x2f9   : > { %v2249_v48 = vadd.f32 %v5205_v9, %v2248_v60  ;;  %v2250_v40 = vpop.f32.mrb[57].mxu1 }
 0x2fb   : > { %2439 = vst [vmem:[%s5235_s10 + $0x100] sm:$0xff] %v2249_v48 }
 0x2fc   : > { %v2253_v32 = vpop.f32.mrb[58].mxu1 }
 0x2fd   : > { %v2254_v26 = vadd.f32 %v5205_v9, %v2253_v32  ;;  %v2255_v47 = vpop.f32.mrb[59].mxu1 }
 0x2ff   : > { %2440 = vst [vmem:[%s5235_s10 + $0x108] sm:$0xff] %v2254_v26 }
 0x301   : > { %v2258_v3 = vpop.f32.mrb[60].mxu1 }
 0x302   : > { %v2259_v28 = vadd.f32 %v5205_v9, %v2258_v3  ;;  %v2260_v29 = vpop.f32.mrb[61].mxu1 }
 0x304   : > { %2441 = vst [vmem:[%s5235_s10 + $0x110] sm:$0xff] %v2259_v28 }
 0x306   : > { %v2263_v11 = vpop.f32.mrb[62].mxu1 }
 0x307   : > { %v2264_v36 = vadd.f32 %v5205_v9, %v2263_v11  ;;  %v2265_v61 = vpop.f32.mrb[63].mxu1 }
 0x309   : > { %2442 = vst [vmem:[%s5235_s10 + $0x118] sm:$0xff] %v2264_v36 }
 0x30c   : > { %v2268_v23 = vpop.f32.mrb[64].mxu1 }
 0x30d   : > { %v2269_v31 = vadd.f32 %v5205_v9, %v2268_v23  ;;  %v2270_v21 = vpop.f32.mrb[65].mxu1 }
 0x30f   : > { %2443 = vst [vmem:[%s5235_s10 + $0x120] sm:$0xff] %v2269_v31 }
 0x311   : > { %v2273_v0 = vpop.f32.mrb[66].mxu1 }
 0x312   : > { %v2274_v38 = vadd.f32 %v5205_v9, %v2273_v0  ;;  %v2275_v39 = vpop.f32.mrb[67].mxu1 }
 0x314   : > { %2444 = vst [vmem:[%s5235_s10 + $0x128] sm:$0xff] %v2274_v38 }
 0x316   : > { %v2278_v43 = vpop.f32.mrb[68].mxu1 }
 0x317   : > { %v2279_v33 = vadd.f32 %v5205_v9, %v2278_v43  ;;  %v2280_v55 = vpop.f32.mrb[69].mxu1 }
 0x319   : > { %2445 = vst [vmem:[%s5235_s10 + $0x130] sm:$0xff] %v2279_v33 }
 0x31b   : > { %v2283_v10 = vpop.f32.mrb[70].mxu1 }
 0x31c   : > { %v2284_v4 = vadd.f32 %v5205_v9, %v2283_v10  ;;  %v2285_v37 = vpop.f32.mrb[71].mxu1 }
 0x31e   : > { %2446 = vst [vmem:[%s5235_s10 + $0x138] sm:$0xff] %v2284_v4 }
 0x31f   : > { %v2288_v42 = vpop.f32.mrb[72].mxu1 }
 0x320   : > { %v2289_v30 = vadd.f32 %v5205_v9, %v2288_v42  ;;  %v2290_v41 = vpop.f32.mrb[73].mxu1 }
 0x322   : > { %2447 = vst [vmem:[%s5235_s10 + $0x140] sm:$0xff] %v2289_v30 }
 0x325   : > { %v2293_v19 = vpop.f32.mrb[74].mxu1 }
 0x326   : > { %v2294_v17 = vadd.f32 %v5205_v9, %v2293_v19  ;;  %v2295_v57 = vpop.f32.mrb[75].mxu1 }
 0x328   : > { %2448 = vst [vmem:[%s5235_s10 + $0x148] sm:$0xff] %v2294_v17 }
 0x329   : > { %v2298_v45 = vpop.f32.mrb[76].mxu1 }
 0x32a   : > { %v2299_v12 = vadd.f32 %v5205_v9, %v2298_v45  ;;  %v2300_v1 = vpop.f32.mrb[77].mxu1 }
 0x32c   : > { %2449 = vst [vmem:[%s5235_s10 + $0x150] sm:$0xff] %v2299_v12 }
 0x32e   : > { %v2303_v54 = vpop.f32.mrb[78].mxu1 }
 0x32f   : > { %v2304_v6 = vadd.f32 %v5205_v9, %v2303_v54  ;;  %v2305_v5 = vpop.f32.mrb[79].mxu1 }
 0x331   : > { %2450 = vst [vmem:[%s5235_s10 + $0x158] sm:$0xff] %v2304_v6 }
 0x333   : > { %v2308_v18 = vpop.f32.mrb[80].mxu1 }
 0x334   : > { %v2309_v14 = vadd.f32 %v5205_v9, %v2308_v18  ;;  %v2310_v59 = vpop.f32.mrb[81].mxu1 }
 0x336   : > { %2451 = vst [vmem:[%s5235_s10 + $0x160] sm:$0xff] %v2309_v14 }
 0x339   : > { %v2313_v49 = vpop.f32.mrb[82].mxu1 }
 0x33a   : > { %v2314_v50 = vadd.f32 %v5205_v9, %v2313_v49  ;;  %v2315_v20 = vpop.f32.mrb[83].mxu1 }
 0x33c   : > { %2452 = vst [vmem:[%s5235_s10 + $0x168] sm:$0xff] %v2314_v50 }
 0x33e   : > { %v2318_v52 = vpop.f32.mrb[84].mxu1 }
 0x33f   : > { %v2319_v13 = vadd.f32 %v5205_v9, %v2318_v52  ;;  %v2320_v8 = vpop.f32.mrb[85].mxu1 }
 0x341   : > { %2453 = vst [vmem:[%s5235_s10 + $0x170] sm:$0xff] %v2319_v13 }
 0x343   : > { %v2323_v63 = vpop.f32.mrb[86].mxu1 }
 0x344   : > { %v2324_v51 = vadd.f32 %v5205_v9, %v2323_v63  ;;  %v2325_v44 = vpop.f32.mrb[87].mxu1 }
 0x346   : > { %2454 = vst [vmem:[%s5235_s10 + $0x178] sm:$0xff] %v2324_v51 }
 0x348   : > { %v2328_v46 = vpop.f32.mrb[88].mxu1 }
 0x349   : > { %v2329_v15 = vadd.f32 %v5205_v9, %v2328_v46  ;;  %v2330_v34 = vpop.f32.mrb[89].mxu1 }
 0x34b   : > { %2455 = vst [vmem:[%s5235_s10 + $0x180] sm:$0xff] %v2329_v15 }
 0x34c   : > { %v2333_v22 = vpop.f32.mrb[90].mxu1 }
 0x34d   : > { %v2334_v53 = vadd.f32 %v5205_v9, %v2333_v22  ;;  %v2335_v2 = vpop.f32.mrb[91].mxu1 }
 0x34f   : > { %2456 = vst [vmem:[%s5235_s10 + $0x188] sm:$0xff] %v2334_v53 }
 0x352   : > { %v2338_v62 = vpop.f32.mrb[92].mxu1 }
 0x353   : > { %v2339_v58 = vadd.f32 %v5205_v9, %v2338_v62  ;;  %v2340_v35 = vpop.f32.mrb[93].mxu1 }
 0x355   : > { %2457 = vst [vmem:[%s5235_s10 + $0x190] sm:$0xff] %v2339_v58 }
 0x356   : > { %v2343_v7 = vpop.f32.mrb[94].mxu1 }
 0x357   : > { %v2344_v25 = vadd.f32 %v5205_v9, %v2343_v7  ;;  %v2345_v56 = vpop.f32.mrb[95].mxu1 }
 0x359   : > { %2458 = vst [vmem:[%s5235_s10 + $0x198] sm:$0xff] %v2344_v25 }
 0x35b   : > { %v2348_v16 = vpop.f32.mrb[96].mxu1 }
 0x35c   : > { %v2349_v24 = vadd.f32 %v5205_v9, %v2348_v16  ;;  %v2350_v27 = vpop.f32.mrb[97].mxu1 }
 0x35e   : > { %2459 = vst [vmem:[%s5235_s10 + $0x1a0] sm:$0xff] %v2349_v24 }
 0x360   : > { %v2353_v60 = vpop.f32.mrb[98].mxu1 }
 0x361   : > { %v2354_v48 = vadd.f32 %v5205_v9, %v2353_v60  ;;  %v2355_v40 = vpop.f32.mrb[99].mxu1 }
 0x363   : > { %2460 = vst [vmem:[%s5235_s10 + $0x1a8] sm:$0xff] %v2354_v48 }
 0x366   : > { %v2358_v32 = vpop.f32.mrb[100].mxu1 }
 0x367   : > { %v2359_v26 = vadd.f32 %v5205_v9, %v2358_v32  ;;  %v2360_v47 = vpop.f32.mrb[101].mxu1 }
 0x369   : > { %2461 = vst [vmem:[%s5235_s10 + $0x1b0] sm:$0xff] %v2359_v26 }
 0x36b   : > { %v2363_v3 = vpop.f32.mrb[102].mxu1 }
 0x36c   : > { %v2364_v28 = vadd.f32 %v5205_v9, %v2363_v3  ;;  %v2365_v29 = vpop.f32.mrb[103].mxu1 }
 0x36e   : > { %2462 = vst [vmem:[%s5235_s10 + $0x1b8] sm:$0xff] %v2364_v28 }
 0x370   : > { %v2368_v11 = vpop.f32.mrb[104].mxu1 }
 0x371   : > { %v2369_v36 = vadd.f32 %v5205_v9, %v2368_v11  ;;  %v2370_v61 = vpop.f32.mrb[105].mxu1 }
 0x373   : > { %2463 = vst [vmem:[%s5235_s10 + $0x1c0] sm:$0xff] %v2369_v36 }
 0x374   : > { %v2373_v23 = vpop.f32.mrb[106].mxu1 }
 0x375   : > { %v2374_v31 = vadd.f32 %v5205_v9, %v2373_v23  ;;  %v2375_v21 = vpop.f32.mrb[107].mxu1 }
 0x377   : > { %2464 = vst [vmem:[%s5235_s10 + $0x1c8] sm:$0xff] %v2374_v31 }
 0x378   : > { %v2378_v0 = vpop.f32.mrb[108].mxu1 }
 0x379   : > { %v2379_v38 = vadd.f32 %v5205_v9, %v2378_v0  ;;  %v2380_v39 = vpop.f32.mrb[109].mxu1 }
 0x37b   : > { %2465 = vst [vmem:[%s5235_s10 + $0x1d0] sm:$0xff] %v2379_v38 }
 0x37c   : > { %v2383_v43 = vpop.f32.mrb[110].mxu1 }
 0x37d   : > { %v2384_v33 = vadd.f32 %v5205_v9, %v2383_v43  ;;  %v2385_v55 = vpop.f32.mrb[111].mxu1 }
 0x37f   : > { %2466 = vst [vmem:[%s5235_s10 + $0x1d8] sm:$0xff] %v2384_v33 }
 0x380   : > { %v2388_v10 = vpop.f32.mrb[112].mxu1 }
 0x381   : > { %v2389_v4 = vadd.f32 %v5205_v9, %v2388_v10  ;;  %v2390_v37 = vpop.f32.mrb[113].mxu1 }
 0x383   : > { %2467 = vst [vmem:[%s5235_s10 + $0x1e0] sm:$0xff] %v2389_v4 }
 0x384   : > { %v2393_v42 = vpop.f32.mrb[114].mxu1 }
 0x385   : > { %v2394_v30 = vadd.f32 %v5205_v9, %v2393_v42  ;;  %v2395_v41 = vpop.f32.mrb[115].mxu1 }
 0x387   : > { %2468 = vst [vmem:[%s5235_s10 + $0x1e8] sm:$0xff] %v2394_v30 }
 0x388   : > { %v2398_v19 = vpop.f32.mrb[116].mxu1 }
 0x389   : > { %v2399_v17 = vadd.f32 %v5205_v9, %v2398_v19  ;;  %v2400_v57 = vpop.f32.mrb[117].mxu1 }
 0x38b   : > { %2469 = vst [vmem:[%s5235_s10 + $0x1f0] sm:$0xff] %v2399_v17 }
 0x38c   : > { %v2403_v45 = vpop.f32.mrb[118].mxu1 }
 0x38d   : > { %v2404_v12 = vadd.f32 %v5205_v9, %v2403_v45  ;;  %v2405_v1 = vpop.f32.mrb[119].mxu1 }
 0x38f   : > { %2470 = vst [vmem:[%s5235_s10 + $0x1f8] sm:$0xff] %v2404_v12 }
 0x390   : > { %3140 = shalt.err (!%p3137_p2)
}
 0x391   : > { %s3141_s14 = scalar_lea.hbm %s5461_s11, 8192  ;;  %s3145_s12 = scalar_lea.hbm %s5514_s5, 16384 }
 0x392   : > { %p3142_p13 = scmp.ne.s32.totalorder %s5461_s11, %s3141_s14  ;;  %p3146_p4 = scmp.lt.u32.totalorder %s5461_s11, %s5514_s5 }
 0x393   : > { %p3147_p7 = scmp.lt.u32.totalorder %s3145_s12, %s3141_s14  ;;  %p3149_p11 = scmp.lt.u32.totalorder %s3141_s14, %s5461_s11 }
 0x394   : > { %p3143_p6 = pnand %p3142_p13, %p5542_p0 }
 0x395   : > { %p3148_p8 = por %p3147_p7, %p3146_p4 }
 0x396   : > { %p3144_p10 = pneg %p3143_p6 }
 0x397   : > { %p3150_p1 = por %p3149_p11, %p3148_p8 }
 0x399   : > { %p3151_p3 = pnand %p3150_p1, %p3144_p10 }
 0x39b   : > { %3154 = shalt.err (!%p3151_p3)
}
 0x39c   : > { %s3209_s28 = smov 128   ;;  %s3210_s9 = smov 8  }
 0x39d   : > { %2720 = dma.vmem_to_hbm [thread:$0]  (%p5542_p0), %s5463_s15, 8192, %s5461_s11, %s2472_s23, %s3209_s28, %s3209_s28, %s3210_s9  }
 0x39e PF: > { %s2500_s30 = sand.u32 1, %s3185_s18   ;;  %p5543_p5 = scmp.ne.s32.totalorder %s5519_s25, 0 }
 0x39f   : > { %p5544_p9 = scmp.ge.s32.totalorder %s3197_s21, 2  ;;  %s2501_s7 = scalar_lea.sflag [#allocation4], %s2500_s30 }
 0x3a1   : > { %p2734_p12 = pnand %p5544_p9, %p5543_p5 }
 0x3a3   : > { %3180 = dma.done.wait (!%p2734_p12), %s2501_s7, 8192  }
 0x3a4   : > { %3182 = vsyncadd (!%p2734_p12), %s2501_s7, 4294959104  ;;  %p19_p2 = scmp.ge.s32.totalorder %s3354_s16, 4   ;;  %s5545_s18 = smov %s3189_s19 }
 0x3a5   : > { %s5546_s19 = smov %s3193_s20  ;;  %s5547_s20 = smov %s3363_s27 }
 0x3a6   : > { %s5548_s21 = smov %s3354_s16  ;;  %21 = sbr.rel (!%p19_p2) target bundleno = 6 (0x6), region = 93 }
 0x3ad   :  { %2506 = vsyncpa [#allocation3], 1 }
 0x3ae   :  { %2508 = vsyncpa [#allocation3 + $0x1], 1 }
 0x3af   :  { %2509 = vsyncpa [#allocation6], 1 }
 0x3b0   :  { %2510 = vsyncpa [#allocation4], 1 }
 0x3b1   :  { %2512 = vsyncpa [#allocation4 + $0x1], 1 }

</bundles_post_ra>
